<compile_context>
chip_gen: v5e
topology: v5e:2x2
jax: 0.10.0
libtpu: 0.0.40
codegen_flags: <defaults>
</compile_context>

<pallas_src>
import functools

import jax
import jax.numpy as jnp
from jax.experimental import pallas as pl
from jax.experimental.pallas import tpu as pltpu


def _round_up(a, b):
    return (a + b - 1) // b * b


# ----------------------------------------------------------------------------
# Pallas kernel: out_tile = x_tile @ w + b   (bf16 operands, f32 accumulate)
# ----------------------------------------------------------------------------
def _matmul_bias_kernel(x_ref, w_ref, b_ref, o_ref):
    acc = jnp.dot(x_ref[...], w_ref[...], preferred_element_type=jnp.float32)
    o_ref[...] = (acc + b_ref[...]).astype(o_ref.dtype)


def matmul_bias(x, w, b, *, tile_m=1024, out_dtype=jnp.float32):
    """x: (M, K), w: (K, N), b: (N,) -> (M, N). Gridded (pipelined) over M;
    weights/bias stay resident (constant index_map => no re-DMA)."""
    M, K = x.shape
    K2, N = w.shape
    assert K == K2
    b2 = b.reshape(1, N).astype(jnp.float32)

    tm = min(tile_m, _round_up(M, 8))
    M_pad = _round_up(M, tm)
    if M_pad != M:
        x = jnp.pad(x, ((0, M_pad - M), (0, 0)))

    out = pl.pallas_call(
        _matmul_bias_kernel,
        out_shape=jax.ShapeDtypeStruct((M_pad, N), out_dtype),
        grid=(M_pad // tm,),
        in_specs=[
            pl.BlockSpec((tm, K), lambda i: (i, 0)),
            pl.BlockSpec((K, N), lambda i: (0, 0)),
            pl.BlockSpec((1, N), lambda i: (0, 0)),
        ],
        out_specs=pl.BlockSpec((tm, N), lambda i: (i, 0)),
        compiler_params=pltpu.CompilerParams(
            dimension_semantics=("parallel",),
            vmem_limit_bytes=48 * 1024 * 1024,
        ),
    )(x, w, b2)
    return out[:M] if M_pad != M else out


# ----------------------------------------------------------------------------
# Pallas kernel: fused MLP head  relu(x@w1+b1) -> relu(.@w2+b2) -> .@w3+b3
# Intermediates never leave VMEM; (B, 2) output written once.
# ----------------------------------------------------------------------------
def _fused_mlp_kernel(x_ref, w1_ref, b1_ref, w2_ref, b2_ref, w3_ref, b3_ref,
                      o_ref):
    h = jnp.dot(x_ref[...], w1_ref[...], preferred_element_type=jnp.float32)
    h = jnp.maximum(h + b1_ref[...], 0.0)
    h = jnp.dot(h.astype(w2_ref.dtype), w2_ref[...],
                preferred_element_type=jnp.float32)
    h = jnp.maximum(h + b2_ref[...], 0.0)
    o = jnp.dot(h.astype(w3_ref.dtype), w3_ref[...],
                preferred_element_type=jnp.float32)
    o_ref[...] = (o + b3_ref[...]).astype(o_ref.dtype)


def fused_mlp(x, w1, b1, w2, b2, w3, b3, *, tile_b=256):
    """x: (B, F) bf16, weights bf16, biases f32 -> (B, n_components) f32."""
    B, F = x.shape
    N1, N2, N3 = w1.shape[1], w2.shape[1], w3.shape[1]
    b1r = b1.reshape(1, N1).astype(jnp.float32)
    b2r = b2.reshape(1, N2).astype(jnp.float32)
    b3r = b3.reshape(1, N3).astype(jnp.float32)

    tb = min(tile_b, _round_up(B, 8))
    B_pad = _round_up(B, tb)
    if B_pad != B:
        x = jnp.pad(x, ((0, B_pad - B), (0, 0)))

    out = pl.pallas_call(
        _fused_mlp_kernel,
        out_shape=jax.ShapeDtypeStruct((B_pad, N3), jnp.float32),
        grid=(B_pad // tb,),
        in_specs=[
            pl.BlockSpec((tb, F), lambda i: (i, 0)),
            pl.BlockSpec((F, N1), lambda i: (0, 0)),
            pl.BlockSpec((1, N1), lambda i: (0, 0)),
            pl.BlockSpec((N1, N2), lambda i: (0, 0)),
            pl.BlockSpec((1, N2), lambda i: (0, 0)),
            pl.BlockSpec((N2, N3), lambda i: (0, 0)),
            pl.BlockSpec((1, N3), lambda i: (0, 0)),
        ],
        out_specs=pl.BlockSpec((tb, N3), lambda i: (i, 0)),
        compiler_params=pltpu.CompilerParams(
            dimension_semantics=("parallel",),
            vmem_limit_bytes=48 * 1024 * 1024,
        ),
    )(x, w1, b1r, w2, b2r, w3, b3r)
    return out[:B] if B_pad != B else out


# ----------------------------------------------------------------------------
# Conv2d in NHWC via im2col + Pallas matmul (no activation transposes)
# ----------------------------------------------------------------------------
def _im2col_nhwc(x_nhwc, k, stride, pad):
    """x: (B, H, W, C) -> patches (B*OH*OW, k*k*C) with feature ordering
    (kh, kw, C), plus (OH, OW)."""
    B, H, W, C = x_nhwc.shape
    xp = jnp.pad(x_nhwc, ((0, 0), (pad, pad), (pad, pad), (0, 0)))
    OH = (H + 2 * pad - k) // stride + 1
    OW = (W + 2 * pad - k) // stride + 1
    cols = []
    for i in range(k):
        for j in range(k):
            cols.append(
                xp[:, i:i + stride * OH:stride, j:j + stride * OW:stride, :]
            )  # (B, OH, OW, C)
    p = jnp.stack(cols, axis=3)                      # (B, OH, OW, k*k, C)
    p = p.reshape(B * OH * OW, k * k * C)
    return p, OH, OW


def conv2d_nhwc(x_nhwc, weight, bias, *, stride, padding, tile_m=1024,
                out_dtype=jnp.bfloat16):
    """weight: (OC, C, k, k) PyTorch layout, bias: (OC,). NHWC in -> NHWC out."""
    OC, C, k, _ = weight.shape
    B = x_nhwc.shape[0]
    patches, OH, OW = _im2col_nhwc(x_nhwc, k, stride, padding)
    # weight permuted to (kh, kw, C, OC) -> (k*k*C, OC); matches patch ordering.
    w2 = weight.transpose(2, 3, 1, 0).reshape(k * k * C, OC).astype(jnp.bfloat16)
    out = matmul_bias(patches, w2, bias.astype(jnp.float32),
                      tile_m=tile_m, out_dtype=out_dtype)  # (B*OH*OW, OC)
    return out.reshape(B, OH, OW, OC)


# ----------------------------------------------------------------------------
# ConvEncoder init + forward
# ----------------------------------------------------------------------------
def conv_encoder_init(key, input_shape, conv1_filters=64, conv2_filters=128,
                      conv_kernel_size=3, conv_stride=2, conv_padding=1,
                      n_features_linear=512, n_components=2):
    C, H, W = input_shape
    k = conv_kernel_size
    OH1 = (H + 2 * conv_padding - k) // conv_stride + 1
    OW1 = (W + 2 * conv_padding - k) // conv_stride + 1
    OH2 = (OH1 + 2 * conv_padding - k) // conv_stride + 1
    OW2 = (OW1 + 2 * conv_padding - k) // conv_stride + 1
    in_features = conv2_filters * OH2 * OW2  # PyTorch NCHW-flatten count

    ks = jax.random.split(key, 10)

    def uinit(kk, shape, fan_in):
        bound = 1.0 / jnp.sqrt(fan_in)
        return jax.random.uniform(kk, shape, jnp.float32, -bound, bound)

    params = {
        # PyTorch layouts kept for all parameters.
        "conv1_w": uinit(ks[0], (conv1_filters, C, k, k), C * k * k),
        "conv1_b": uinit(ks[1], (conv1_filters,), C * k * k),
        "conv2_w": uinit(ks[2], (conv2_filters, conv1_filters, k, k),
                         conv1_filters * k * k),
        "conv2_b": uinit(ks[3], (conv2_filters,), conv1_filters * k * k),
        # fc weights stored as (in, out); fc1 rows indexed by NCHW-flatten order.
        "fc1_w": uinit(ks[4], (in_features, n_features_linear), in_features),
        "fc1_b": uinit(ks[5], (n_features_linear,), in_features),
        "fc2_w": uinit(ks[6], (n_features_linear, n_features_linear),
                       n_features_linear),
        "fc2_b": uinit(ks[7], (n_features_linear,), n_features_linear),
        "fc3_w": uinit(ks[8], (n_features_linear, n_components),
                       n_features_linear),
        "fc3_b": uinit(ks[9], (n_components,), n_features_linear),
    }
    hparams = dict(stride=conv_stride, padding=conv_padding)
    return params, hparams


@functools.partial(jax.jit, static_argnames=("stride", "padding"))
def conv_encoder_forward(params, x_nchw, *, stride=2, padding=1):
    # One small input transpose NCHW -> NHWC; everything after stays NHWC.
    x = jnp.transpose(x_nchw, (0, 2, 3, 1)).astype(jnp.bfloat16)

    h1 = conv2d_nhwc(x, params["conv1_w"], params["conv1_b"],
                     stride=stride, padding=padding)          # (B, OH1, OW1, 64)
    h2 = conv2d_nhwc(h1, params["conv2_w"], params["conv2_b"],
                     stride=stride, padding=padding)          # (B, OH2, OW2, 128)

    B, OH2, OW2, C2 = h2.shape
    feats = h2.reshape(B, OH2 * OW2 * C2)                     # NHWC flatten (bf16)

    # Permute fc1 rows from PyTorch NCHW-flatten order to NHWC-flatten order
    # (weight-side permutation; no activation transpose).
    fc1_w = (params["fc1_w"]
             .reshape(C2, OH2, OW2, -1)
             .transpose(1, 2, 0, 3)
             .reshape(OH2 * OW2 * C2, -1))

    out = fused_mlp(
        feats,
        fc1_w.astype(jnp.bfloat16), params["fc1_b"],
        params["fc2_w"].astype(jnp.bfloat16), params["fc2_b"],
        params["fc3_w"].astype(jnp.bfloat16), params["fc3_b"],
    )
    return out


if __name__ == "__main__":
    key = jax.random.PRNGKey(0)
    k_param, k_x = jax.random.split(key)

    input_shape = (1, 16, 16)  # (channels, freq bins, time bins)
    batch = 2
    params, hp = conv_encoder_init(k_param, input_shape)

    x = jax.random.normal(k_x, (batch, *input_shape), dtype=jnp.float32)

    y = conv_encoder_forward(params, x, stride=hp["stride"],
                             padding=hp["padding"])
    y = jax.block_until_ready(y)
    assert y.shape == (batch, 2), y.shape
    print("KERNEL_OK")
</pallas_src>

<mosaic_0001>
module attributes {stable_mosaic.version = 11 : i64} {
  func.func @_matmul_bias_kernel(%arg0: i32, %arg1: memref<128x9xbf16, #tpu.memory_space<vmem>>, %arg2: memref<9x64xbf16, #tpu.memory_space<vmem>>, %arg3: memref<1x64xf32, #tpu.memory_space<vmem>>, %arg4: memref<128x64xbf16, #tpu.memory_space<vmem>>) attributes {dimension_semantics = [#tpu.dimension_semantics<parallel>], iteration_bounds = array<i64: 1>, scalar_prefetch = 0 : i64, scratch_operands = 0 : i64, tpu.core_type = #tpu.core_type<tc>, window_params = [{transform_indices = @transform_0, window_bounds = array<i64: 128, 9>}, {pipeline_mode = #tpu.pipeline_mode<synchronous>, transform_indices = @transform_1, window_bounds = array<i64: 9, 64>}, {pipeline_mode = #tpu.pipeline_mode<synchronous>, transform_indices = @transform_2, window_bounds = array<i64: 1, 64>}, {transform_indices = @transform_3, window_bounds = array<i64: 128, 64>}]} {
    %c0 = arith.constant 0 : index
    %c0_0 = arith.constant 0 : index
    %0 = vector.load %arg1[%c0, %c0_0] : memref<128x9xbf16, #tpu.memory_space<vmem>>, vector<128x9xbf16>
    %c0_1 = arith.constant 0 : index
    %c0_2 = arith.constant 0 : index
    %1 = vector.load %arg2[%c0_1, %c0_2] : memref<9x64xbf16, #tpu.memory_space<vmem>>, vector<9x64xbf16>
    %cst = arith.constant dense<0.000000e+00> : vector<128x64xf32>
    %2 = tpu.matmul %0, %1, %cst {dimension_numbers = #tpu.dot_dimension_numbers<[1], [0], [0], [1], [0, 0, 1, 1], [], []>} : vector<128x9xbf16>, vector<9x64xbf16>, vector<128x64xf32> -> vector<128x64xf32>
    %c0_3 = arith.constant 0 : index
    %c0_4 = arith.constant 0 : index
    %3 = vector.load %arg3[%c0_3, %c0_4] : memref<1x64xf32, #tpu.memory_space<vmem>>, vector<1x64xf32>
    %4 = vector.broadcast %3 : vector<1x64xf32> to vector<128x64xf32>
    %5 = arith.addf %2, %4 : vector<128x64xf32>
    %6 = arith.truncf %5 : vector<128x64xf32> to vector<128x64xbf16>
    %c0_5 = arith.constant 0 : index
    %c0_6 = arith.constant 0 : index
    %7 = vector.load %arg4[%c0_5, %c0_6] : memref<128x64xbf16, #tpu.memory_space<vmem>>, vector<128x64xbf16>
    tpu.vector_store %arg4[%c0_5, %c0_6], %6 {strides = array<i32>} : memref<128x64xbf16, #tpu.memory_space<vmem>>, vector<128x64xbf16>,
    return
  }
  func.func @transform_0(%arg0: i32) -> (i32, i32) {
    %c0_i32 = arith.constant 0 : i32
    %c0_i32_0 = arith.constant 0 : i32
    return %arg0, %c0_i32 : i32, i32
  }
  func.func @transform_1(%arg0: i32) -> (i32, i32) {
    %c0_i32 = arith.constant 0 : i32
    %c0_i32_0 = arith.constant 0 : i32
    %c0_i32_1 = arith.constant 0 : i32
    return %c0_i32, %c0_i32_0 : i32, i32
  }
  func.func @transform_2(%arg0: i32) -> (i32, i32) {
    %c0_i32 = arith.constant 0 : i32
    %c0_i32_0 = arith.constant 0 : i32
    %c0_i32_1 = arith.constant 0 : i32
    return %c0_i32, %c0_i32_0 : i32, i32
  }
  func.func @transform_3(%arg0: i32) -> (i32, i32) {
    %c0_i32 = arith.constant 0 : i32
    %c0_i32_0 = arith.constant 0 : i32
    return %arg0, %c0_i32 : i32, i32
  }
}

module attributes {stable_mosaic.version = 11 : i64} {
  func.func @_matmul_bias_kernel(%arg0: i32, %arg1: memref<32x576xbf16, #tpu.memory_space<vmem>>, %arg2: memref<576x128xbf16, #tpu.memory_space<vmem>>, %arg3: memref<1x128xf32, #tpu.memory_space<vmem>>, %arg4: memref<32x128xbf16, #tpu.memory_space<vmem>>) attributes {dimension_semantics = [#tpu.dimension_semantics<parallel>], iteration_bounds = array<i64: 1>, scalar_prefetch = 0 : i64, scratch_operands = 0 : i64, tpu.core_type = #tpu.core_type<tc>, window_params = [{transform_indices = @transform_0, window_bounds = array<i64: 32, 576>}, {pipeline_mode = #tpu.pipeline_mode<synchronous>, transform_indices = @transform_1, window_bounds = array<i64: 576, 128>}, {pipeline_mode = #tpu.pipeline_mode<synchronous>, transform_indices = @transform_2, window_bounds = array<i64: 1, 128>}, {transform_indices = @transform_3, window_bounds = array<i64: 32, 128>}]} {
    %c0 = arith.constant 0 : index
    %c0_0 = arith.constant 0 : index
    %0 = vector.load %arg1[%c0, %c0_0] : memref<32x576xbf16, #tpu.memory_space<vmem>>, vector<32x576xbf16>
    %c0_1 = arith.constant 0 : index
    %c0_2 = arith.constant 0 : index
    %1 = vector.load %arg2[%c0_1, %c0_2] : memref<576x128xbf16, #tpu.memory_space<vmem>>, vector<576x128xbf16>
    %cst = arith.constant dense<0.000000e+00> : vector<32x128xf32>
    %2 = tpu.matmul %0, %1, %cst {dimension_numbers = #tpu.dot_dimension_numbers<[1], [0], [0], [1], [0, 0, 1, 1], [], []>} : vector<32x576xbf16>, vector<576x128xbf16>, vector<32x128xf32> -> vector<32x128xf32>
    %c0_3 = arith.constant 0 : index
    %c0_4 = arith.constant 0 : index
    %3 = vector.load %arg3[%c0_3, %c0_4] : memref<1x128xf32, #tpu.memory_space<vmem>>, vector<1x128xf32>
    %4 = vector.broadcast %3 : vector<1x128xf32> to vector<32x128xf32>
    %5 = arith.addf %2, %4 : vector<32x128xf32>
    %6 = arith.truncf %5 : vector<32x128xf32> to vector<32x128xbf16>
    %c0_5 = arith.constant 0 : index
    %c0_6 = arith.constant 0 : index
    %7 = vector.load %arg4[%c0_5, %c0_6] : memref<32x128xbf16, #tpu.memory_space<vmem>>, vector<32x128xbf16>
    tpu.vector_store %arg4[%c0_5, %c0_6], %6 {strides = array<i32>} : memref<32x128xbf16, #tpu.memory_space<vmem>>, vector<32x128xbf16>,
    return
  }
  func.func @transform_0(%arg0: i32) -> (i32, i32) {
    %c0_i32 = arith.constant 0 : i32
    %c0_i32_0 = arith.constant 0 : i32
    return %arg0, %c0_i32 : i32, i32
  }
  func.func @transform_1(%arg0: i32) -> (i32, i32) {
    %c0_i32 = arith.constant 0 : i32
    %c0_i32_0 = arith.constant 0 : i32
    %c0_i32_1 = arith.constant 0 : i32
    return %c0_i32, %c0_i32_0 : i32, i32
  }
  func.func @transform_2(%arg0: i32) -> (i32, i32) {
    %c0_i32 = arith.constant 0 : i32
    %c0_i32_0 = arith.constant 0 : i32
    %c0_i32_1 = arith.constant 0 : i32
    return %c0_i32, %c0_i32_0 : i32, i32
  }
  func.func @transform_3(%arg0: i32) -> (i32, i32) {
    %c0_i32 = arith.constant 0 : i32
    %c0_i32_0 = arith.constant 0 : i32
    return %arg0, %c0_i32 : i32, i32
  }
}

module attributes {stable_mosaic.version = 11 : i64} {
  func.func @_fused_mlp_kernel(%arg0: i32, %arg1: memref<8x2048xbf16, #tpu.memory_space<vmem>>, %arg2: memref<2048x512xbf16, #tpu.memory_space<vmem>>, %arg3: memref<1x512xf32, #tpu.memory_space<vmem>>, %arg4: memref<512x512xbf16, #tpu.memory_space<vmem>>, %arg5: memref<1x512xf32, #tpu.memory_space<vmem>>, %arg6: memref<512x2xbf16, #tpu.memory_space<vmem>>, %arg7: memref<1x2xf32, #tpu.memory_space<vmem>>, %arg8: memref<8x2xf32, #tpu.memory_space<vmem>>) attributes {dimension_semantics = [#tpu.dimension_semantics<parallel>], iteration_bounds = array<i64: 1>, scalar_prefetch = 0 : i64, scratch_operands = 0 : i64, tpu.core_type = #tpu.core_type<tc>, window_params = [{transform_indices = @transform_0, window_bounds = array<i64: 8, 2048>}, {pipeline_mode = #tpu.pipeline_mode<synchronous>, transform_indices = @transform_1, window_bounds = array<i64: 2048, 512>}, {pipeline_mode = #tpu.pipeline_mode<synchronous>, transform_indices = @transform_2, window_bounds = array<i64: 1, 512>}, {pipeline_mode = #tpu.pipeline_mode<synchronous>, transform_indices = @transform_3, window_bounds = array<i64: 512, 512>}, {pipeline_mode = #tpu.pipeline_mode<synchronous>, transform_indices = @transform_4, window_bounds = array<i64: 1, 512>}, {pipeline_mode = #tpu.pipeline_mode<synchronous>, transform_indices = @transform_5, window_bounds = array<i64: 512, 2>}, {pipeline_mode = #tpu.pipeline_mode<synchronous>, transform_indices = @transform_6, window_bounds = array<i64: 1, 2>}, {transform_indices = @transform_7, window_bounds = array<i64: 8, 2>}]} {
    %c0 = arith.constant 0 : index
    %c0_0 = arith.constant 0 : index
    %0 = vector.load %arg1[%c0, %c0_0] : memref<8x2048xbf16, #tpu.memory_space<vmem>>, vector<8x2048xbf16>
    %c0_1 = arith.constant 0 : index
    %c0_2 = arith.constant 0 : index
    %1 = vector.load %arg2[%c0_1, %c0_2] : memref<2048x512xbf16, #tpu.memory_space<vmem>>, vector<2048x512xbf16>
    %cst = arith.constant dense<0.000000e+00> : vector<8x512xf32>
    %2 = tpu.matmul %0, %1, %cst {dimension_numbers = #tpu.dot_dimension_numbers<[1], [0], [0], [1], [0, 0, 1, 1], [], []>} : vector<8x2048xbf16>, vector<2048x512xbf16>, vector<8x512xf32> -> vector<8x512xf32>
    %c0_3 = arith.constant 0 : index
    %c0_4 = arith.constant 0 : index
    %3 = vector.load %arg3[%c0_3, %c0_4] : memref<1x512xf32, #tpu.memory_space<vmem>>, vector<1x512xf32>
    %4 = vector.broadcast %3 : vector<1x512xf32> to vector<8x512xf32>
    %5 = arith.addf %2, %4 : vector<8x512xf32>
    %cst_5 = arith.constant 0.000000e+00 : f32
    %6 = vector.broadcast %cst_5 : f32 to vector<8x512xf32>
    %7 = arith.maximumf %5, %6 : vector<8x512xf32>
    %8 = arith.truncf %7 : vector<8x512xf32> to vector<8x512xbf16>
    %c0_6 = arith.constant 0 : index
    %c0_7 = arith.constant 0 : index
    %9 = vector.load %arg4[%c0_6, %c0_7] : memref<512x512xbf16, #tpu.memory_space<vmem>>, vector<512x512xbf16>
    %cst_8 = arith.constant dense<0.000000e+00> : vector<8x512xf32>
    %10 = tpu.matmul %8, %9, %cst_8 {dimension_numbers = #tpu.dot_dimension_numbers<[1], [0], [0], [1], [0, 0, 1, 1], [], []>} : vector<8x512xbf16>, vector<512x512xbf16>, vector<8x512xf32> -> vector<8x512xf32>
    %c0_9 = arith.constant 0 : index
    %c0_10 = arith.constant 0 : index
    %11 = vector.load %arg5[%c0_9, %c0_10] : memref<1x512xf32, #tpu.memory_space<vmem>>, vector<1x512xf32>
    %12 = vector.broadcast %11 : vector<1x512xf32> to vector<8x512xf32>
    %13 = arith.addf %10, %12 : vector<8x512xf32>
    %cst_11 = arith.constant 0.000000e+00 : f32
    %14 = vector.broadcast %cst_11 : f32 to vector<8x512xf32>
    %15 = arith.maximumf %13, %14 : vector<8x512xf32>
    %16 = arith.truncf %15 : vector<8x512xf32> to vector<8x512xbf16>
    %c0_12 = arith.constant 0 : index
    %c0_13 = arith.constant 0 : index
    %17 = vector.load %arg6[%c0_12, %c0_13] : memref<512x2xbf16, #tpu.memory_space<vmem>>, vector<512x2xbf16>
    %cst_14 = arith.constant dense<0.000000e+00> : vector<8x2xf32>
    %18 = tpu.matmul %16, %17, %cst_14 {dimension_numbers = #tpu.dot_dimension_numbers<[1], [0], [0], [1], [0, 0, 1, 1], [], []>} : vector<8x512xbf16>, vector<512x2xbf16>, vector<8x2xf32> -> vector<8x2xf32>
    %c0_15 = arith.constant 0 : index
    %c0_16 = arith.constant 0 : index
    %19 = vector.load %arg7[%c0_15, %c0_16] : memref<1x2xf32, #tpu.memory_space<vmem>>, vector<1x2xf32>
    %20 = vector.broadcast %19 : vector<1x2xf32> to vector<8x2xf32>
    %21 = arith.addf %18, %20 : vector<8x2xf32>
    %c0_17 = arith.constant 0 : index
    %c0_18 = arith.constant 0 : index
    %22 = vector.load %arg8[%c0_17, %c0_18] : memref<8x2xf32, #tpu.memory_space<vmem>>, vector<8x2xf32>
    tpu.vector_store %arg8[%c0_17, %c0_18], %21 {strides = array<i32>} : memref<8x2xf32, #tpu.memory_space<vmem>>, vector<8x2xf32>,
    return
  }
  func.func @transform_0(%arg0: i32) -> (i32, i32) {
    %c0_i32 = arith.constant 0 : i32
    %c0_i32_0 = arith.constant 0 : i32
    return %arg0, %c0_i32 : i32, i32
  }
  func.func @transform_1(%arg0: i32) -> (i32, i32) {
    %c0_i32 = arith.constant 0 : i32
    %c0_i32_0 = arith.constant 0 : i32
    %c0_i32_1 = arith.constant 0 : i32
    return %c0_i32, %c0_i32_0 : i32, i32
  }
  func.func @transform_2(%arg0: i32) -> (i32, i32) {
    %c0_i32 = arith.constant 0 : i32
    %c0_i32_0 = arith.constant 0 : i32
    %c0_i32_1 = arith.constant 0 : i32
    return %c0_i32, %c0_i32_0 : i32, i32
  }
  func.func @transform_3(%arg0: i32) -> (i32, i32) {
    %c0_i32 = arith.constant 0 : i32
    %c0_i32_0 = arith.constant 0 : i32
    %c0_i32_1 = arith.constant 0 : i32
    return %c0_i32, %c0_i32_0 : i32, i32
  }
  func.func @transform_4(%arg0: i32) -> (i32, i32) {
    %c0_i32 = arith.constant 0 : i32
    %c0_i32_0 = arith.constant 0 : i32
    %c0_i32_1 = arith.constant 0 : i32
    return %c0_i32, %c0_i32_0 : i32, i32
  }
  func.func @transform_5(%arg0: i32) -> (i32, i32) {
    %c0_i32 = arith.constant 0 : i32
    %c0_i32_0 = arith.constant 0 : i32
    %c0_i32_1 = arith.constant 0 : i32
    return %c0_i32, %c0_i32_0 : i32, i32
  }
  func.func @transform_6(%arg0: i32) -> (i32, i32) {
    %c0_i32 = arith.constant 0 : i32
    %c0_i32_0 = arith.constant 0 : i32
    %c0_i32_1 = arith.constant 0 : i32
    return %c0_i32, %c0_i32_0 : i32, i32
  }
  func.func @transform_7(%arg0: i32) -> (i32, i32) {
    %c0_i32 = arith.constant 0 : i32
    %c0_i32_0 = arith.constant 0 : i32
    return %arg0, %c0_i32 : i32, i32
  }
}

</mosaic_0001>

<bundles_post_ra>
// kernel: conv_encoder_forward.3
= control target key start
LH: loop header
LB: loop body
LE: loop exit
PB: predicated region body
PF: predicated region fallthrough
CT: control target
= control target key end

     0   :  { %8 = vsyncpa [#allocation3], 0  ;;  %s300_s15 = smov [#allocation2]   ;;  %s427_s0 = inlined_call_operand.vmem [shape: bf16[128,9], index: 0, kind: input, shape index: {}]   ;;  %s428_s1 = inlined_call_operand.vmem [shape: bf16[9,64], index: 1, kind: input, shape index: {}]   ;;  %s429_s2 = inlined_call_operand.hbm [shape: f32[1,64], index: 2, kind: input, shape index: {}]   ;;  %s430_s3 = inlined_call_operand.vmem [shape: bf16[128,64], index: 3, kind: output, shape index: {}]  }
   0x1   :  { %s18_s14 = sshll.u32 %s429_s2, 4  ;;  %s20_s16 = sshll.u32 %s300_s15, 4  ;;  %s19_s14 = int_to_ptr.hbm [resolvable:$true] %s18_s14  ;;  %s21_s16 = int_to_ptr.vmem [resolvable:$true] %s20_s16 }
   0x2   :  { %23 = dma.hbm_to_vmem [thread:$0]  %s19_s14, 16, %s21_s16, [#allocation3]  }
   0x3   :  { %298 = dma.done.wait [#allocation3], 16  }
   0x4   :  { %299 = vsyncadd [#allocation3], 4294967280  ;;  %vm121_vm0 = vcmask 1043456   ;;  %vm122_vm1 = vcmask 1044480   ;;  %v301_v0 = vmov 65535   ;;  %v259_v7 = vld [vmem:[%s427_s0] sm:$0xff] }
   0x5   :  { %v123_v1 = vsel %vm121_vm0, 4294967295, %v301_v0  ;;  %v249_v2 = vld [vmem:[%s428_s1] sm:$0xf]  ;;  %v267_v3 = vld [vmem:[%s428_s1] sm:$0x10]  ;;  %v261_v8 = vld [vmem:[%s427_s0 + $0x10] sm:$0xff] }
   0x6   :  { %v124_v4 = vsel %vm122_vm1, %v123_v1, 0  ;;  %v250_v5 = vor.u32 %v267_v3, %v249_v2  ;;  %vm96_vm2 = vcmask 72704   ;;  %v263_v9 = vld [vmem:[%s427_s0 + $0x20] sm:$0xff]  ;;  %v265_v10 = vld [vmem:[%s427_s0 + $0x30] sm:$0xff]  ;;  %v260_v11 = vld [vmem:[%s427_s0 + $0x8] sm:$0xff]  ;;  %vm193_vm3 = vcmask 519168  }
   0x7   :  { %v262_v12 = vld [vmem:[%s427_s0 + $0x18] sm:$0xff]  ;;  %v264_v13 = vld [vmem:[%s427_s0 + $0x28] sm:$0xff]  ;;  %v273_v15 = vld [vmem:[#allocation2] ss:$0 sm:$0xff] }
   0x8   :  { %v126_v6 = vand.u32 %v250_v5, %v124_v4  ;;  %v266_v14 = vld [vmem:[%s427_s0 + $0x38] sm:$0xff] }
   0xa   :  { %135 = vmatpush.bf16.msra.mxu0 %v126_v6  ;;  %268 = vmatpush.bf16.msra.mxu1 %v126_v6 }
   0xb   :  { %269 = vmatpush.bf16.msra.mxu2 %v126_v6  ;;  %270 = vmatpush.bf16.msra.mxu3 %v126_v6 }
   0xd   :  { %251 = vmatmul.msk.bf16.vlgmr.msra.gmra.mxu0 %vm96_vm2, %v259_v7  ;;  %253 = vmatmul.msk.bf16.vlgmr.msra.gmra.mxu1 %vm96_vm2, %v261_v8 }
   0xe   :  { %255 = vmatmul.msk.bf16.vlgmr.msra.gmra.mxu2 %vm96_vm2, %v263_v9  ;;  %257 = vmatmul.msk.bf16.vlgmr.msra.gmra.mxu3 %vm96_vm2, %v265_v10 }
  0x1d   :  { %252 = vmatmul.msk.bf16.gmra.mxu0 %vm96_vm2, %v260_v11  ;;  %254 = vmatmul.msk.bf16.gmra.mxu1 %vm96_vm2, %v262_v12 }
  0x1e   :  { %256 = vmatmul.msk.bf16.gmra.mxu2 %vm96_vm2, %v264_v13  ;;  %258 = vmatmul.msk.bf16.gmra.mxu3 %vm96_vm2, %v266_v14 }
  0x8a   :  { %v137_v16 = vpop.f32.mrf.mxu0  ;;  %v147_v17 = vpop.f32.mrf.mxu1 }
  0x8b   :  { %v138_v18 = vadd.f32 %v273_v15, %v137_v16  ;;  %v148_v19 = vadd.f32 %v273_v15, %v147_v17 }
  0x8d   :  { %v177_v20 = vpack.c.bf16 %v138_v18, %v138_v18  ;;  %v181_v21 = vpack.c.bf16 %v148_v19, %v148_v19 }
  0x8f   :  { %194 = vst.msk [vmem:[%s430_s3] sm:$0xf] %vm193_vm3, %v177_v20 }
  0x90   :  { %198 = vst.msk [vmem:[%s430_s3 + $0x10] sm:$0xf] %vm193_vm3, %v181_v21 }
  0x91   :  { %v157_v22 = vpop.f32.mrf.mxu2  ;;  %v167_v23 = vpop.f32.mrf.mxu3 }
  0x92   :  { %v158_v24 = vadd.f32 %v273_v15, %v157_v22  ;;  %v168_v25 = vadd.f32 %v273_v15, %v167_v23  ;;  %v139_v26 = vpop.f32.mrf.mxu0  ;;  %v149_v27 = vpop.f32.mrf.mxu1 }
  0x93   :  { %v140_v28 = vadd.f32 %v273_v15, %v139_v26  ;;  %v150_v29 = vadd.f32 %v273_v15, %v149_v27 }
  0x94   :  { %v185_v30 = vpack.c.bf16 %v158_v24, %v158_v24  ;;  %v189_v31 = vpack.c.bf16 %v168_v25, %v168_v25 }
  0x95   :  { %v178_v32 = vpack.c.bf16 %v140_v28, %v140_v28  ;;  %v182_v33 = vpack.c.bf16 %v150_v29, %v150_v29 }
  0x96   :  { %202 = vst.msk [vmem:[%s430_s3 + $0x20] sm:$0xf] %vm193_vm3, %v185_v30 }
  0x97   :  { %206 = vst.msk [vmem:[%s430_s3 + $0x30] sm:$0xf] %vm193_vm3, %v189_v31 }
  0x98   :  { %195 = vst.msk [vmem:[%s430_s3 + $0x4] sm:$0xf] %vm193_vm3, %v178_v32 }
  0x99   :  { %199 = vst.msk [vmem:[%s430_s3 + $0x14] sm:$0xf] %vm193_vm3, %v182_v33  ;;  %v159_v34 = vpop.f32.mrf.mxu2  ;;  %v169_v35 = vpop.f32.mrf.mxu3 }
  0x9a   :  { %v160_v36 = vadd.f32 %v273_v15, %v159_v34  ;;  %v170_v37 = vadd.f32 %v273_v15, %v169_v35  ;;  %v142_v38 = vpop.f32.mrf.mxu0  ;;  %v152_v39 = vpop.f32.mrf.mxu1 }
  0x9b   :  { %v143_v40 = vadd.f32 %v273_v15, %v142_v38  ;;  %v153_v41 = vadd.f32 %v273_v15, %v152_v39 }
  0x9c   :  { %v186_v42 = vpack.c.bf16 %v160_v36, %v160_v36  ;;  %v190_v43 = vpack.c.bf16 %v170_v37, %v170_v37 }
  0x9d   :  { %v179_v44 = vpack.c.bf16 %v143_v40, %v143_v40  ;;  %v183_v45 = vpack.c.bf16 %v153_v41, %v153_v41 }
  0x9e   :  { %203 = vst.msk [vmem:[%s430_s3 + $0x24] sm:$0xf] %vm193_vm3, %v186_v42 }
  0x9f   :  { %207 = vst.msk [vmem:[%s430_s3 + $0x34] sm:$0xf] %vm193_vm3, %v190_v43 }
  0xa0   :  { %196 = vst.msk [vmem:[%s430_s3 + $0x8] sm:$0xf] %vm193_vm3, %v179_v44 }
  0xa1   :  { %200 = vst.msk [vmem:[%s430_s3 + $0x18] sm:$0xf] %vm193_vm3, %v183_v45  ;;  %v162_v46 = vpop.f32.mrf.mxu2  ;;  %v172_v47 = vpop.f32.mrf.mxu3 }
  0xa2   :  { %v163_v48 = vadd.f32 %v273_v15, %v162_v46  ;;  %v173_v49 = vadd.f32 %v273_v15, %v172_v47  ;;  %v144_v50 = vpop.f32.mrf.mxu0  ;;  %v154_v51 = vpop.f32.mrf.mxu1 }
  0xa3   :  { %v145_v52 = vadd.f32 %v273_v15, %v144_v50  ;;  %v155_v53 = vadd.f32 %v273_v15, %v154_v51 }
  0xa4   :  { %v187_v54 = vpack.c.bf16 %v163_v48, %v163_v48  ;;  %v191_v55 = vpack.c.bf16 %v173_v49, %v173_v49 }
  0xa5   :  { %v180_v56 = vpack.c.bf16 %v145_v52, %v145_v52  ;;  %v184_v57 = vpack.c.bf16 %v155_v53, %v155_v53 }
  0xa6   :  { %204 = vst.msk [vmem:[%s430_s3 + $0x28] sm:$0xf] %vm193_vm3, %v187_v54 }
  0xa7   :  { %208 = vst.msk [vmem:[%s430_s3 + $0x38] sm:$0xf] %vm193_vm3, %v191_v55 }
  0xa8   :  { %197 = vst.msk [vmem:[%s430_s3 + $0xc] sm:$0xf] %vm193_vm3, %v180_v56 }
  0xa9   :  { %201 = vst.msk [vmem:[%s430_s3 + $0x1c] sm:$0xf] %vm193_vm3, %v184_v57  ;;  %v164_v58 = vpop.f32.mrf.mxu2  ;;  %v174_v59 = vpop.f32.mrf.mxu3 }
  0xaa   :  { %v165_v60 = vadd.f32 %v273_v15, %v164_v58  ;;  %v175_v61 = vadd.f32 %v273_v15, %v174_v59 }
  0xac   :  { %v188_v62 = vpack.c.bf16 %v165_v60, %v165_v60  ;;  %v192_v63 = vpack.c.bf16 %v175_v61, %v175_v61 }
  0xae   :  { %205 = vst.msk [vmem:[%s430_s3 + $0x2c] sm:$0xf] %vm193_vm3, %v188_v62 }
  0xaf   :  { %209 = vst.msk [vmem:[%s430_s3 + $0x3c] sm:$0xf] %vm193_vm3, %v192_v63 }
  0xb0   :  { %214 = vsyncpa [#allocation3], 1 }

// kernel: conv_encoder_forward.4
= control target key start
LH: loop header
LB: loop body
LE: loop exit
PB: predicated region body
PF: predicated region fallthrough
CT: control target
= control target key end

     0   :  { %8 = vsyncpa [#allocation3], 0  ;;  %s773_s15 = smov [#allocation2]   ;;  %s971_s0 = inlined_call_operand.vmem [shape: bf16[32,576], index: 0, kind: input, shape index: {}]   ;;  %s972_s1 = inlined_call_operand.vmem [shape: bf16[576,128], index: 1, kind: input, shape index: {}]   ;;  %s973_s2 = inlined_call_operand.hbm [shape: f32[1,128], index: 2, kind: input, shape index: {}]   ;;  %s974_s3 = inlined_call_operand.vmem [shape: bf16[32,128], index: 3, kind: output, shape index: {}]  }
   0x1   :  { %s18_s14 = sshll.u32 %s973_s2, 4  ;;  %s20_s16 = sshll.u32 %s773_s15, 4  ;;  %s19_s14 = int_to_ptr.hbm [resolvable:$true] %s18_s14  ;;  %s21_s16 = int_to_ptr.vmem [resolvable:$true] %s20_s16 }
   0x2   :  { %23 = dma.hbm_to_vmem [thread:$0]  %s19_s14, 16, %s21_s16, [#allocation3]  }
   0x3   :  { %771 = dma.done.wait [#allocation3], 16  }
   0x4   :  { %772 = vsyncadd [#allocation3], 4294967280  ;;  %v701_v0 = vld [vmem:[%s972_s1 + $0x38] sm:$0xff]  ;;  %v700_v4 = vld [vmem:[%s972_s1 + $0x30] sm:$0xff]  ;;  %vm383_vm0 = vcmask 523264  }
   0x5   :  { %v709_v1 = vld [vmem:[%s972_s1 + $0x78] sm:$0xff]  ;;  %390 = vmatpush.bf16.msra.mxu0 %v701_v0  ;;  %v708_v5 = vld [vmem:[%s972_s1 + $0x70] sm:$0xff]  ;;  %v699_v8 = vld [vmem:[%s972_s1 + $0x28] sm:$0xff] }
   0x6   :  { %v717_v2 = vld [vmem:[%s972_s1 + $0xb8] sm:$0xff]  ;;  %409 = vmatpush.bf16.msra.mxu1 %v709_v1  ;;  %v716_v6 = vld [vmem:[%s972_s1 + $0xb0] sm:$0xff]  ;;  %v707_v9 = vld [vmem:[%s972_s1 + $0x68] sm:$0xff] }
   0x7   :  { %v725_v3 = vld [vmem:[%s972_s1 + $0xf8] sm:$0xff]  ;;  %428 = vmatpush.bf16.msra.mxu2 %v717_v2  ;;  %v724_v7 = vld [vmem:[%s972_s1 + $0xf0] sm:$0xff]  ;;  %v715_v10 = vld [vmem:[%s972_s1 + $0xa8] sm:$0xff] }
   0x8   :  { %447 = vmatpush.bf16.msra.mxu3 %v725_v3  ;;  %v723_v11 = vld [vmem:[%s972_s1 + $0xe8] sm:$0xff]  ;;  %v698_v12 = vld [vmem:[%s972_s1 + $0x20] sm:$0xff]  ;;  %v697_v16 = vld [vmem:[%s972_s1 + $0x18] sm:$0xff] }
   0x9   :  { %391 = vmatpush.bf16.msra.mxu0 %v700_v4  ;;  %v706_v13 = vld [vmem:[%s972_s1 + $0x60] sm:$0xff]  ;;  %v705_v17 = vld [vmem:[%s972_s1 + $0x58] sm:$0xff]  ;;  %v696_v20 = vld [vmem:[%s972_s1 + $0x10] sm:$0xff] }
   0xa   :  { %410 = vmatpush.bf16.msra.mxu1 %v708_v5  ;;  %v714_v14 = vld [vmem:[%s972_s1 + $0xa0] sm:$0xff]  ;;  %v713_v18 = vld [vmem:[%s972_s1 + $0x98] sm:$0xff]  ;;  %v704_v21 = vld [vmem:[%s972_s1 + $0x50] sm:$0xff] }
   0xb   :  { %429 = vmatpush.bf16.msra.mxu2 %v716_v6  ;;  %v722_v15 = vld [vmem:[%s972_s1 + $0xe0] sm:$0xff]  ;;  %v721_v19 = vld [vmem:[%s972_s1 + $0xd8] sm:$0xff]  ;;  %v712_v22 = vld [vmem:[%s972_s1 + $0x90] sm:$0xff] }
   0xc   :  { %448 = vmatpush.bf16.msra.mxu3 %v724_v7  ;;  %v720_v23 = vld [vmem:[%s972_s1 + $0xd0] sm:$0xff]  ;;  %v695_v24 = vld [vmem:[%s972_s1 + $0x8] sm:$0xff]  ;;  %v694_v28 = vld [vmem:[%s972_s1] sm:$0xff] }
   0xd   :  { %392 = vmatpush.bf16.msra.mxu0 %v699_v8  ;;  %v703_v25 = vld [vmem:[%s972_s1 + $0x48] sm:$0xff]  ;;  %v702_v29 = vld [vmem:[%s972_s1 + $0x40] sm:$0xff]  ;;  %v686_v33 = vld [vmem:[%s971_s0 + $0x10] sm:$0xf0] }
   0xe   :  { %411 = vmatpush.bf16.msra.mxu1 %v707_v9  ;;  %v711_v26 = vld [vmem:[%s972_s1 + $0x88] sm:$0xff]  ;;  %v710_v30 = vld [vmem:[%s972_s1 + $0x80] sm:$0xff]  ;;  %v502_v35 = vld [vmem:[%s971_s0 + $0x14] sm:$0xf0] }
   0xf   :  { %430 = vmatpush.bf16.msra.mxu2 %v715_v10  ;;  %v719_v27 = vld [vmem:[%s972_s1 + $0xc8] sm:$0xff]  ;;  %v718_v31 = vld [vmem:[%s972_s1 + $0xc0] sm:$0xff]  ;;  %v687_v37 = vld [vmem:[%s971_s0 + $0x18] sm:$0xf0] }
  0x10   :  { %449 = vmatpush.bf16.msra.mxu3 %v723_v11  ;;  %v500_v32 = vld [vmem:[%s971_s0] sm:$0xf]  ;;  %v684_v34 = vld [vmem:[%s971_s0 + $0x4] sm:$0xf]  ;;  %v508_v36 = vld [vmem:[%s971_s0 + $0x8] sm:$0xf] }
  0x11   :  { %393 = vmatpush.bf16.msra.mxu0 %v698_v12  ;;  %v685_v38 = vld [vmem:[%s971_s0 + $0xc] sm:$0xf]  ;;  %v510_v39 = vld [vmem:[%s971_s0 + $0x1c] sm:$0xf0]  ;;  %v729_v40 = vld [vmem:[%s972_s1 + $0x118] sm:$0xff]  ;;  %v501_v41 = vor.u32 %v686_v33, %v500_v32  ;;  %v505_v42 = vor.u32 %v684_v34, %v502_v35  ;;  %v509_v43 = vor.u32 %v687_v37, %v508_v36 }
  0x12   :  { %412 = vmatpush.bf16.msra.mxu1 %v706_v13  ;;  %v513_v44 = vor.u32 %v685_v38, %v510_v39  ;;  %v728_v45 = vld [vmem:[%s972_s1 + $0x110] sm:$0xff]  ;;  %v727_v46 = vld [vmem:[%s972_s1 + $0x108] sm:$0xff]  ;;  %v726_v47 = vld [vmem:[%s972_s1 + $0x100] sm:$0xff] }
  0x13   :  { %431 = vmatpush.bf16.msra.mxu2 %v714_v14  ;;  %v520_v48 = vld [vmem:[%s971_s0 + $0x28] sm:$0xf]  ;;  %v691_v49 = vld [vmem:[%s971_s0 + $0x38] sm:$0xf0]  ;;  %v689_v50 = vld [vmem:[%s971_s0 + $0x2c] sm:$0xf] }
  0x14   :  { %450 = vmatpush.bf16.msra.mxu3 %v722_v15  ;;  %v522_v51 = vld [vmem:[%s971_s0 + $0x3c] sm:$0xf0]  ;;  %v528_v52 = vld [vmem:[%s971_s0 + $0x30] sm:$0xf]  ;;  %v692_v53 = vld [vmem:[%s971_s0 + $0x40] sm:$0xf0]  ;;  %v521_v56 = vor.u32 %v691_v49, %v520_v48 }
  0x15   :  { %394 = vmatpush.bf16.msra.mxu0 %v697_v16  ;;  %v690_v54 = vld [vmem:[%s971_s0 + $0x34] sm:$0xf]  ;;  %v530_v55 = vld [vmem:[%s971_s0 + $0x44] sm:$0xf0]  ;;  %v525_v57 = vor.u32 %v689_v50, %v522_v51  ;;  %v529_v58 = vor.u32 %v692_v53, %v528_v52  ;;  %v516_v60 = vld [vmem:[%s971_s0 + $0x10] sm:$0xf] }
  0x16   :  { %413 = vmatpush.bf16.msra.mxu1 %v705_v17  ;;  %v533_v59 = vor.u32 %v690_v54, %v530_v55  ;;  %v688_v61 = vld [vmem:[%s971_s0 + $0x20] sm:$0xf0]  ;;  %v536_v62 = vld [vmem:[%s971_s0 + $0x38] sm:$0xf]  ;;  %v693_v63 = vld [vmem:[%s971_s0 + $0x48] sm:$0xf0] }
  0x17   :  { %432 = vmatpush.bf16.msra.mxu2 %v713_v18  ;;  %v517_v0 = vor.u32 %v688_v61, %v516_v60  ;;  %v537_v1 = vor.u32 %v693_v63, %v536_v62  ;;  %v746_v15 = vld [vmem:[#allocation2] ss:$0 sm:$0xff] }
  0x18   :  { %451 = vmatpush.bf16.msra.mxu3 %v721_v19 }
  0x19   :  { %395 = vmatpush.bf16.msra.mxu0 %v696_v20 }
  0x1a   :  { %414 = vmatpush.bf16.msra.mxu1 %v704_v21 }
  0x1b   :  { %433 = vmatpush.bf16.msra.mxu2 %v712_v22 }
  0x1c   :  { %452 = vmatpush.bf16.msra.mxu3 %v720_v23 }
  0x1d   :  { %396 = vmatpush.bf16.msra.mxu0 %v695_v24 }
  0x1e   :  { %415 = vmatpush.bf16.msra.mxu1 %v703_v25 }
  0x1f   :  { %434 = vmatpush.bf16.msra.mxu2 %v711_v26 }
  0x20   :  { %453 = vmatpush.bf16.msra.mxu3 %v719_v27 }
  0x21   :  { %397 = vmatpush.bf16.msra.mxu0 %v694_v28 }
  0x22   :  { %416 = vmatpush.bf16.msra.mxu1 %v702_v29 }
  0x23   :  { %435 = vmatpush.bf16.msra.mxu2 %v710_v30 }
  0x24   :  { %454 = vmatpush.bf16.msra.mxu3 %v718_v31  ;;  %398 = vmatmul.bf16.vlgmr.msra.gmra.mxu0 %v501_v41 }
  0x25   :  { %470 = vmatpush.bf16.msrb.mxu0 %v729_v40  ;;  %417 = vmatmul.bf16.vlgmr.msra.gmra.mxu1 %v505_v42 }
  0x26   :  { %741 = vmatpush.bf16.msrb.mxu1 %v729_v40  ;;  %436 = vmatmul.bf16.vlgmr.msra.gmra.mxu2 %v509_v43 }
  0x27   :  { %455 = vmatmul.bf16.vlgmr.msra.gmra.mxu3 %v513_v44 }
  0x29   :  { %471 = vmatpush.bf16.msrb.mxu0 %v728_v45 }
  0x2a   :  { %742 = vmatpush.bf16.msrb.mxu1 %v728_v45 }
  0x2d   :  { %472 = vmatpush.bf16.msrb.mxu0 %v727_v46 }
  0x2e   :  { %743 = vmatpush.bf16.msrb.mxu1 %v727_v46 }
  0x31   :  { %473 = vmatpush.bf16.msrb.mxu0 %v726_v47 }
  0x32   :  { %744 = vmatpush.bf16.msrb.mxu1 %v726_v47 }
  0x34   :  { %403 = vmatmul.bf16.gmra.mxu0 %v521_v56 }
  0x35   :  { %422 = vmatmul.bf16.gmra.mxu1 %v525_v57 }
  0x36   :  { %441 = vmatmul.bf16.gmra.mxu2 %v529_v58 }
  0x37   :  { %460 = vmatmul.bf16.gmra.mxu3 %v533_v59 }
  0x44   :  { %682 = vmatmul.msk.bf16.vlgmr.msrb.gmra.mxu0 %vm383_vm0, %v517_v0 }
  0x45   :  { %683 = vmatmul.msk.bf16.vlgmr.msrb.gmra.mxu1 %vm383_vm0, %v537_v1 }
  0xa1   :  { %v399_v2 = vpop.f32.mrf.mxu0 }
  0xa2   :  { %v418_v3 = vpop.f32.mrf.mxu1  ;;  %v400_v17 = vadd.f32 %v746_v15, %v399_v2 }
  0xa4   :  { %v419_v24 = vadd.f32 %v418_v3, %v400_v17 }
  0xa9   :  { %v437_v4 = vpop.f32.mrf.mxu2  ;;  %v401_v6 = vpop.f32.mrf.mxu0 }
  0xaa   :  { %v456_v5 = vpop.f32.mrf.mxu3  ;;  %v420_v7 = vpop.f32.mrf.mxu1  ;;  %v402_v18 = vadd.f32 %v746_v15, %v401_v6  ;;  %v438_v28 = vadd.f32 %v437_v4, %v419_v24 }
  0xac   :  { %v421_v25 = vadd.f32 %v420_v7, %v402_v18  ;;  %v457_v33 = vadd.f32 %v456_v5, %v438_v28 }
  0xb1   :  { %v439_v8 = vpop.f32.mrf.mxu2  ;;  %v404_v9 = vpop.f32.mrf.mxu0 }
  0xb2   :  { %v423_v10 = vpop.f32.mrf.mxu1  ;;  %v458_v11 = vpop.f32.mrf.mxu3  ;;  %v405_v19 = vadd.f32 %v746_v15, %v404_v9  ;;  %v440_v29 = vadd.f32 %v439_v8, %v421_v25 }
  0xb4   :  { %v424_v26 = vadd.f32 %v423_v10, %v405_v19  ;;  %v459_v34 = vadd.f32 %v458_v11, %v440_v29 }
  0xb9   :  { %v442_v12 = vpop.f32.mrf.mxu2  ;;  %v406_v13 = vpop.f32.mrf.mxu0 }
  0xba   :  { %v425_v14 = vpop.f32.mrf.mxu1  ;;  %v461_v16 = vpop.f32.mrf.mxu3  ;;  %v407_v20 = vadd.f32 %v746_v15, %v406_v13  ;;  %v443_v30 = vadd.f32 %v442_v12, %v424_v26 }
  0xbc   :  { %v426_v27 = vadd.f32 %v425_v14, %v407_v20  ;;  %v462_v35 = vadd.f32 %v461_v16, %v443_v30 }
  0xc1   :  { %v444_v21 = vpop.f32.mrf.mxu2  ;;  %v475_v22 = vpop.f32.mrf.mxu0 }
  0xc2   :  { %v480_v23 = vpop.f32.mrf.mxu1  ;;  %v445_v31 = vadd.f32 %v444_v21, %v426_v27  ;;  %v463_v32 = vpop.f32.mrf.mxu3  ;;  %v476_v39 = vadd.f32 %v475_v22, %v457_v33 }
  0xc3   :  { %v481_v40 = vadd.f32 %v480_v23, %v462_v35 }
  0xc4   :  { %v464_v36 = vadd.f32 %v463_v32, %v445_v31 }
  0xc9   :  { %v477_v37 = vpop.f32.mrf.mxu0 }
  0xca   :  { %v482_v38 = vpop.f32.mrf.mxu1  ;;  %v478_v41 = vadd.f32 %v477_v37, %v459_v34 }
  0xcb   :  { %v483_v42 = vadd.f32 %v482_v38, %v464_v36 }
  0xcc   :  { %v733_v43 = vpack.c.bf16 %v478_v41, %v476_v39 }
  0xcd   :  { %v738_v44 = vpack.c.bf16 %v483_v42, %v481_v40 }
  0xce   :  { %734 = vst [vmem:[%s974_s3] sm:$0xff] %v733_v43  }
  0xcf   :  { %740 = vst [vmem:[%s974_s3 + $0x8] sm:$0xff] %v738_v44  }
  0xd0   :  { %497 = vsyncpa [#allocation3], 1 }

// kernel: conv_encoder_forward.5
= control target key start
LH: loop header
LB: loop body
LE: loop exit
PB: predicated region body
PF: predicated region fallthrough
CT: control target
= control target key end

     0   :  { %vm5318_vm0 = vcmask 15360   ;;  %s12916_s1 = inlined_call_operand.vmem [shape: bf16[2048,512], index: 1, kind: input, shape index: {}]   ;;  %s12917_s0 = inlined_call_operand.vmem [shape: bf16[8,2048], index: 0, kind: input, shape index: {}]   ;;  %s12918_s2 = inlined_call_operand.vmem [shape: f32[1,512], index: 2, kind: input, shape index: {}]   ;;  %s12919_s3 = inlined_call_operand.vmem [shape: bf16[512,512], index: 3, kind: input, shape index: {}]   ;;  %s12920_s4 = inlined_call_operand.vmem [shape: f32[1,512], index: 4, kind: input, shape index: {}]   ;;  %s12921_s5 = inlined_call_operand.vmem [shape: bf16[512,2], index: 5, kind: input, shape index: {}]   ;;  %s12922_s6 = inlined_call_operand.vmem [shape: f32[1,2], index: 6, kind: input, shape index: {}]   ;;  %s12923_s7 = inlined_call_operand.vmem [shape: f32[8,2], index: 7, kind: output, shape index: {}]  }
   0x1   :  { %v5438_v0 = vld [vmem:[%s12916_s1 + $0xe0] sm:$0xf]  ;;  %v8042_v1 = vld [vmem:[%s12916_s1 + $0xec] sm:$0xf0] }
   0x2   :  { %v5566_v2 = vld [vmem:[%s12916_s1 + $0x1e0] sm:$0xf]  ;;  %v5439_v3 = vor.u32 %v8042_v1, %v5438_v0  ;;  %v8074_v4 = vld [vmem:[%s12916_s1 + $0x1ec] sm:$0xf0] }
   0x3   :  { %v5694_v5 = vld [vmem:[%s12916_s1 + $0x2e0] sm:$0xf]  ;;  %v8106_v6 = vld [vmem:[%s12916_s1 + $0x2ec] sm:$0xf0]  ;;  %v5567_v7 = vor.u32 %v8074_v4, %v5566_v2 }
   0x4   :  { %v5695_v8 = vor.u32 %v8106_v6, %v5694_v5  ;;  %v5822_v9 = vld [vmem:[%s12916_s1 + $0x3e0] sm:$0xf]  ;;  %v8138_v10 = vld [vmem:[%s12916_s1 + $0x3ec] sm:$0xf0]  ;;  %3172 = vmatpush.bf16.msra.mxu0 %v5439_v3 }
   0x5   :  { %v5422_v11 = vld [vmem:[%s12916_s1 + $0xc0] sm:$0xf]  ;;  %v5823_v12 = vor.u32 %v8138_v10, %v5822_v9  ;;  %v8038_v13 = vld [vmem:[%s12916_s1 + $0xcc] sm:$0xf0]  ;;  %3185 = vmatpush.bf16.msra.mxu1 %v5567_v7 }
   0x6   :  { %v5550_v14 = vld [vmem:[%s12916_s1 + $0x1c0] sm:$0xf]  ;;  %v8070_v15 = vld [vmem:[%s12916_s1 + $0x1cc] sm:$0xf0]  ;;  %3198 = vmatpush.bf16.msra.mxu2 %v5695_v8  ;;  %v5423_v16 = vor.u32 %v8038_v13, %v5422_v11 }
   0x7   :  { %v5551_v17 = vor.u32 %v8070_v15, %v5550_v14  ;;  %v5678_v18 = vld [vmem:[%s12916_s1 + $0x2c0] sm:$0xf]  ;;  %v8102_v19 = vld [vmem:[%s12916_s1 + $0x2cc] sm:$0xf0]  ;;  %3211 = vmatpush.bf16.msra.mxu3 %v5823_v12 }
   0x8   :  { %v5806_v20 = vld [vmem:[%s12916_s1 + $0x3c0] sm:$0xf]  ;;  %v5679_v21 = vor.u32 %v8102_v19, %v5678_v18  ;;  %v8134_v22 = vld [vmem:[%s12916_s1 + $0x3cc] sm:$0xf0]  ;;  %3173 = vmatpush.bf16.msra.mxu0 %v5423_v16 }
   0x9   :  { %v5406_v23 = vld [vmem:[%s12916_s1 + $0xa0] sm:$0xf]  ;;  %v8034_v24 = vld [vmem:[%s12916_s1 + $0xac] sm:$0xf0]  ;;  %v5807_v25 = vor.u32 %v8134_v22, %v5806_v20  ;;  %3186 = vmatpush.bf16.msra.mxu1 %v5551_v17 }
   0xa   :  { %v5534_v26 = vld [vmem:[%s12916_s1 + $0x1a0] sm:$0xf]  ;;  %v8066_v27 = vld [vmem:[%s12916_s1 + $0x1ac] sm:$0xf0]  ;;  %v5407_v29 = vor.u32 %v8034_v24, %v5406_v23  ;;  %3199 = vmatpush.bf16.msra.mxu2 %v5679_v21 }
   0xb   :  { %v5662_v28 = vld [vmem:[%s12916_s1 + $0x2a0] sm:$0xf]  ;;  %v8098_v30 = vld [vmem:[%s12916_s1 + $0x2ac] sm:$0xf0]  ;;  %v5535_v33 = vor.u32 %v8066_v27, %v5534_v26  ;;  %3212 = vmatpush.bf16.msra.mxu3 %v5807_v25 }
   0xc   :  { %v5790_v31 = vld [vmem:[%s12916_s1 + $0x3a0] sm:$0xf]  ;;  %v8130_v32 = vld [vmem:[%s12916_s1 + $0x3ac] sm:$0xf0]  ;;  %v5663_v34 = vor.u32 %v8098_v30, %v5662_v28  ;;  %3174 = vmatpush.bf16.msra.mxu0 %v5407_v29 }
   0xd   :  { %v5390_v35 = vld [vmem:[%s12916_s1 + $0x80] sm:$0xf]  ;;  %v8030_v36 = vld [vmem:[%s12916_s1 + $0x8c] sm:$0xf0]  ;;  %v5791_v38 = vor.u32 %v8130_v32, %v5790_v31  ;;  %3187 = vmatpush.bf16.msra.mxu1 %v5535_v33 }
   0xe   :  { %v5518_v37 = vld [vmem:[%s12916_s1 + $0x180] sm:$0xf]  ;;  %v8062_v39 = vld [vmem:[%s12916_s1 + $0x18c] sm:$0xf0]  ;;  %v5391_v44 = vor.u32 %v8030_v36, %v5390_v35  ;;  %3200 = vmatpush.bf16.msra.mxu2 %v5663_v34 }
   0xf   :  { %v5646_v40 = vld [vmem:[%s12916_s1 + $0x280] sm:$0xf]  ;;  %v8094_v41 = vld [vmem:[%s12916_s1 + $0x28c] sm:$0xf0]  ;;  %v5519_v45 = vor.u32 %v8062_v39, %v5518_v37  ;;  %3213 = vmatpush.bf16.msra.mxu3 %v5791_v38 }
  0x10   :  { %v5774_v42 = vld [vmem:[%s12916_s1 + $0x380] sm:$0xf]  ;;  %v8126_v43 = vld [vmem:[%s12916_s1 + $0x38c] sm:$0xf0]  ;;  %v5647_v46 = vor.u32 %v8094_v41, %v5646_v40  ;;  %3175 = vmatpush.bf16.msra.mxu0 %v5391_v44 }
  0x11   :  { %v5374_v47 = vld [vmem:[%s12916_s1 + $0x60] sm:$0xf]  ;;  %v8026_v48 = vld [vmem:[%s12916_s1 + $0x6c] sm:$0xf0]  ;;  %v5775_v50 = vor.u32 %v8126_v43, %v5774_v42  ;;  %3188 = vmatpush.bf16.msra.mxu1 %v5519_v45 }
  0x12   :  { %v5502_v49 = vld [vmem:[%s12916_s1 + $0x160] sm:$0xf]  ;;  %v8058_v51 = vld [vmem:[%s12916_s1 + $0x16c] sm:$0xf0]  ;;  %v5375_v56 = vor.u32 %v8026_v48, %v5374_v47  ;;  %3201 = vmatpush.bf16.msra.mxu2 %v5647_v46 }
  0x13   :  { %v5630_v52 = vld [vmem:[%s12916_s1 + $0x260] sm:$0xf]  ;;  %v8090_v53 = vld [vmem:[%s12916_s1 + $0x26c] sm:$0xf0]  ;;  %v5503_v57 = vor.u32 %v8058_v51, %v5502_v49  ;;  %3214 = vmatpush.bf16.msra.mxu3 %v5775_v50 }
  0x14   :  { %v5758_v54 = vld [vmem:[%s12916_s1 + $0x360] sm:$0xf]  ;;  %v8122_v55 = vld [vmem:[%s12916_s1 + $0x36c] sm:$0xf0]  ;;  %v5631_v58 = vor.u32 %v8090_v53, %v5630_v52  ;;  %3176 = vmatpush.bf16.msra.mxu0 %v5375_v56 }
  0x15   :  { %v5358_v59 = vld [vmem:[%s12916_s1 + $0x40] sm:$0xf]  ;;  %v8022_v60 = vld [vmem:[%s12916_s1 + $0x4c] sm:$0xf0]  ;;  %v5759_v62 = vor.u32 %v8122_v55, %v5758_v54  ;;  %3189 = vmatpush.bf16.msra.mxu1 %v5503_v57 }
  0x16   :  { %v5486_v61 = vld [vmem:[%s12916_s1 + $0x140] sm:$0xf]  ;;  %v8054_v63 = vld [vmem:[%s12916_s1 + $0x14c] sm:$0xf0]  ;;  %v5359_v4 = vor.u32 %v8022_v60, %v5358_v59  ;;  %3202 = vmatpush.bf16.msra.mxu2 %v5631_v58 }
  0x17   :  { %v5614_v0 = vld [vmem:[%s12916_s1 + $0x240] sm:$0xf]  ;;  %v8086_v1 = vld [vmem:[%s12916_s1 + $0x24c] sm:$0xf0]  ;;  %v5487_v5 = vor.u32 %v8054_v63, %v5486_v61  ;;  %3215 = vmatpush.bf16.msra.mxu3 %v5759_v62 }
  0x18   :  { %v5742_v2 = vld [vmem:[%s12916_s1 + $0x340] sm:$0xf]  ;;  %v8118_v3 = vld [vmem:[%s12916_s1 + $0x34c] sm:$0xf0]  ;;  %v5615_v6 = vor.u32 %v8086_v1, %v5614_v0  ;;  %3177 = vmatpush.bf16.msra.mxu0 %v5359_v4 }
  0x19   :  { %v5342_v7 = vld [vmem:[%s12916_s1 + $0x20] sm:$0xf]  ;;  %v8018_v8 = vld [vmem:[%s12916_s1 + $0x2c] sm:$0xf0]  ;;  %v5743_v10 = vor.u32 %v8118_v3, %v5742_v2  ;;  %3190 = vmatpush.bf16.msra.mxu1 %v5487_v5  ;;  %v27_v2 = vld [vmem:[%s12917_s0 + $0x8] sm:$0xff] }
  0x1a   :  { %v5470_v9 = vld [vmem:[%s12916_s1 + $0x120] sm:$0xf]  ;;  %v8050_v11 = vld [vmem:[%s12916_s1 + $0x12c] sm:$0xf0]  ;;  %v5343_v16 = vor.u32 %v8018_v8, %v5342_v7  ;;  %3203 = vmatpush.bf16.msra.mxu2 %v5615_v6  ;;  %v566_v8 = vunpack.c.l.b16 %v27_v2 }
  0x1b   :  { %v5598_v12 = vld [vmem:[%s12916_s1 + $0x220] sm:$0xf]  ;;  %v8082_v13 = vld [vmem:[%s12916_s1 + $0x22c] sm:$0xf0]  ;;  %v5471_v19 = vor.u32 %v8050_v11, %v5470_v9  ;;  %3216 = vmatpush.bf16.msra.mxu3 %v5743_v10  ;;  %v567_v10 = vunpack.c.h.b16 %v27_v2 }
  0x1c   :  { %v5726_v14 = vld [vmem:[%s12916_s1 + $0x320] sm:$0xf]  ;;  %v8114_v15 = vld [vmem:[%s12916_s1 + $0x32c] sm:$0xf0]  ;;  %v5599_v20 = vor.u32 %v8082_v13, %v5598_v12  ;;  %3178 = vmatpush.bf16.msra.mxu0 %v5343_v16 }
  0x1d   :  { %v5326_v17 = vld [vmem:[%s12916_s1] sm:$0xf]  ;;  %v8014_v18 = vld [vmem:[%s12916_s1 + $0xc] sm:$0xf0]  ;;  %v5727_v24 = vor.u32 %v8114_v15, %v5726_v14  ;;  %3191 = vmatpush.bf16.msra.mxu1 %v5471_v19 }
  0x1e   :  { %v5454_v21 = vld [vmem:[%s12916_s1 + $0x100] sm:$0xf]  ;;  %v8046_v22 = vld [vmem:[%s12916_s1 + $0x10c] sm:$0xf0]  ;;  %v5327_v31 = vor.u32 %v8014_v18, %v5326_v17  ;;  %3204 = vmatpush.bf16.msra.mxu2 %v5599_v20  ;;  %v9022_v18 = vpack.c.b16 %v566_v8, %v566_v8  ;;  %v9026_v20 = vpack.c.b16 %v567_v10, %v567_v10 }
  0x1f   :  { %v5582_v23 = vld [vmem:[%s12916_s1 + $0x200] sm:$0xf]  ;;  %v8078_v25 = vld [vmem:[%s12916_s1 + $0x20c] sm:$0xf0]  ;;  %v5455_v35 = vor.u32 %v8046_v22, %v5454_v21  ;;  %3217 = vmatpush.bf16.msra.mxu3 %v5727_v24 }
  0x20   :  { %v5710_v26 = vld [vmem:[%s12916_s1 + $0x300] sm:$0xf]  ;;  %v8110_v27 = vld [vmem:[%s12916_s1 + $0x30c] sm:$0xf0]  ;;  %v5583_v36 = vor.u32 %v8078_v25, %v5582_v23  ;;  %3179 = vmatpush.bf16.msra.mxu0 %v5327_v31 }
  0x21   :  { %v5950_v28 = vld [vmem:[%s12916_s1 + $0x4e0] sm:$0xf]  ;;  %v8170_v29 = vld [vmem:[%s12916_s1 + $0x4ec] sm:$0xf0]  ;;  %v5711_v39 = vor.u32 %v8110_v27, %v5710_v26  ;;  %3192 = vmatpush.bf16.msra.mxu1 %v5455_v35 }
  0x22   :  { %v6078_v30 = vld [vmem:[%s12916_s1 + $0x5e0] sm:$0xf]  ;;  %v8202_v32 = vld [vmem:[%s12916_s1 + $0x5ec] sm:$0xf0]  ;;  %v5951_v40 = vor.u32 %v8170_v29, %v5950_v28  ;;  %3205 = vmatpush.bf16.msra.mxu2 %v5583_v36 }
  0x23   :  { %v6206_v33 = vld [vmem:[%s12916_s1 + $0x6e0] sm:$0xf]  ;;  %v8234_v34 = vld [vmem:[%s12916_s1 + $0x6ec] sm:$0xf0]  ;;  %v6079_v41 = vor.u32 %v8202_v32, %v6078_v30  ;;  %3218 = vmatpush.bf16.msra.mxu3 %v5711_v39 }
  0x24   :  { %v6334_v37 = vld [vmem:[%s12916_s1 + $0x7e0] sm:$0xf]  ;;  %v8266_v38 = vld [vmem:[%s12916_s1 + $0x7ec] sm:$0xf0]  ;;  %v6207_v42 = vor.u32 %v8234_v34, %v6206_v33  ;;  %3224 = vmatpush.bf16.msrb.mxu0 %v5951_v40 }
  0x25   :  { %v5934_v43 = vld [vmem:[%s12916_s1 + $0x4c0] sm:$0xf]  ;;  %v8166_v44 = vld [vmem:[%s12916_s1 + $0x4cc] sm:$0xf0]  ;;  %v6335_v46 = vor.u32 %v8266_v38, %v6334_v37  ;;  %3237 = vmatpush.bf16.msrb.mxu1 %v6079_v41  ;;  %3206 = vmatmul.bf16.vlgmr.msra.gmra.mxu2 %v9022_v18 }
  0x26   :  { %v6062_v45 = vld [vmem:[%s12916_s1 + $0x5c0] sm:$0xf]  ;;  %v8198_v47 = vld [vmem:[%s12916_s1 + $0x5cc] sm:$0xf0]  ;;  %v5935_v52 = vor.u32 %v8166_v44, %v5934_v43  ;;  %3250 = vmatpush.bf16.msrb.mxu2 %v6207_v42  ;;  %3219 = vmatmul.bf16.vlgmr.msra.gmra.mxu3 %v9026_v20 }
  0x27   :  { %v6190_v48 = vld [vmem:[%s12916_s1 + $0x6c0] sm:$0xf]  ;;  %v8230_v49 = vld [vmem:[%s12916_s1 + $0x6cc] sm:$0xf0]  ;;  %v6063_v54 = vor.u32 %v8198_v47, %v6062_v45  ;;  %3263 = vmatpush.bf16.msrb.mxu3 %v6335_v46 }
  0x28   :  { %v6318_v50 = vld [vmem:[%s12916_s1 + $0x7c0] sm:$0xf]  ;;  %v8262_v51 = vld [vmem:[%s12916_s1 + $0x7cc] sm:$0xf0]  ;;  %v6191_v55 = vor.u32 %v8230_v49, %v6190_v48  ;;  %3225 = vmatpush.bf16.msrb.mxu0 %v5935_v52 }
  0x29   :  { %v5918_v53 = vld [vmem:[%s12916_s1 + $0x4a0] sm:$0xf]  ;;  %v8162_v56 = vld [vmem:[%s12916_s1 + $0x4ac] sm:$0xf0]  ;;  %v6319_v59 = vor.u32 %v8262_v51, %v6318_v50  ;;  %3238 = vmatpush.bf16.msrb.mxu1 %v6063_v54 }
  0x2a   :  { %v6046_v57 = vld [vmem:[%s12916_s1 + $0x5a0] sm:$0xf]  ;;  %v8194_v58 = vld [vmem:[%s12916_s1 + $0x5ac] sm:$0xf0]  ;;  %v5919_v0 = vor.u32 %v8162_v56, %v5918_v53  ;;  %3251 = vmatpush.bf16.msrb.mxu2 %v6191_v55 }
  0x2b   :  { %v6174_v60 = vld [vmem:[%s12916_s1 + $0x6a0] sm:$0xf]  ;;  %v8226_v61 = vld [vmem:[%s12916_s1 + $0x6ac] sm:$0xf0]  ;;  %v6047_v1 = vor.u32 %v8194_v58, %v6046_v57  ;;  %3264 = vmatpush.bf16.msrb.mxu3 %v6319_v59 }
  0x2c   :  { %v6302_v62 = vld [vmem:[%s12916_s1 + $0x7a0] sm:$0xf]  ;;  %v8258_v63 = vld [vmem:[%s12916_s1 + $0x7ac] sm:$0xf0]  ;;  %v6175_v4 = vor.u32 %v8226_v61, %v6174_v60  ;;  %3226 = vmatpush.bf16.msrb.mxu0 %v5919_v0 }
  0x2d   :  { %v26_v3 = vld [vmem:[%s12917_s0] sm:$0xff]  ;;  %v8158_v6 = vld [vmem:[%s12916_s1 + $0x48c] sm:$0xf0]  ;;  %v6303_v11 = vor.u32 %v8258_v63, %v6302_v62  ;;  %3239 = vmatpush.bf16.msrb.mxu1 %v6047_v1 }
  0x2e   :  { %v5902_v5 = vld [vmem:[%s12916_s1 + $0x480] sm:$0xf]  ;;  %v564_v9 = vunpack.c.l.b16 %v26_v3  ;;  %v8190_v12 = vld [vmem:[%s12916_s1 + $0x58c] sm:$0xf0]  ;;  %v565_v15 = vunpack.c.h.b16 %v26_v3  ;;  %3252 = vmatpush.bf16.msrb.mxu2 %v6175_v4  ;;  %v29_v3 = vld [vmem:[%s12917_s0 + $0x18] sm:$0xff] }
  0x2f   :  { %v6030_v7 = vld [vmem:[%s12916_s1 + $0x580] sm:$0xf]  ;;  %v8222_v14 = vld [vmem:[%s12916_s1 + $0x68c] sm:$0xf0]  ;;  %v5903_v21 = vor.u32 %v8158_v6, %v5902_v5  ;;  %3265 = vmatpush.bf16.msrb.mxu3 %v6303_v11 }
  0x30   :  { %v6158_v13 = vld [vmem:[%s12916_s1 + $0x680] sm:$0xf]  ;;  %v8254_v17 = vld [vmem:[%s12916_s1 + $0x78c] sm:$0xf0]  ;;  %v9024_v19 = vpack.c.b16 %v564_v9, %v564_v9  ;;  %v9028_v22 = vpack.c.b16 %v565_v15, %v565_v15  ;;  %v6031_v23 = vor.u32 %v8190_v12, %v6030_v7  ;;  %v570_v15 = vunpack.c.l.b16 %v29_v3 }
  0x31   :  { %v6286_v16 = vld [vmem:[%s12916_s1 + $0x780] sm:$0xf]  ;;  %v6159_v24 = vor.u32 %v8222_v14, %v6158_v13  ;;  %v8154_v26 = vld [vmem:[%s12916_s1 + $0x46c] sm:$0xf0]  ;;  %3227 = vmatpush.bf16.msrb.mxu0 %v5903_v21 }
  0x32   :  { %v5886_v25 = vld [vmem:[%s12916_s1 + $0x460] sm:$0xf]  ;;  %v6287_v28 = vor.u32 %v8254_v17, %v6286_v16  ;;  %v8186_v29 = vld [vmem:[%s12916_s1 + $0x56c] sm:$0xf0]  ;;  %3180 = vmatmul.bf16.vlgmr.msra.gmra.mxu0 %v9024_v19  ;;  %3193 = vmatmul.bf16.vlgmr.msra.gmra.mxu1 %v9028_v22 }
  0x33   :  { %v6014_v27 = vld [vmem:[%s12916_s1 + $0x560] sm:$0xf]  ;;  %v8218_v31 = vld [vmem:[%s12916_s1 + $0x66c] sm:$0xf0]  ;;  %v5887_v34 = vor.u32 %v8154_v26, %v5886_v25  ;;  %3240 = vmatpush.bf16.msrb.mxu1 %v6031_v23  ;;  %3253 = vmatpush.bf16.msrb.mxu2 %v6159_v24  ;;  %v571_v25 = vunpack.c.h.b16 %v29_v3 }
  0x34   :  { %v6142_v30 = vld [vmem:[%s12916_s1 + $0x660] sm:$0xf]  ;;  %v8250_v33 = vld [vmem:[%s12916_s1 + $0x76c] sm:$0xf0]  ;;  %v6015_v35 = vor.u32 %v8186_v29, %v6014_v27  ;;  %3266 = vmatpush.bf16.msrb.mxu3 %v6287_v28 }
  0x35   :  { %v6270_v32 = vld [vmem:[%s12916_s1 + $0x760] sm:$0xf]  ;;  %v6143_v36 = vor.u32 %v8218_v31, %v6142_v30  ;;  %v8150_v38 = vld [vmem:[%s12916_s1 + $0x44c] sm:$0xf0]  ;;  %3228 = vmatpush.bf16.msrb.mxu0 %v5887_v34 }
  0x36   :  { %v5870_v37 = vld [vmem:[%s12916_s1 + $0x440] sm:$0xf]  ;;  %v6271_v40 = vor.u32 %v8250_v33, %v6270_v32  ;;  %v8182_v41 = vld [vmem:[%s12916_s1 + $0x54c] sm:$0xf0] }
  0x37   :  { %v5998_v39 = vld [vmem:[%s12916_s1 + $0x540] sm:$0xf]  ;;  %v8214_v43 = vld [vmem:[%s12916_s1 + $0x64c] sm:$0xf0]  ;;  %v5871_v46 = vor.u32 %v8150_v38, %v5870_v37  ;;  %3241 = vmatpush.bf16.msrb.mxu1 %v6015_v35  ;;  %3254 = vmatpush.bf16.msrb.mxu2 %v6143_v36  ;;  %v9178_v38 = vpack.c.b16 %v570_v15, %v570_v15 }
  0x38   :  { %v6126_v42 = vld [vmem:[%s12916_s1 + $0x640] sm:$0xf]  ;;  %v8246_v45 = vld [vmem:[%s12916_s1 + $0x74c] sm:$0xf0]  ;;  %v5999_v47 = vor.u32 %v8182_v41, %v5998_v39  ;;  %3267 = vmatpush.bf16.msrb.mxu3 %v6271_v40 }
  0x39   :  { %v6254_v44 = vld [vmem:[%s12916_s1 + $0x740] sm:$0xf]  ;;  %v6127_v48 = vor.u32 %v8214_v43, %v6126_v42  ;;  %v8146_v50 = vld [vmem:[%s12916_s1 + $0x42c] sm:$0xf0]  ;;  %3229 = vmatpush.bf16.msrb.mxu0 %v5871_v46  ;;  %v9188_v42 = vpack.c.b16 %v571_v25, %v571_v25 }
  0x3a   :  { %v5854_v49 = vld [vmem:[%s12916_s1 + $0x420] sm:$0xf]  ;;  %v6255_v52 = vor.u32 %v8246_v45, %v6254_v44  ;;  %v8178_v53 = vld [vmem:[%s12916_s1 + $0x52c] sm:$0xf0] }
  0x3b   :  { %v5982_v51 = vld [vmem:[%s12916_s1 + $0x520] sm:$0xf]  ;;  %v8210_v55 = vld [vmem:[%s12916_s1 + $0x62c] sm:$0xf0]  ;;  %v5855_v59 = vor.u32 %v8146_v50, %v5854_v49  ;;  %3242 = vmatpush.bf16.msrb.mxu1 %v5999_v47  ;;  %3255 = vmatpush.bf16.msrb.mxu2 %v6127_v48 }
  0x3c   :  { %v6110_v54 = vld [vmem:[%s12916_s1 + $0x620] sm:$0xf]  ;;  %v8242_v57 = vld [vmem:[%s12916_s1 + $0x72c] sm:$0xf0]  ;;  %v5983_v63 = vor.u32 %v8178_v53, %v5982_v51  ;;  %3268 = vmatpush.bf16.msrb.mxu3 %v6255_v52 }
  0x3d   :  { %v6238_v56 = vld [vmem:[%s12916_s1 + $0x720] sm:$0xf]  ;;  %v8142_v60 = vld [vmem:[%s12916_s1 + $0x40c] sm:$0xf0]  ;;  %v6111_v0 = vor.u32 %v8210_v55, %v6110_v54  ;;  %3230 = vmatpush.bf16.msrb.mxu0 %v5855_v59 }
  0x3e   :  { %v5838_v58 = vld [vmem:[%s12916_s1 + $0x400] sm:$0xf]  ;;  %v8174_v62 = vld [vmem:[%s12916_s1 + $0x50c] sm:$0xf0]  ;;  %v6239_v4 = vor.u32 %v8242_v57, %v6238_v56 }
  0x3f   :  { %v5966_v61 = vld [vmem:[%s12916_s1 + $0x500] sm:$0xf]  ;;  %v8206_v2 = vld [vmem:[%s12916_s1 + $0x60c] sm:$0xf0]  ;;  %v5839_v11 = vor.u32 %v8142_v60, %v5838_v58  ;;  %3243 = vmatpush.bf16.msrb.mxu1 %v5983_v63  ;;  %3256 = vmatpush.bf16.msrb.mxu2 %v6111_v0 }
  0x40   :  { %v6094_v1 = vld [vmem:[%s12916_s1 + $0x600] sm:$0xf]  ;;  %v8238_v6 = vld [vmem:[%s12916_s1 + $0x70c] sm:$0xf0]  ;;  %v5967_v16 = vor.u32 %v8174_v62, %v5966_v61  ;;  %3269 = vmatpush.bf16.msrb.mxu3 %v6239_v4 }
  0x41   :  { %v6222_v5 = vld [vmem:[%s12916_s1 + $0x700] sm:$0xf]  ;;  %v28_v7 = vld [vmem:[%s12917_s0 + $0x10] sm:$0xff]  ;;  %v6095_v17 = vor.u32 %v8206_v2, %v6094_v1  ;;  %3231 = vmatpush.bf16.msrb.mxu0 %v5839_v11 }
  0x42   :  { %v6462_v8 = vld [vmem:[%s12916_s1 + $0x8e0] sm:$0xf]  ;;  %v8298_v9 = vld [vmem:[%s12916_s1 + $0x8ec] sm:$0xf0]  ;;  %v568_v24 = vunpack.c.l.b16 %v28_v7  ;;  %v6223_v26 = vor.u32 %v8238_v6, %v6222_v5  ;;  %v569_v28 = vunpack.c.h.b16 %v28_v7 }
  0x43   :  { %v6590_v10 = vld [vmem:[%s12916_s1 + $0x9e0] sm:$0xf]  ;;  %v8330_v12 = vld [vmem:[%s12916_s1 + $0x9ec] sm:$0xf0]  ;;  %v6463_v27 = vor.u32 %v8298_v9, %v6462_v8  ;;  %3244 = vmatpush.bf16.msrb.mxu1 %v5967_v16  ;;  %3257 = vmatpush.bf16.msrb.mxu2 %v6095_v17 }
  0x44   :  { %v6718_v13 = vld [vmem:[%s12916_s1 + $0xae0] sm:$0xf]  ;;  %v8362_v14 = vld [vmem:[%s12916_s1 + $0xaec] sm:$0xf0]  ;;  %v6591_v29 = vor.u32 %v8330_v12, %v6590_v10  ;;  %v9186_v41 = vpack.c.b16 %v568_v24, %v568_v24  ;;  %3270 = vmatpush.bf16.msrb.mxu3 %v6223_v26  ;;  %v9190_v44 = vpack.c.b16 %v569_v28, %v569_v28 }
  0x45   :  { %v6846_v21 = vld [vmem:[%s12916_s1 + $0xbe0] sm:$0xf]  ;;  %v8394_v23 = vld [vmem:[%s12916_s1 + $0xbec] sm:$0xf0]  ;;  %v6719_v30 = vor.u32 %v8362_v14, %v6718_v13  ;;  %3276 = vmatpush.bf16.msra.mxu0 %v6463_v27 }
  0x46   :  { %v6446_v31 = vld [vmem:[%s12916_s1 + $0x8c0] sm:$0xf]  ;;  %v8294_v32 = vld [vmem:[%s12916_s1 + $0x8cc] sm:$0xf0]  ;;  %v6847_v34 = vor.u32 %v8394_v23, %v6846_v21  ;;  %3258 = vmatmul.bf16.vlgmr.msrb.gmra.mxu2 %v9178_v38  ;;  %3232 = vmatmul.bf16.vlgmr.msrb.gmra.mxu0 %v9186_v41 }
  0x47   :  { %v6574_v33 = vld [vmem:[%s12916_s1 + $0x9c0] sm:$0xf]  ;;  %v8326_v35 = vld [vmem:[%s12916_s1 + $0x9cc] sm:$0xf0]  ;;  %v6447_v43 = vor.u32 %v8294_v32, %v6446_v31  ;;  %3289 = vmatpush.bf16.msra.mxu1 %v6591_v29  ;;  %3302 = vmatpush.bf16.msra.mxu2 %v6719_v30 }
  0x48   :  { %v6702_v36 = vld [vmem:[%s12916_s1 + $0xac0] sm:$0xf]  ;;  %v8358_v37 = vld [vmem:[%s12916_s1 + $0xacc] sm:$0xf0]  ;;  %v6575_v45 = vor.u32 %v8326_v35, %v6574_v33  ;;  %3315 = vmatpush.bf16.msra.mxu3 %v6847_v34  ;;  %3245 = vmatmul.bf16.vlgmr.msrb.gmra.mxu1 %v9190_v44 }
  0x49   :  { %v6830_v39 = vld [vmem:[%s12916_s1 + $0xbc0] sm:$0xf]  ;;  %v8390_v40 = vld [vmem:[%s12916_s1 + $0xbcc] sm:$0xf0]  ;;  %v6703_v46 = vor.u32 %v8358_v37, %v6702_v36  ;;  %3271 = vmatmul.bf16.vlgmr.msrb.gmra.mxu3 %v9188_v42  ;;  %3277 = vmatpush.bf16.msra.mxu0 %v6447_v43 }
  0x4a   :  { %v6430_v47 = vld [vmem:[%s12916_s1 + $0x8a0] sm:$0xf]  ;;  %v8290_v48 = vld [vmem:[%s12916_s1 + $0x8ac] sm:$0xf0]  ;;  %v6831_v50 = vor.u32 %v8390_v40, %v6830_v39 }
  0x4b   :  { %v6558_v49 = vld [vmem:[%s12916_s1 + $0x9a0] sm:$0xf]  ;;  %v8322_v51 = vld [vmem:[%s12916_s1 + $0x9ac] sm:$0xf0]  ;;  %v6431_v56 = vor.u32 %v8290_v48, %v6430_v47  ;;  %3290 = vmatpush.bf16.msra.mxu1 %v6575_v45  ;;  %3303 = vmatpush.bf16.msra.mxu2 %v6703_v46 }
  0x4c   :  { %v6686_v52 = vld [vmem:[%s12916_s1 + $0xaa0] sm:$0xf]  ;;  %v8354_v53 = vld [vmem:[%s12916_s1 + $0xaac] sm:$0xf0]  ;;  %v6559_v57 = vor.u32 %v8322_v51, %v6558_v49  ;;  %3316 = vmatpush.bf16.msra.mxu3 %v6831_v50 }
  0x4d   :  { %v6814_v54 = vld [vmem:[%s12916_s1 + $0xba0] sm:$0xf]  ;;  %v8386_v55 = vld [vmem:[%s12916_s1 + $0xbac] sm:$0xf0]  ;;  %v6687_v58 = vor.u32 %v8354_v53, %v6686_v52  ;;  %3278 = vmatpush.bf16.msra.mxu0 %v6431_v56 }
  0x4e   :  { %v6414_v59 = vld [vmem:[%s12916_s1 + $0x880] sm:$0xf]  ;;  %v8286_v60 = vld [vmem:[%s12916_s1 + $0x88c] sm:$0xf0]  ;;  %v6815_v62 = vor.u32 %v8386_v55, %v6814_v54 }
  0x4f   :  { %v6542_v61 = vld [vmem:[%s12916_s1 + $0x980] sm:$0xf]  ;;  %v8318_v63 = vld [vmem:[%s12916_s1 + $0x98c] sm:$0xf0]  ;;  %v6415_v4 = vor.u32 %v8286_v60, %v6414_v59  ;;  %3291 = vmatpush.bf16.msra.mxu1 %v6559_v57  ;;  %3304 = vmatpush.bf16.msra.mxu2 %v6687_v58 }
  0x50   :  { %v6670_v0 = vld [vmem:[%s12916_s1 + $0xa80] sm:$0xf]  ;;  %v8350_v1 = vld [vmem:[%s12916_s1 + $0xa8c] sm:$0xf0]  ;;  %v6543_v5 = vor.u32 %v8318_v63, %v6542_v61  ;;  %3317 = vmatpush.bf16.msra.mxu3 %v6815_v62  ;;  %v31_v61 = vld [vmem:[%s12917_s0 + $0x28] sm:$0xff] }
  0x51   :  { %v6798_v2 = vld [vmem:[%s12916_s1 + $0xb80] sm:$0xf]  ;;  %v8382_v3 = vld [vmem:[%s12916_s1 + $0xb8c] sm:$0xf0]  ;;  %v6671_v6 = vor.u32 %v8350_v1, %v6670_v0  ;;  %3279 = vmatpush.bf16.msra.mxu0 %v6415_v4 }
  0x52   :  { %v6398_v7 = vld [vmem:[%s12916_s1 + $0x860] sm:$0xf]  ;;  %v8282_v8 = vld [vmem:[%s12916_s1 + $0x86c] sm:$0xf0]  ;;  %v6799_v10 = vor.u32 %v8382_v3, %v6798_v2 }
  0x53   :  { %v6526_v9 = vld [vmem:[%s12916_s1 + $0x960] sm:$0xf]  ;;  %v8314_v11 = vld [vmem:[%s12916_s1 + $0x96c] sm:$0xf0]  ;;  %v6399_v16 = vor.u32 %v8282_v8, %v6398_v7  ;;  %3292 = vmatpush.bf16.msra.mxu1 %v6543_v5  ;;  %3305 = vmatpush.bf16.msra.mxu2 %v6671_v6 }
  0x54   :  { %v6654_v12 = vld [vmem:[%s12916_s1 + $0xa60] sm:$0xf]  ;;  %v8346_v13 = vld [vmem:[%s12916_s1 + $0xa6c] sm:$0xf0]  ;;  %v6527_v17 = vor.u32 %v8314_v11, %v6526_v9  ;;  %3318 = vmatpush.bf16.msra.mxu3 %v6799_v10  ;;  %v574_v10 = vunpack.c.l.b16 %v31_v61 }
  0x55   :  { %v6782_v14 = vld [vmem:[%s12916_s1 + $0xb60] sm:$0xf]  ;;  %v8378_v15 = vld [vmem:[%s12916_s1 + $0xb6c] sm:$0xf0]  ;;  %v6655_v21 = vor.u32 %v8346_v13, %v6654_v12  ;;  %3280 = vmatpush.bf16.msra.mxu0 %v6399_v16 }
  0x56   :  { %v6382_v23 = vld [vmem:[%s12916_s1 + $0x840] sm:$0xf]  ;;  %v8278_v24 = vld [vmem:[%s12916_s1 + $0x84c] sm:$0xf0]  ;;  %v6783_v26 = vor.u32 %v8378_v15, %v6782_v14  ;;  %v575_v14 = vunpack.c.h.b16 %v31_v61 }
  0x57   :  { %v6510_v25 = vld [vmem:[%s12916_s1 + $0x940] sm:$0xf]  ;;  %v8310_v27 = vld [vmem:[%s12916_s1 + $0x94c] sm:$0xf0]  ;;  %v6383_v32 = vor.u32 %v8278_v24, %v6382_v23  ;;  %3293 = vmatpush.bf16.msra.mxu1 %v6527_v17  ;;  %3306 = vmatpush.bf16.msra.mxu2 %v6655_v21 }
  0x58   :  { %v6638_v28 = vld [vmem:[%s12916_s1 + $0xa40] sm:$0xf]  ;;  %v8342_v29 = vld [vmem:[%s12916_s1 + $0xa4c] sm:$0xf0]  ;;  %v6511_v33 = vor.u32 %v8310_v27, %v6510_v25  ;;  %3319 = vmatpush.bf16.msra.mxu3 %v6783_v26 }
  0x59   :  { %v6766_v30 = vld [vmem:[%s12916_s1 + $0xb40] sm:$0xf]  ;;  %v8374_v31 = vld [vmem:[%s12916_s1 + $0xb4c] sm:$0xf0]  ;;  %v6639_v34 = vor.u32 %v8342_v29, %v6638_v28  ;;  %3281 = vmatpush.bf16.msra.mxu0 %v6383_v32  ;;  %v9390_v29 = vpack.c.b16 %v574_v10, %v574_v10 }
  0x5a   :  { %v6366_v35 = vld [vmem:[%s12916_s1 + $0x820] sm:$0xf]  ;;  %v8274_v36 = vld [vmem:[%s12916_s1 + $0x82c] sm:$0xf0]  ;;  %v6767_v39 = vor.u32 %v8374_v31, %v6766_v30 }
  0x5b   :  { %v6494_v37 = vld [vmem:[%s12916_s1 + $0x920] sm:$0xf]  ;;  %v8306_v40 = vld [vmem:[%s12916_s1 + $0x92c] sm:$0xf0]  ;;  %v6367_v49 = vor.u32 %v8274_v36, %v6366_v35  ;;  %3294 = vmatpush.bf16.msra.mxu1 %v6511_v33  ;;  %3307 = vmatpush.bf16.msra.mxu2 %v6639_v34  ;;  %v9400_v33 = vpack.c.b16 %v575_v14, %v575_v14 }
  0x5c   :  { %v6622_v43 = vld [vmem:[%s12916_s1 + $0xa20] sm:$0xf]  ;;  %v8338_v45 = vld [vmem:[%s12916_s1 + $0xa2c] sm:$0xf0]  ;;  %v6495_v53 = vor.u32 %v8306_v40, %v6494_v37  ;;  %3320 = vmatpush.bf16.msra.mxu3 %v6767_v39 }
  0x5d   :  { %v6750_v46 = vld [vmem:[%s12916_s1 + $0xb20] sm:$0xf]  ;;  %v8370_v47 = vld [vmem:[%s12916_s1 + $0xb2c] sm:$0xf0]  ;;  %v6623_v54 = vor.u32 %v8338_v45, %v6622_v43  ;;  %3282 = vmatpush.bf16.msra.mxu0 %v6367_v49 }
  0x5e   :  { %v6350_v48 = vld [vmem:[%s12916_s1 + $0x800] sm:$0xf]  ;;  %v8270_v50 = vld [vmem:[%s12916_s1 + $0x80c] sm:$0xf0]  ;;  %v6751_v58 = vor.u32 %v8370_v47, %v6750_v46 }
  0x5f   :  { %v6478_v51 = vld [vmem:[%s12916_s1 + $0x900] sm:$0xf]  ;;  %v8302_v52 = vld [vmem:[%s12916_s1 + $0x90c] sm:$0xf0]  ;;  %v6351_v1 = vor.u32 %v8270_v50, %v6350_v48  ;;  %3295 = vmatpush.bf16.msra.mxu1 %v6495_v53  ;;  %3308 = vmatpush.bf16.msra.mxu2 %v6623_v54 }
  0x60   :  { %v6606_v55 = vld [vmem:[%s12916_s1 + $0xa00] sm:$0xf]  ;;  %v8334_v56 = vld [vmem:[%s12916_s1 + $0xa0c] sm:$0xf0]  ;;  %v6479_v6 = vor.u32 %v8302_v52, %v6478_v51  ;;  %3321 = vmatpush.bf16.msra.mxu3 %v6751_v58 }
  0x61   :  { %v30_v57 = vld [vmem:[%s12917_s0 + $0x20] sm:$0xff]  ;;  %v8366_v60 = vld [vmem:[%s12916_s1 + $0xb0c] sm:$0xf0]  ;;  %v6607_v7 = vor.u32 %v8334_v56, %v6606_v55  ;;  %3283 = vmatpush.bf16.msra.mxu0 %v6351_v1 }
  0x62   :  { %v6734_v59 = vld [vmem:[%s12916_s1 + $0xb00] sm:$0xf]  ;;  %v8426_v63 = vld [vmem:[%s12916_s1 + $0xcec] sm:$0xf0]  ;;  %v572_v5 = vunpack.c.l.b16 %v30_v57  ;;  %v573_v11 = vunpack.c.h.b16 %v30_v57 }
  0x63   :  { %v6974_v62 = vld [vmem:[%s12916_s1 + $0xce0] sm:$0xf]  ;;  %v8458_v2 = vld [vmem:[%s12916_s1 + $0xdec] sm:$0xf0]  ;;  %v6735_v12 = vor.u32 %v8366_v60, %v6734_v59  ;;  %3296 = vmatpush.bf16.msra.mxu1 %v6479_v6  ;;  %3309 = vmatpush.bf16.msra.mxu2 %v6607_v7 }
  0x64   :  { %v7102_v0 = vld [vmem:[%s12916_s1 + $0xde0] sm:$0xf]  ;;  %v8490_v4 = vld [vmem:[%s12916_s1 + $0xeec] sm:$0xf0]  ;;  %v6975_v13 = vor.u32 %v8426_v63, %v6974_v62  ;;  %v9379_v25 = vpack.c.b16 %v572_v5, %v572_v5  ;;  %v9392_v30 = vpack.c.b16 %v573_v11, %v573_v11 }
  0x65   :  { %v7230_v3 = vld [vmem:[%s12916_s1 + $0xee0] sm:$0xf]  ;;  %v8522_v9 = vld [vmem:[%s12916_s1 + $0xfec] sm:$0xf0]  ;;  %v7103_v15 = vor.u32 %v8458_v2, %v7102_v0  ;;  %3322 = vmatpush.bf16.msra.mxu3 %v6735_v12 }
  0x66   :  { %v7358_v8 = vld [vmem:[%s12916_s1 + $0xfe0] sm:$0xf]  ;;  %v7231_v16 = vor.u32 %v8490_v4, %v7230_v3  ;;  %v8422_v21 = vld [vmem:[%s12916_s1 + $0xccc] sm:$0xf0]  ;;  %3328 = vmatpush.bf16.msrb.mxu0 %v6975_v13  ;;  %3310 = vmatmul.bf16.vlgmr.msra.gmra.mxu2 %v9390_v29 }
  0x67   :  { %v6958_v17 = vld [vmem:[%s12916_s1 + $0xcc0] sm:$0xf]  ;;  %v7359_v24 = vor.u32 %v8522_v9, %v7358_v8  ;;  %v8454_v26 = vld [vmem:[%s12916_s1 + $0xdcc] sm:$0xf0]  ;;  %3341 = vmatpush.bf16.msrb.mxu1 %v7103_v15  ;;  %3284 = vmatmul.bf16.vlgmr.msra.gmra.mxu0 %v9379_v25 }
  0x68   :  { %v7086_v23 = vld [vmem:[%s12916_s1 + $0xdc0] sm:$0xf]  ;;  %v8486_v28 = vld [vmem:[%s12916_s1 + $0xecc] sm:$0xf0]  ;;  %v6959_v34 = vor.u32 %v8422_v21, %v6958_v17  ;;  %3354 = vmatpush.bf16.msrb.mxu2 %v7231_v16  ;;  %3297 = vmatmul.bf16.vlgmr.msra.gmra.mxu1 %v9392_v30 }
  0x69   :  { %v7214_v27 = vld [vmem:[%s12916_s1 + $0xec0] sm:$0xf]  ;;  %v8518_v32 = vld [vmem:[%s12916_s1 + $0xfcc] sm:$0xf0]  ;;  %v7087_v35 = vor.u32 %v8454_v26, %v7086_v23  ;;  %3367 = vmatpush.bf16.msrb.mxu3 %v7359_v24 }
  0x6a   :  { %v7342_v31 = vld [vmem:[%s12916_s1 + $0xfc0] sm:$0xf]  ;;  %v7215_v36 = vor.u32 %v8486_v28, %v7214_v27  ;;  %v8418_v39 = vld [vmem:[%s12916_s1 + $0xcac] sm:$0xf0]  ;;  %3323 = vmatmul.bf16.vlgmr.msra.gmra.mxu3 %v9400_v33  ;;  %3329 = vmatpush.bf16.msrb.mxu0 %v6959_v34 }
  0x6b   :  { %v6942_v37 = vld [vmem:[%s12916_s1 + $0xca0] sm:$0xf]  ;;  %v7343_v43 = vor.u32 %v8518_v32, %v7342_v31  ;;  %v8450_v45 = vld [vmem:[%s12916_s1 + $0xdac] sm:$0xf0]  ;;  %3342 = vmatpush.bf16.msrb.mxu1 %v7087_v35 }
  0x6c   :  { %v7070_v40 = vld [vmem:[%s12916_s1 + $0xda0] sm:$0xf]  ;;  %v8482_v47 = vld [vmem:[%s12916_s1 + $0xeac] sm:$0xf0]  ;;  %v6943_v50 = vor.u32 %v8418_v39, %v6942_v37  ;;  %3355 = vmatpush.bf16.msrb.mxu2 %v7215_v36 }
  0x6d   :  { %v7198_v46 = vld [vmem:[%s12916_s1 + $0xea0] sm:$0xf]  ;;  %v8514_v49 = vld [vmem:[%s12916_s1 + $0xfac] sm:$0xf0]  ;;  %v7071_v51 = vor.u32 %v8450_v45, %v7070_v40  ;;  %3368 = vmatpush.bf16.msrb.mxu3 %v7343_v43 }
  0x6e   :  { %v7326_v48 = vld [vmem:[%s12916_s1 + $0xfa0] sm:$0xf]  ;;  %v7199_v52 = vor.u32 %v8482_v47, %v7198_v46  ;;  %v8414_v54 = vld [vmem:[%s12916_s1 + $0xc8c] sm:$0xf0]  ;;  %3330 = vmatpush.bf16.msrb.mxu0 %v6943_v50 }
  0x6f   :  { %v6926_v53 = vld [vmem:[%s12916_s1 + $0xc80] sm:$0xf]  ;;  %v7327_v56 = vor.u32 %v8514_v49, %v7326_v48  ;;  %v8446_v57 = vld [vmem:[%s12916_s1 + $0xd8c] sm:$0xf0]  ;;  %3343 = vmatpush.bf16.msrb.mxu1 %v7071_v51 }
  0x70   :  { %v7054_v55 = vld [vmem:[%s12916_s1 + $0xd80] sm:$0xf]  ;;  %v8478_v59 = vld [vmem:[%s12916_s1 + $0xe8c] sm:$0xf0]  ;;  %v6927_v62 = vor.u32 %v8414_v54, %v6926_v53  ;;  %3356 = vmatpush.bf16.msrb.mxu2 %v7199_v52 }
  0x71   :  { %v7182_v58 = vld [vmem:[%s12916_s1 + $0xe80] sm:$0xf]  ;;  %v8510_v61 = vld [vmem:[%s12916_s1 + $0xf8c] sm:$0xf0]  ;;  %v7055_v63 = vor.u32 %v8446_v57, %v7054_v55  ;;  %3369 = vmatpush.bf16.msrb.mxu3 %v7327_v56 }
  0x72   :  { %v7310_v60 = vld [vmem:[%s12916_s1 + $0xf80] sm:$0xf]  ;;  %v7183_v0 = vor.u32 %v8478_v59, %v7182_v58  ;;  %v8410_v2 = vld [vmem:[%s12916_s1 + $0xc6c] sm:$0xf0]  ;;  %3331 = vmatpush.bf16.msrb.mxu0 %v6927_v62  ;;  %v33_v59 = vld [vmem:[%s12917_s0 + $0x38] sm:$0xff] }
  0x73   :  { %v6910_v1 = vld [vmem:[%s12916_s1 + $0xc60] sm:$0xf]  ;;  %v7311_v4 = vor.u32 %v8510_v61, %v7310_v60  ;;  %v8442_v5 = vld [vmem:[%s12916_s1 + $0xd6c] sm:$0xf0]  ;;  %3344 = vmatpush.bf16.msrb.mxu1 %v7055_v63  ;;  %v8040_v60 = vld [vmem:[%s12916_s1 + $0xe4] sm:$0xf] }
  0x74   :  { %v7038_v3 = vld [vmem:[%s12916_s1 + $0xd60] sm:$0xf]  ;;  %v8474_v7 = vld [vmem:[%s12916_s1 + $0xe6c] sm:$0xf0]  ;;  %v6911_v10 = vor.u32 %v8410_v2, %v6910_v1  ;;  %3357 = vmatpush.bf16.msrb.mxu2 %v7183_v0  ;;  %v5440_v61 = vld [vmem:[%s12916_s1 + $0xf0] sm:$0xf0] }
  0x75   :  { %v7166_v6 = vld [vmem:[%s12916_s1 + $0xe60] sm:$0xf]  ;;  %v8506_v9 = vld [vmem:[%s12916_s1 + $0xf6c] sm:$0xf0]  ;;  %v7039_v11 = vor.u32 %v8442_v5, %v7038_v3  ;;  %3370 = vmatpush.bf16.msrb.mxu3 %v7311_v4  ;;  %v8072_v62 = vld [vmem:[%s12916_s1 + $0x1e4] sm:$0xf] }
  0x76   :  { %v7294_v8 = vld [vmem:[%s12916_s1 + $0xf60] sm:$0xf]  ;;  %v7167_v12 = vor.u32 %v8474_v7, %v7166_v6  ;;  %v8406_v14 = vld [vmem:[%s12916_s1 + $0xc4c] sm:$0xf0]  ;;  %3332 = vmatpush.bf16.msrb.mxu0 %v6911_v10  ;;  %v5568_v0 = vld [vmem:[%s12916_s1 + $0x1f0] sm:$0xf0] }
  0x77   :  { %v6894_v13 = vld [vmem:[%s12916_s1 + $0xc40] sm:$0xf]  ;;  %v7295_v16 = vor.u32 %v8506_v9, %v7294_v8  ;;  %v8438_v17 = vld [vmem:[%s12916_s1 + $0xd4c] sm:$0xf0]  ;;  %3345 = vmatpush.bf16.msrb.mxu1 %v7039_v11  ;;  %v8104_v1 = vld [vmem:[%s12916_s1 + $0x2e4] sm:$0xf]  ;;  %v578_v8 = vunpack.c.l.b16 %v33_v59  ;;  %v5443_v11 = vor.u32 %v8040_v60, %v5440_v61 }
  0x78   :  { %v7022_v15 = vld [vmem:[%s12916_s1 + $0xd40] sm:$0xf]  ;;  %v8470_v23 = vld [vmem:[%s12916_s1 + $0xe4c] sm:$0xf0]  ;;  %v6895_v27 = vor.u32 %v8406_v14, %v6894_v13  ;;  %3358 = vmatpush.bf16.msrb.mxu2 %v7167_v12  ;;  %v5696_v2 = vld [vmem:[%s12916_s1 + $0x2f0] sm:$0xf0]  ;;  %v579_v12 = vunpack.c.h.b16 %v33_v59  ;;  %v5571_v13 = vor.u32 %v8072_v62, %v5568_v0 }
  0x79   :  { %v7150_v21 = vld [vmem:[%s12916_s1 + $0xe40] sm:$0xf]  ;;  %v8502_v26 = vld [vmem:[%s12916_s1 + $0xf4c] sm:$0xf0]  ;;  %v7023_v28 = vor.u32 %v8438_v17, %v7022_v15  ;;  %3371 = vmatpush.bf16.msrb.mxu3 %v7295_v16  ;;  %v8136_v6 = vld [vmem:[%s12916_s1 + $0x3e4] sm:$0xf]  ;;  %v5699_v14 = vor.u32 %v8104_v1, %v5696_v2 }
  0x7a   :  { %v7278_v24 = vld [vmem:[%s12916_s1 + $0xf40] sm:$0xf]  ;;  %v7151_v31 = vor.u32 %v8470_v23, %v7150_v21  ;;  %v8402_v34 = vld [vmem:[%s12916_s1 + $0xc2c] sm:$0xf0]  ;;  %3333 = vmatpush.bf16.msrb.mxu0 %v6895_v27  ;;  %v5824_v7 = vld [vmem:[%s12916_s1 + $0x3f0] sm:$0xf0] }
  0x7b   :  { %v6878_v32 = vld [vmem:[%s12916_s1 + $0xc20] sm:$0xf]  ;;  %v7279_v36 = vor.u32 %v8502_v26, %v7278_v24  ;;  %v8434_v37 = vld [vmem:[%s12916_s1 + $0xd2c] sm:$0xf0]  ;;  %3346 = vmatpush.bf16.msrb.mxu1 %v7023_v28  ;;  %v8036_v15 = vld [vmem:[%s12916_s1 + $0xc4] sm:$0xf]  ;;  %v5827_v21 = vor.u32 %v8136_v6, %v5824_v7  ;;  %v9600_v28 = vpack.c.b16 %v578_v8, %v578_v8 }
  0x7c   :  { %v7006_v35 = vld [vmem:[%s12916_s1 + $0xd20] sm:$0xf]  ;;  %v8466_v40 = vld [vmem:[%s12916_s1 + $0xe2c] sm:$0xf0]  ;;  %v6879_v47 = vor.u32 %v8402_v34, %v6878_v32  ;;  %3359 = vmatpush.bf16.msrb.mxu2 %v7151_v31  ;;  %v5424_v16 = vld [vmem:[%s12916_s1 + $0xd0] sm:$0xf0] }
  0x7d   :  { %v7134_v39 = vld [vmem:[%s12916_s1 + $0xe20] sm:$0xf]  ;;  %v8498_v45 = vld [vmem:[%s12916_s1 + $0xf2c] sm:$0xf0]  ;;  %v7007_v51 = vor.u32 %v8434_v37, %v7006_v35  ;;  %3372 = vmatpush.bf16.msrb.mxu3 %v7279_v36  ;;  %v8068_v17 = vld [vmem:[%s12916_s1 + $0x1c4] sm:$0xf]  ;;  %v9610_v35 = vpack.c.b16 %v579_v12, %v579_v12  ;;  %v5427_v36 = vor.u32 %v8036_v15, %v5424_v16 }
  0x7e   :  { %v7262_v43 = vld [vmem:[%s12916_s1 + $0xf20] sm:$0xf]  ;;  %v8398_v48 = vld [vmem:[%s12916_s1 + $0xc0c] sm:$0xf0]  ;;  %v7135_v52 = vor.u32 %v8466_v40, %v7134_v39  ;;  %3334 = vmatpush.bf16.msrb.mxu0 %v6879_v47  ;;  %v5552_v24 = vld [vmem:[%s12916_s1 + $0x1d0] sm:$0xf0] }
  0x7f   :  { %v6862_v46 = vld [vmem:[%s12916_s1 + $0xc00] sm:$0xf]  ;;  %v8430_v50 = vld [vmem:[%s12916_s1 + $0xd0c] sm:$0xf0]  ;;  %v7263_v56 = vor.u32 %v8498_v45, %v7262_v43  ;;  %3347 = vmatpush.bf16.msrb.mxu1 %v7007_v51  ;;  %v8100_v26 = vld [vmem:[%s12916_s1 + $0x2c4] sm:$0xf]  ;;  %v5555_v37 = vor.u32 %v8068_v17, %v5552_v24 }
  0x80   :  { %v6990_v49 = vld [vmem:[%s12916_s1 + $0xd00] sm:$0xf]  ;;  %v8462_v54 = vld [vmem:[%s12916_s1 + $0xe0c] sm:$0xf0]  ;;  %v6863_v63 = vor.u32 %v8398_v48, %v6862_v46  ;;  %3360 = vmatpush.bf16.msrb.mxu2 %v7135_v52  ;;  %v5680_v27 = vld [vmem:[%s12916_s1 + $0x2d0] sm:$0xf0] }
  0x81   :  { %v7118_v53 = vld [vmem:[%s12916_s1 + $0xe00] sm:$0xf]  ;;  %v32_v55 = vld [vmem:[%s12917_s0 + $0x30] sm:$0xff]  ;;  %v6991_v4 = vor.u32 %v8430_v50, %v6990_v49  ;;  %3373 = vmatpush.bf16.msrb.mxu3 %v7263_v56  ;;  %v8132_v32 = vld [vmem:[%s12916_s1 + $0x3c4] sm:$0xf]  ;;  %v5683_v39 = vor.u32 %v8100_v26, %v5680_v27 }
  0x82   :  { %v7246_v57 = vld [vmem:[%s12916_s1 + $0xf00] sm:$0xf]  ;;  %v8494_v58 = vld [vmem:[%s12916_s1 + $0xf0c] sm:$0xf0]  ;;  %v576_v3 = vunpack.c.l.b16 %v32_v55  ;;  %v7119_v5 = vor.u32 %v8462_v54, %v7118_v53  ;;  %v577_v9 = vunpack.c.h.b16 %v32_v55  ;;  %3335 = vmatpush.bf16.msrb.mxu0 %v6863_v63  ;;  %v5808_v34 = vld [vmem:[%s12916_s1 + $0x3d0] sm:$0xf0] }
  0x83   :  { %v7247_v10 = vor.u32 %v8494_v58, %v7246_v57  ;;  %3348 = vmatpush.bf16.msrb.mxu1 %v6991_v4  ;;  %v8032_v40 = vld [vmem:[%s12916_s1 + $0xa4] sm:$0xf]  ;;  %v5408_v43 = vld [vmem:[%s12916_s1 + $0xb0] sm:$0xf0]  ;;  %v5811_v46 = vor.u32 %v8132_v32, %v5808_v34 }
  0x84   :  { %v9589_v23 = vpack.c.b16 %v576_v3, %v576_v3  ;;  %3361 = vmatpush.bf16.msrb.mxu2 %v7119_v5  ;;  %v9602_v31 = vpack.c.b16 %v577_v9, %v577_v9  ;;  %v8064_v45 = vld [vmem:[%s12916_s1 + $0x1a4] sm:$0xf]  ;;  %v5536_v47 = vld [vmem:[%s12916_s1 + $0x1b0] sm:$0xf0]  ;;  %v5411_v52 = vor.u32 %v8032_v40, %v5408_v43 }
  0x85   :  { %3374 = vmatpush.bf16.msrb.mxu3 %v7247_v10  ;;  %v8096_v48 = vld [vmem:[%s12916_s1 + $0x2a4] sm:$0xf]  ;;  %v5664_v49 = vld [vmem:[%s12916_s1 + $0x2b0] sm:$0xf0]  ;;  %v5539_v53 = vor.u32 %v8064_v45, %v5536_v47 }
  0x86   :  { %3380 = vmatpush.bf16.msra.mxu0 %v5443_v11  ;;  %3349 = vmatmul.bf16.vlgmr.msrb.gmra.mxu1 %v9602_v31  ;;  %v8128_v50 = vld [vmem:[%s12916_s1 + $0x3a4] sm:$0xf]  ;;  %v5792_v51 = vld [vmem:[%s12916_s1 + $0x3b0] sm:$0xf0]  ;;  %v5667_v54 = vor.u32 %v8096_v48, %v5664_v49 }
  0x87   :  { %3393 = vmatpush.bf16.msra.mxu1 %v5571_v13  ;;  %3336 = vmatmul.bf16.vlgmr.msrb.gmra.mxu0 %v9589_v23  ;;  %v8028_v55 = vld [vmem:[%s12916_s1 + $0x84] sm:$0xf]  ;;  %v5392_v56 = vld [vmem:[%s12916_s1 + $0x90] sm:$0xf0]  ;;  %v5795_v58 = vor.u32 %v8128_v50, %v5792_v51 }
  0x88   :  { %3406 = vmatpush.bf16.msra.mxu2 %v5699_v14  ;;  %3375 = vmatmul.bf16.vlgmr.msrb.gmra.mxu3 %v9610_v35  ;;  %v8060_v57 = vld [vmem:[%s12916_s1 + $0x184] sm:$0xf]  ;;  %v5520_v59 = vld [vmem:[%s12916_s1 + $0x190] sm:$0xf0]  ;;  %v5395_v0 = vor.u32 %v8028_v55, %v5392_v56 }
  0x89   :  { %3419 = vmatpush.bf16.msra.mxu3 %v5827_v21  ;;  %3362 = vmatmul.bf16.vlgmr.msrb.gmra.mxu2 %v9600_v28  ;;  %v8092_v60 = vld [vmem:[%s12916_s1 + $0x284] sm:$0xf]  ;;  %v5648_v61 = vld [vmem:[%s12916_s1 + $0x290] sm:$0xf0]  ;;  %v5523_v1 = vor.u32 %v8060_v57, %v5520_v59 }
  0x8a   :  { %3381 = vmatpush.bf16.msra.mxu0 %v5427_v36  ;;  %v8124_v62 = vld [vmem:[%s12916_s1 + $0x384] sm:$0xf]  ;;  %v5776_v63 = vld [vmem:[%s12916_s1 + $0x390] sm:$0xf0]  ;;  %v5651_v2 = vor.u32 %v8092_v60, %v5648_v61 }
  0x8b   :  { %3394 = vmatpush.bf16.msra.mxu1 %v5555_v37  ;;  %v8024_v3 = vld [vmem:[%s12916_s1 + $0x64] sm:$0xf]  ;;  %v5376_v4 = vld [vmem:[%s12916_s1 + $0x70] sm:$0xf0]  ;;  %v5779_v6 = vor.u32 %v8124_v62, %v5776_v63 }
  0x8c   :  { %3407 = vmatpush.bf16.msra.mxu2 %v5683_v39  ;;  %v8056_v5 = vld [vmem:[%s12916_s1 + $0x164] sm:$0xf]  ;;  %v5504_v7 = vld [vmem:[%s12916_s1 + $0x170] sm:$0xf0]  ;;  %v5379_v12 = vor.u32 %v8024_v3, %v5376_v4 }
  0x8d   :  { %3420 = vmatpush.bf16.msra.mxu3 %v5811_v46  ;;  %v8088_v8 = vld [vmem:[%s12916_s1 + $0x264] sm:$0xf]  ;;  %v5632_v9 = vld [vmem:[%s12916_s1 + $0x270] sm:$0xf0]  ;;  %v5507_v13 = vor.u32 %v8056_v5, %v5504_v7 }
  0x8e   :  { %3382 = vmatpush.bf16.msra.mxu0 %v5411_v52  ;;  %v8120_v10 = vld [vmem:[%s12916_s1 + $0x364] sm:$0xf]  ;;  %v5760_v11 = vld [vmem:[%s12916_s1 + $0x370] sm:$0xf0]  ;;  %v5635_v14 = vor.u32 %v8088_v8, %v5632_v9 }
  0x8f   :  { %3395 = vmatpush.bf16.msra.mxu1 %v5539_v53  ;;  %v8020_v15 = vld [vmem:[%s12916_s1 + $0x44] sm:$0xf]  ;;  %v5360_v16 = vld [vmem:[%s12916_s1 + $0x50] sm:$0xf0]  ;;  %v5763_v21 = vor.u32 %v8120_v10, %v5760_v11 }
  0x90   :  { %3408 = vmatpush.bf16.msra.mxu2 %v5667_v54  ;;  %v8052_v17 = vld [vmem:[%s12916_s1 + $0x144] sm:$0xf]  ;;  %v5488_v24 = vld [vmem:[%s12916_s1 + $0x150] sm:$0xf0]  ;;  %v5363_v36 = vor.u32 %v8020_v15, %v5360_v16 }
  0x91   :  { %3421 = vmatpush.bf16.msra.mxu3 %v5795_v58  ;;  %v8084_v26 = vld [vmem:[%s12916_s1 + $0x244] sm:$0xf]  ;;  %v5616_v27 = vld [vmem:[%s12916_s1 + $0x250] sm:$0xf0]  ;;  %v5491_v37 = vor.u32 %v8052_v17, %v5488_v24 }
  0x92   :  { %3383 = vmatpush.bf16.msra.mxu0 %v5395_v0  ;;  %v8116_v32 = vld [vmem:[%s12916_s1 + $0x344] sm:$0xf]  ;;  %v5744_v34 = vld [vmem:[%s12916_s1 + $0x350] sm:$0xf0]  ;;  %v5619_v39 = vor.u32 %v8084_v26, %v5616_v27 }
  0x93   :  { %3396 = vmatpush.bf16.msra.mxu1 %v5523_v1  ;;  %v8016_v40 = vld [vmem:[%s12916_s1 + $0x24] sm:$0xf]  ;;  %v5344_v43 = vld [vmem:[%s12916_s1 + $0x30] sm:$0xf0]  ;;  %v5747_v46 = vor.u32 %v8116_v32, %v5744_v34 }
  0x94   :  { %3409 = vmatpush.bf16.msra.mxu2 %v5651_v2  ;;  %v8048_v45 = vld [vmem:[%s12916_s1 + $0x124] sm:$0xf]  ;;  %v5472_v47 = vld [vmem:[%s12916_s1 + $0x130] sm:$0xf0]  ;;  %v5347_v52 = vor.u32 %v8016_v40, %v5344_v43 }
  0x95   :  { %3422 = vmatpush.bf16.msra.mxu3 %v5779_v6  ;;  %v8080_v48 = vld [vmem:[%s12916_s1 + $0x224] sm:$0xf]  ;;  %v5600_v49 = vld [vmem:[%s12916_s1 + $0x230] sm:$0xf0]  ;;  %v5475_v55 = vor.u32 %v8048_v45, %v5472_v47 }
  0x96   :  { %3384 = vmatpush.bf16.msra.mxu0 %v5379_v12  ;;  %v8112_v50 = vld [vmem:[%s12916_s1 + $0x324] sm:$0xf]  ;;  %v5728_v51 = vld [vmem:[%s12916_s1 + $0x330] sm:$0xf0]  ;;  %v5603_v56 = vor.u32 %v8080_v48, %v5600_v49 }
  0x97   :  { %3397 = vmatpush.bf16.msra.mxu1 %v5507_v13  ;;  %v8012_v53 = vld [vmem:[%s12916_s1 + $0x4] sm:$0xf]  ;;  %v5328_v54 = vld [vmem:[%s12916_s1 + $0x10] sm:$0xf0]  ;;  %v5731_v60 = vor.u32 %v8112_v50, %v5728_v51 }
  0x98   :  { %3410 = vmatpush.bf16.msra.mxu2 %v5635_v14  ;;  %v8044_v57 = vld [vmem:[%s12916_s1 + $0x104] sm:$0xf]  ;;  %v5456_v58 = vld [vmem:[%s12916_s1 + $0x110] sm:$0xf0]  ;;  %v5331_v3 = vor.u32 %v8012_v53, %v5328_v54 }
  0x99   :  { %3423 = vmatpush.bf16.msra.mxu3 %v5763_v21  ;;  %v8076_v59 = vld [vmem:[%s12916_s1 + $0x204] sm:$0xf]  ;;  %v5584_v61 = vld [vmem:[%s12916_s1 + $0x210] sm:$0xf0]  ;;  %v5459_v7 = vor.u32 %v8044_v57, %v5456_v58 }
  0x9a   :  { %3385 = vmatpush.bf16.msra.mxu0 %v5363_v36  ;;  %v8108_v62 = vld [vmem:[%s12916_s1 + $0x304] sm:$0xf]  ;;  %v5712_v63 = vld [vmem:[%s12916_s1 + $0x310] sm:$0xf0]  ;;  %v5587_v8 = vor.u32 %v8076_v59, %v5584_v61 }
  0x9b   :  { %3398 = vmatpush.bf16.msra.mxu1 %v5491_v37  ;;  %v8168_v0 = vld [vmem:[%s12916_s1 + $0x4e4] sm:$0xf]  ;;  %v5952_v1 = vld [vmem:[%s12916_s1 + $0x4f0] sm:$0xf0]  ;;  %v5715_v11 = vor.u32 %v8108_v62, %v5712_v63 }
  0x9c   :  { %3411 = vmatpush.bf16.msra.mxu2 %v5619_v39  ;;  %v8200_v2 = vld [vmem:[%s12916_s1 + $0x5e4] sm:$0xf]  ;;  %v6080_v4 = vld [vmem:[%s12916_s1 + $0x5f0] sm:$0xf0]  ;;  %v5955_v12 = vor.u32 %v8168_v0, %v5952_v1 }
  0x9d   :  { %3424 = vmatpush.bf16.msra.mxu3 %v5747_v46  ;;  %v8232_v5 = vld [vmem:[%s12916_s1 + $0x6e4] sm:$0xf]  ;;  %v6208_v6 = vld [vmem:[%s12916_s1 + $0x6f0] sm:$0xf0]  ;;  %v6083_v13 = vor.u32 %v8200_v2, %v6080_v4 }
  0x9e   :  { %3386 = vmatpush.bf16.msra.mxu0 %v5347_v52  ;;  %v8264_v9 = vld [vmem:[%s12916_s1 + $0x7e4] sm:$0xf]  ;;  %v6336_v10 = vld [vmem:[%s12916_s1 + $0x7f0] sm:$0xf0]  ;;  %v6211_v14 = vor.u32 %v8232_v5, %v6208_v6 }
  0x9f   :  { %3399 = vmatpush.bf16.msra.mxu1 %v5475_v55  ;;  %v8164_v15 = vld [vmem:[%s12916_s1 + $0x4c4] sm:$0xf]  ;;  %v5936_v16 = vld [vmem:[%s12916_s1 + $0x4d0] sm:$0xf0]  ;;  %v6339_v21 = vor.u32 %v8264_v9, %v6336_v10  ;;  %v546_v10 = vld [vmem:[%s12918_s2] sm:$0xf] }
  0xa0   :  { %3412 = vmatpush.bf16.msra.mxu2 %v5603_v56  ;;  %v8196_v17 = vld [vmem:[%s12916_s1 + $0x5c4] sm:$0xf]  ;;  %v6064_v24 = vld [vmem:[%s12916_s1 + $0x5d0] sm:$0xf0]  ;;  %v5939_v36 = vor.u32 %v8164_v15, %v5936_v16 }
  0xa1   :  { %3425 = vmatpush.bf16.msra.mxu3 %v5731_v60  ;;  %v8228_v26 = vld [vmem:[%s12916_s1 + $0x6c4] sm:$0xf]  ;;  %v6192_v27 = vld [vmem:[%s12916_s1 + $0x6d0] sm:$0xf0]  ;;  %v6067_v37 = vor.u32 %v8196_v17, %v6064_v24  ;;  %v548_v24 = vperm.slane %v546_v10, 0 }
  0xa2   :  { %3387 = vmatpush.bf16.msra.mxu0 %v5331_v3  ;;  %v8260_v32 = vld [vmem:[%s12916_s1 + $0x7c4] sm:$0xf]  ;;  %v6320_v34 = vld [vmem:[%s12916_s1 + $0x7d0] sm:$0xf0]  ;;  %v6195_v39 = vor.u32 %v8228_v26, %v6192_v27 }
  0xa3   :  { %3400 = vmatpush.bf16.msra.mxu1 %v5459_v7  ;;  %v8160_v40 = vld [vmem:[%s12916_s1 + $0x4a4] sm:$0xf]  ;;  %v5920_v43 = vld [vmem:[%s12916_s1 + $0x4b0] sm:$0xf0]  ;;  %v6323_v46 = vor.u32 %v8260_v32, %v6320_v34 }
  0xa4   :  { %3413 = vmatpush.bf16.msra.mxu2 %v5587_v8  ;;  %v8192_v45 = vld [vmem:[%s12916_s1 + $0x5a4] sm:$0xf]  ;;  %v6048_v47 = vld [vmem:[%s12916_s1 + $0x5b0] sm:$0xf0]  ;;  %v5923_v52 = vor.u32 %v8160_v40, %v5920_v43 }
  0xa5   :  { %3426 = vmatpush.bf16.msra.mxu3 %v5715_v11  ;;  %v8224_v48 = vld [vmem:[%s12916_s1 + $0x6a4] sm:$0xf]  ;;  %v6176_v49 = vld [vmem:[%s12916_s1 + $0x6b0] sm:$0xf0]  ;;  %3388 = vmatmul.bf16.vlgmr.msra.gmra.mxu0 %v9024_v19  ;;  %v6051_v53 = vor.u32 %v8192_v45, %v6048_v47 }
  0xa6   :  { %3432 = vmatpush.bf16.msrb.mxu0 %v5955_v12  ;;  %v8256_v50 = vld [vmem:[%s12916_s1 + $0x7a4] sm:$0xf]  ;;  %v6304_v51 = vld [vmem:[%s12916_s1 + $0x7b0] sm:$0xf0]  ;;  %3401 = vmatmul.bf16.vlgmr.msra.gmra.mxu1 %v9028_v22  ;;  %v6179_v54 = vor.u32 %v8224_v48, %v6176_v49 }
  0xa7   :  { %3445 = vmatpush.bf16.msrb.mxu1 %v6083_v13  ;;  %3414 = vmatmul.bf16.vlgmr.msra.gmra.mxu2 %v9022_v18  ;;  %v8156_v55 = vld [vmem:[%s12916_s1 + $0x484] sm:$0xf]  ;;  %v5904_v56 = vld [vmem:[%s12916_s1 + $0x490] sm:$0xf0]  ;;  %v6307_v58 = vor.u32 %v8256_v50, %v6304_v51 }
  0xa8   :  { %3458 = vmatpush.bf16.msrb.mxu2 %v6211_v14  ;;  %3427 = vmatmul.bf16.vlgmr.msra.gmra.mxu3 %v9026_v20  ;;  %v8188_v57 = vld [vmem:[%s12916_s1 + $0x584] sm:$0xf]  ;;  %v6032_v59 = vld [vmem:[%s12916_s1 + $0x590] sm:$0xf0]  ;;  %v5907_v0 = vor.u32 %v8156_v55, %v5904_v56 }
  0xa9   :  { %3471 = vmatpush.bf16.msrb.mxu3 %v6339_v21  ;;  %v8220_v60 = vld [vmem:[%s12916_s1 + $0x684] sm:$0xf]  ;;  %v6160_v61 = vld [vmem:[%s12916_s1 + $0x690] sm:$0xf0]  ;;  %v6035_v2 = vor.u32 %v8188_v57, %v6032_v59 }
  0xaa   :  { %3433 = vmatpush.bf16.msrb.mxu0 %v5939_v36  ;;  %v8252_v62 = vld [vmem:[%s12916_s1 + $0x784] sm:$0xf]  ;;  %v6288_v63 = vld [vmem:[%s12916_s1 + $0x790] sm:$0xf0]  ;;  %v6163_v3 = vor.u32 %v8220_v60, %v6160_v61 }
  0xab   :  { %3446 = vmatpush.bf16.msrb.mxu1 %v6067_v37  ;;  %v8152_v1 = vld [vmem:[%s12916_s1 + $0x464] sm:$0xf]  ;;  %v5888_v4 = vld [vmem:[%s12916_s1 + $0x470] sm:$0xf0]  ;;  %v6291_v7 = vor.u32 %v8252_v62, %v6288_v63 }
  0xac   :  { %3459 = vmatpush.bf16.msrb.mxu2 %v6195_v39  ;;  %v8184_v5 = vld [vmem:[%s12916_s1 + $0x564] sm:$0xf]  ;;  %v6016_v6 = vld [vmem:[%s12916_s1 + $0x570] sm:$0xf0]  ;;  %v5891_v13 = vor.u32 %v8152_v1, %v5888_v4 }
  0xad   :  { %3472 = vmatpush.bf16.msrb.mxu3 %v6323_v46  ;;  %v8216_v8 = vld [vmem:[%s12916_s1 + $0x664] sm:$0xf]  ;;  %v6144_v9 = vld [vmem:[%s12916_s1 + $0x670] sm:$0xf0]  ;;  %v6019_v15 = vor.u32 %v8184_v5, %v6016_v6 }
  0xae   :  { %3434 = vmatpush.bf16.msrb.mxu0 %v5923_v52  ;;  %v8248_v11 = vld [vmem:[%s12916_s1 + $0x764] sm:$0xf]  ;;  %v6272_v12 = vld [vmem:[%s12916_s1 + $0x770] sm:$0xf0]  ;;  %v6147_v16 = vor.u32 %v8216_v8, %v6144_v9  ;;  %v3220_v8 = vpop.f32.mrf.mxu3 }
  0xaf   :  { %3447 = vmatpush.bf16.msrb.mxu1 %v6051_v53  ;;  %v8148_v14 = vld [vmem:[%s12916_s1 + $0x444] sm:$0xf]  ;;  %v5872_v17 = vld [vmem:[%s12916_s1 + $0x450] sm:$0xf0]  ;;  %v6275_v26 = vor.u32 %v8248_v11, %v6272_v12  ;;  %v3181_v40 = vpop.f32.mrf.mxu0  ;;  %v3194_v50 = vpop.f32.mrf.mxu1 }
  0xb0   :  { %3460 = vmatpush.bf16.msrb.mxu2 %v6179_v54  ;;  %v8180_v21 = vld [vmem:[%s12916_s1 + $0x544] sm:$0xf]  ;;  %v6000_v27 = vld [vmem:[%s12916_s1 + $0x550] sm:$0xf0]  ;;  %v5875_v39 = vor.u32 %v8148_v14, %v5872_v17  ;;  %v3182_v49 = vadd.f32 %v3181_v40, %v548_v24 }
  0xb1   :  { %3473 = vmatpush.bf16.msrb.mxu3 %v6307_v58  ;;  %v8212_v32 = vld [vmem:[%s12916_s1 + $0x644] sm:$0xf]  ;;  %v6128_v34 = vld [vmem:[%s12916_s1 + $0x650] sm:$0xf0]  ;;  %v6003_v43 = vor.u32 %v8180_v21, %v6000_v27 }
  0xb2   :  { %3435 = vmatpush.bf16.msrb.mxu0 %v5907_v0  ;;  %v8244_v36 = vld [vmem:[%s12916_s1 + $0x744] sm:$0xf]  ;;  %v6256_v37 = vld [vmem:[%s12916_s1 + $0x750] sm:$0xf0]  ;;  %v6131_v45 = vor.u32 %v8212_v32, %v6128_v34  ;;  %v3195_v57 = vadd.f32 %v3194_v50, %v3182_v49 }
  0xb3   :  { %3448 = vmatpush.bf16.msrb.mxu1 %v6035_v2  ;;  %v8144_v46 = vld [vmem:[%s12916_s1 + $0x424] sm:$0xf]  ;;  %v5856_v47 = vld [vmem:[%s12916_s1 + $0x430] sm:$0xf0]  ;;  %v6259_v51 = vor.u32 %v8244_v36, %v6256_v37  ;;  %v3207_v2 = vpop.f32.mrf.mxu2 }
  0xb4   :  { %3461 = vmatpush.bf16.msrb.mxu2 %v6163_v3  ;;  %v8176_v48 = vld [vmem:[%s12916_s1 + $0x524] sm:$0xf]  ;;  %v5984_v52 = vld [vmem:[%s12916_s1 + $0x530] sm:$0xf0]  ;;  %v5859_v58 = vor.u32 %v8144_v46, %v5856_v47 }
  0xb5   :  { %3474 = vmatpush.bf16.msrb.mxu3 %v6291_v7  ;;  %v8208_v53 = vld [vmem:[%s12916_s1 + $0x624] sm:$0xf]  ;;  %v6112_v54 = vld [vmem:[%s12916_s1 + $0x630] sm:$0xf0]  ;;  %v5987_v61 = vor.u32 %v8176_v48, %v5984_v52  ;;  %v3208_v7 = vadd.f32 %v3207_v2, %v3195_v57 }
  0xb6   :  { %3436 = vmatpush.bf16.msrb.mxu0 %v5891_v13  ;;  %v8240_v55 = vld [vmem:[%s12916_s1 + $0x724] sm:$0xf]  ;;  %v6240_v56 = vld [vmem:[%s12916_s1 + $0x730] sm:$0xf0]  ;;  %v6115_v62 = vor.u32 %v8208_v53, %v6112_v54  ;;  %v3222_v54 = vpop.f32.mrf.mxu3 }
  0xb7   :  { %3449 = vmatpush.bf16.msrb.mxu1 %v6019_v15  ;;  %v8140_v59 = vld [vmem:[%s12916_s1 + $0x404] sm:$0xf]  ;;  %v5840_v60 = vld [vmem:[%s12916_s1 + $0x410] sm:$0xf0]  ;;  %v6243_v3 = vor.u32 %v8240_v55, %v6240_v56  ;;  %v3183_v17 = vpop.f32.mrf.mxu0  ;;  %v3196_v32 = vpop.f32.mrf.mxu1 }
  0xb8   :  { %3462 = vmatpush.bf16.msrb.mxu2 %v6147_v16  ;;  %v8172_v63 = vld [vmem:[%s12916_s1 + $0x504] sm:$0xf]  ;;  %v5968_v0 = vld [vmem:[%s12916_s1 + $0x510] sm:$0xf0]  ;;  %v5843_v12 = vor.u32 %v8140_v59, %v5840_v60  ;;  %v9977_v16 = vadd.f32 %v3220_v8, %v3208_v7 }
  0xb9   :  { %3475 = vmatpush.bf16.msrb.mxu3 %v6275_v26  ;;  %v8204_v1 = vld [vmem:[%s12916_s1 + $0x604] sm:$0xf]  ;;  %v6096_v4 = vld [vmem:[%s12916_s1 + $0x610] sm:$0xf0]  ;;  %v5971_v21 = vor.u32 %v8172_v63, %v5968_v0 }
  0xba   :  { %3437 = vmatpush.bf16.msrb.mxu0 %v5875_v39  ;;  %v8236_v5 = vld [vmem:[%s12916_s1 + $0x704] sm:$0xf]  ;;  %v6224_v6 = vld [vmem:[%s12916_s1 + $0x710] sm:$0xf0]  ;;  %v6099_v24 = vor.u32 %v8204_v1, %v6096_v4 }
  0xbb   :  { %3450 = vmatpush.bf16.msrb.mxu1 %v6003_v43  ;;  %v8296_v9 = vld [vmem:[%s12916_s1 + $0x8e4] sm:$0xf]  ;;  %v6464_v10 = vld [vmem:[%s12916_s1 + $0x8f0] sm:$0xf0]  ;;  %v6227_v34 = vor.u32 %v8236_v5, %v6224_v6  ;;  %v3209_v52 = vpop.f32.mrf.mxu2 }
  0xbc   :  { %3463 = vmatpush.bf16.msrb.mxu2 %v6131_v45  ;;  %v8328_v11 = vld [vmem:[%s12916_s1 + $0x9e4] sm:$0xf]  ;;  %v6592_v13 = vld [vmem:[%s12916_s1 + $0x9f0] sm:$0xf0]  ;;  %v6467_v36 = vor.u32 %v8296_v9, %v6464_v10 }
  0xbd   :  { %3476 = vmatpush.bf16.msrb.mxu3 %v6259_v51  ;;  %v8360_v14 = vld [vmem:[%s12916_s1 + $0xae4] sm:$0xf]  ;;  %v6720_v15 = vld [vmem:[%s12916_s1 + $0xaf0] sm:$0xf0]  ;;  %v6595_v37 = vor.u32 %v8328_v11, %v6592_v13 }
  0xbe   :  { %3438 = vmatpush.bf16.msrb.mxu0 %v5859_v58  ;;  %v8392_v26 = vld [vmem:[%s12916_s1 + $0xbe4] sm:$0xf]  ;;  %v6848_v27 = vld [vmem:[%s12916_s1 + $0xbf0] sm:$0xf0]  ;;  %v6723_v39 = vor.u32 %v8360_v14, %v6720_v15 }
  0xbf   :  { %3451 = vmatpush.bf16.msrb.mxu1 %v5987_v61  ;;  %v8292_v40 = vld [vmem:[%s12916_s1 + $0x8c4] sm:$0xf]  ;;  %v6448_v43 = vld [vmem:[%s12916_s1 + $0x8d0] sm:$0xf0]  ;;  %v6851_v46 = vor.u32 %v8392_v26, %v6848_v27 }
  0xc0   :  { %3464 = vmatpush.bf16.msrb.mxu2 %v6115_v62  ;;  %v8324_v45 = vld [vmem:[%s12916_s1 + $0x9c4] sm:$0xf]  ;;  %v6576_v47 = vld [vmem:[%s12916_s1 + $0x9d0] sm:$0xf0]  ;;  %v6451_v53 = vor.u32 %v8292_v40, %v6448_v43 }
  0xc1   :  { %3477 = vmatpush.bf16.msrb.mxu3 %v6243_v3  ;;  %v8356_v48 = vld [vmem:[%s12916_s1 + $0xac4] sm:$0xf]  ;;  %v6704_v49 = vld [vmem:[%s12916_s1 + $0xad0] sm:$0xf0]  ;;  %v6579_v55 = vor.u32 %v8324_v45, %v6576_v47 }
  0xc2   :  { %3439 = vmatpush.bf16.msrb.mxu0 %v5843_v12  ;;  %v8388_v50 = vld [vmem:[%s12916_s1 + $0xbc4] sm:$0xf]  ;;  %v6832_v51 = vld [vmem:[%s12916_s1 + $0xbd0] sm:$0xf0]  ;;  %v6707_v56 = vor.u32 %v8356_v48, %v6704_v49 }
  0xc3   :  { %3452 = vmatpush.bf16.msrb.mxu1 %v5971_v21  ;;  %v8288_v57 = vld [vmem:[%s12916_s1 + $0x8a4] sm:$0xf]  ;;  %v6432_v58 = vld [vmem:[%s12916_s1 + $0x8b0] sm:$0xf0]  ;;  %v6835_v60 = vor.u32 %v8388_v50, %v6832_v51  ;;  %v3233_v15 = vpop.f32.mrf.mxu0 }
  0xc4   :  { %3465 = vmatpush.bf16.msrb.mxu2 %v6099_v24  ;;  %v8320_v59 = vld [vmem:[%s12916_s1 + $0x9a4] sm:$0xf]  ;;  %v6560_v61 = vld [vmem:[%s12916_s1 + $0x9b0] sm:$0xf0]  ;;  %v6435_v2 = vor.u32 %v8288_v57, %v6432_v58  ;;  %v3234_v32 = vadd.f32 %v3233_v15, %v9977_v16 }
  0xc5   :  { %3478 = vmatpush.bf16.msrb.mxu3 %v6227_v34  ;;  %v8352_v62 = vld [vmem:[%s12916_s1 + $0xaa4] sm:$0xf]  ;;  %v6688_v63 = vld [vmem:[%s12916_s1 + $0xab0] sm:$0xf0]  ;;  %3440 = vmatmul.bf16.vlgmr.msrb.gmra.mxu0 %v9186_v41  ;;  %v6563_v3 = vor.u32 %v8320_v59, %v6560_v61  ;;  %v3246_v34 = vpop.f32.mrf.mxu1 }
  0xc6   :  { %3484 = vmatpush.bf16.msra.mxu0 %v6467_v36  ;;  %v8384_v0 = vld [vmem:[%s12916_s1 + $0xba4] sm:$0xf]  ;;  %v6816_v1 = vld [vmem:[%s12916_s1 + $0xbb0] sm:$0xf0]  ;;  %3453 = vmatmul.bf16.vlgmr.msrb.gmra.mxu1 %v9190_v44  ;;  %v6691_v4 = vor.u32 %v8352_v62, %v6688_v63  ;;  %v3247_v45 = vadd.f32 %v3246_v34, %v3234_v32 }
  0xc7   :  { %3497 = vmatpush.bf16.msra.mxu1 %v6595_v37  ;;  %3466 = vmatmul.bf16.vlgmr.msrb.gmra.mxu2 %v9178_v38  ;;  %v8284_v5 = vld [vmem:[%s12916_s1 + $0x884] sm:$0xf]  ;;  %v6416_v6 = vld [vmem:[%s12916_s1 + $0x890] sm:$0xf0]  ;;  %v6819_v8 = vor.u32 %v8384_v0, %v6816_v1 }
  0xc8   :  { %3510 = vmatpush.bf16.msra.mxu2 %v6723_v39  ;;  %3479 = vmatmul.bf16.vlgmr.msrb.gmra.mxu3 %v9188_v42  ;;  %v8316_v7 = vld [vmem:[%s12916_s1 + $0x984] sm:$0xf]  ;;  %v6544_v9 = vld [vmem:[%s12916_s1 + $0x990] sm:$0xf0]  ;;  %v6419_v14 = vor.u32 %v8284_v5, %v6416_v6 }
  0xc9   :  { %3523 = vmatpush.bf16.msra.mxu3 %v6851_v46  ;;  %v8348_v10 = vld [vmem:[%s12916_s1 + $0xa84] sm:$0xf]  ;;  %v6672_v11 = vld [vmem:[%s12916_s1 + $0xa90] sm:$0xf0]  ;;  %v6547_v17 = vor.u32 %v8316_v7, %v6544_v9  ;;  %v3259_v52 = vpop.f32.mrf.mxu2 }
  0xca   :  { %3485 = vmatpush.bf16.msra.mxu0 %v6451_v53  ;;  %v8380_v12 = vld [vmem:[%s12916_s1 + $0xb84] sm:$0xf]  ;;  %v6800_v13 = vld [vmem:[%s12916_s1 + $0xb90] sm:$0xf0]  ;;  %v6675_v21 = vor.u32 %v8348_v10, %v6672_v11  ;;  %v3260_v57 = vadd.f32 %v3259_v52, %v3247_v45 }
  0xcb   :  { %3498 = vmatpush.bf16.msra.mxu1 %v6579_v55  ;;  %v8280_v24 = vld [vmem:[%s12916_s1 + $0x864] sm:$0xf]  ;;  %v6400_v26 = vld [vmem:[%s12916_s1 + $0x870] sm:$0xf0]  ;;  %v6803_v36 = vor.u32 %v8380_v12, %v6800_v13  ;;  %v3235_v63 = vpop.f32.mrf.mxu0 }
  0xcc   :  { %3511 = vmatpush.bf16.msra.mxu2 %v6707_v56  ;;  %v8312_v27 = vld [vmem:[%s12916_s1 + $0x964] sm:$0xf]  ;;  %v6528_v37 = vld [vmem:[%s12916_s1 + $0x970] sm:$0xf0]  ;;  %v6403_v46 = vor.u32 %v8280_v24, %v6400_v26  ;;  %v3272_v58 = vpop.f32.mrf.mxu3 }
  0xcd   :  { %3524 = vmatpush.bf16.msra.mxu3 %v6835_v60  ;;  %v8344_v39 = vld [vmem:[%s12916_s1 + $0xa64] sm:$0xf]  ;;  %v6656_v40 = vld [vmem:[%s12916_s1 + $0xa70] sm:$0xf0]  ;;  %v6531_v47 = vor.u32 %v8312_v27, %v6528_v37  ;;  %v10110_v62 = vadd.f32 %v3272_v58, %v3260_v57  ;;  %v3248_v5 = vpop.f32.mrf.mxu1 }
  0xce   :  { %3486 = vmatpush.bf16.msra.mxu0 %v6435_v2  ;;  %v8376_v43 = vld [vmem:[%s12916_s1 + $0xb64] sm:$0xf]  ;;  %v6784_v16 = vld [vmem:[%s12916_s1 + $0xb70] sm:$0xf0]  ;;  %v6659_v48 = vor.u32 %v8344_v39, %v6656_v40 }
  0xcf   :  { %3499 = vmatpush.bf16.msra.mxu1 %v6563_v3  ;;  %v8276_v49 = vld [vmem:[%s12916_s1 + $0x844] sm:$0xf]  ;;  %v6384_v50 = vld [vmem:[%s12916_s1 + $0x850] sm:$0xf0]  ;;  %v6787_v53 = vor.u32 %v8376_v43, %v6784_v16 }
  0xd0   :  { %3512 = vmatpush.bf16.msra.mxu2 %v6691_v4  ;;  %v8308_v51 = vld [vmem:[%s12916_s1 + $0x944] sm:$0xf]  ;;  %v6512_v54 = vld [vmem:[%s12916_s1 + $0x950] sm:$0xf0]  ;;  %v6387_v61 = vor.u32 %v8276_v49, %v6384_v50 }
  0xd1   :  { %3525 = vmatpush.bf16.msra.mxu3 %v6819_v8  ;;  %v8340_v55 = vld [vmem:[%s12916_s1 + $0xa44] sm:$0xf]  ;;  %v6640_v56 = vld [vmem:[%s12916_s1 + $0xa50] sm:$0xf0]  ;;  %v6515_v0 = vor.u32 %v8308_v51, %v6512_v54  ;;  %v3261_v27 = vpop.f32.mrf.mxu2 }
  0xd2   :  { %3487 = vmatpush.bf16.msra.mxu0 %v6419_v14  ;;  %v8372_v59 = vld [vmem:[%s12916_s1 + $0xb44] sm:$0xf]  ;;  %v6768_v60 = vld [vmem:[%s12916_s1 + $0xb50] sm:$0xf0]  ;;  %v6643_v1 = vor.u32 %v8340_v55, %v6640_v56 }
  0xd3   :  { %3500 = vmatpush.bf16.msra.mxu1 %v6547_v17  ;;  %v8272_v2 = vld [vmem:[%s12916_s1 + $0x824] sm:$0xf]  ;;  %v6368_v3 = vld [vmem:[%s12916_s1 + $0x830] sm:$0xf0]  ;;  %v6771_v6 = vor.u32 %v8372_v59, %v6768_v60 }
  0xd4   :  { %3513 = vmatpush.bf16.msra.mxu2 %v6675_v21  ;;  %v8304_v4 = vld [vmem:[%s12916_s1 + $0x924] sm:$0xf]  ;;  %v6496_v7 = vld [vmem:[%s12916_s1 + $0x930] sm:$0xf0]  ;;  %v6371_v12 = vor.u32 %v8272_v2, %v6368_v3  ;;  %v3274_v39 = vpop.f32.mrf.mxu3 }
  0xd5   :  { %3526 = vmatpush.bf16.msra.mxu3 %v6803_v36  ;;  %v8336_v8 = vld [vmem:[%s12916_s1 + $0xa24] sm:$0xf]  ;;  %v6624_v9 = vld [vmem:[%s12916_s1 + $0xa30] sm:$0xf0]  ;;  %v6499_v15 = vor.u32 %v8304_v4, %v6496_v7 }
  0xd6   :  { %3488 = vmatpush.bf16.msra.mxu0 %v6403_v46  ;;  %v8368_v10 = vld [vmem:[%s12916_s1 + $0xb24] sm:$0xf]  ;;  %v6752_v11 = vld [vmem:[%s12916_s1 + $0xb30] sm:$0xf0]  ;;  %v6627_v17 = vor.u32 %v8336_v8, %v6624_v9 }
  0xd7   :  { %3501 = vmatpush.bf16.msra.mxu1 %v6531_v47  ;;  %v8268_v13 = vld [vmem:[%s12916_s1 + $0x804] sm:$0xf]  ;;  %v6352_v14 = vld [vmem:[%s12916_s1 + $0x810] sm:$0xf0]  ;;  %v6755_v32 = vor.u32 %v8368_v10, %v6752_v11 }
  0xd8   :  { %3514 = vmatpush.bf16.msra.mxu2 %v6659_v48  ;;  %v8300_v21 = vld [vmem:[%s12916_s1 + $0x904] sm:$0xf]  ;;  %v6480_v24 = vld [vmem:[%s12916_s1 + $0x910] sm:$0xf0]  ;;  %v6355_v45 = vor.u32 %v8268_v13, %v6352_v14 }
  0xd9   :  { %3527 = vmatpush.bf16.msra.mxu3 %v6787_v53  ;;  %v8332_v26 = vld [vmem:[%s12916_s1 + $0xa04] sm:$0xf]  ;;  %v6608_v34 = vld [vmem:[%s12916_s1 + $0xa10] sm:$0xf0]  ;;  %v6483_v49 = vor.u32 %v8300_v21, %v6480_v24 }
  0xda   :  { %3489 = vmatpush.bf16.msra.mxu0 %v6387_v61  ;;  %v8364_v36 = vld [vmem:[%s12916_s1 + $0xb04] sm:$0xf]  ;;  %v6736_v37 = vld [vmem:[%s12916_s1 + $0xb10] sm:$0xf0]  ;;  %v6611_v50 = vor.u32 %v8332_v26, %v6608_v34 }
  0xdb   :  { %3502 = vmatpush.bf16.msra.mxu1 %v6515_v0  ;;  %v8424_v40 = vld [vmem:[%s12916_s1 + $0xce4] sm:$0xf]  ;;  %v6976_v43 = vld [vmem:[%s12916_s1 + $0xcf0] sm:$0xf0]  ;;  %v6739_v53 = vor.u32 %v8364_v36, %v6736_v37 }
  0xdc   :  { %3515 = vmatpush.bf16.msra.mxu2 %v6643_v1  ;;  %v8456_v16 = vld [vmem:[%s12916_s1 + $0xde4] sm:$0xf]  ;;  %v7104_v46 = vld [vmem:[%s12916_s1 + $0xdf0] sm:$0xf0]  ;;  %v6979_v54 = vor.u32 %v8424_v40, %v6976_v43 }
  0xdd   :  { %3528 = vmatpush.bf16.msra.mxu3 %v6771_v6  ;;  %v8488_v47 = vld [vmem:[%s12916_s1 + $0xee4] sm:$0xf]  ;;  %v7232_v48 = vld [vmem:[%s12916_s1 + $0xef0] sm:$0xf0]  ;;  %v7107_v55 = vor.u32 %v8456_v16, %v7104_v46 }
  0xde   :  { %3490 = vmatpush.bf16.msra.mxu0 %v6371_v12  ;;  %v8520_v51 = vld [vmem:[%s12916_s1 + $0xfe4] sm:$0xf]  ;;  %v7360_v52 = vld [vmem:[%s12916_s1 + $0xff0] sm:$0xf0]  ;;  %v7235_v56 = vor.u32 %v8488_v47, %v7232_v48 }
  0xdf   :  { %3503 = vmatpush.bf16.msra.mxu1 %v6499_v15  ;;  %v8420_v57 = vld [vmem:[%s12916_s1 + $0xcc4] sm:$0xf]  ;;  %v6960_v58 = vld [vmem:[%s12916_s1 + $0xcd0] sm:$0xf0]  ;;  %v7363_v60 = vor.u32 %v8520_v51, %v7360_v52 }
  0xe0   :  { %3516 = vmatpush.bf16.msra.mxu2 %v6627_v17  ;;  %v8452_v59 = vld [vmem:[%s12916_s1 + $0xdc4] sm:$0xf]  ;;  %v7088_v61 = vld [vmem:[%s12916_s1 + $0xdd0] sm:$0xf0]  ;;  %v6963_v3 = vor.u32 %v8420_v57, %v6960_v58 }
  0xe1   :  { %3529 = vmatpush.bf16.msra.mxu3 %v6755_v32  ;;  %v8484_v63 = vld [vmem:[%s12916_s1 + $0xec4] sm:$0xf]  ;;  %v7216_v0 = vld [vmem:[%s12916_s1 + $0xed0] sm:$0xf0]  ;;  %v7091_v4 = vor.u32 %v8452_v59, %v7088_v61 }
  0xe2   :  { %3491 = vmatpush.bf16.msra.mxu0 %v6355_v45  ;;  %v8516_v1 = vld [vmem:[%s12916_s1 + $0xfc4] sm:$0xf]  ;;  %v7344_v2 = vld [vmem:[%s12916_s1 + $0xfd0] sm:$0xf0]  ;;  %v7219_v5 = vor.u32 %v8484_v63, %v7216_v0 }
  0xe3   :  { %3504 = vmatpush.bf16.msra.mxu1 %v6483_v49  ;;  %v8416_v6 = vld [vmem:[%s12916_s1 + $0xca4] sm:$0xf]  ;;  %v6944_v7 = vld [vmem:[%s12916_s1 + $0xcb0] sm:$0xf0]  ;;  %v7347_v9 = vor.u32 %v8516_v1, %v7344_v2 }
  0xe4   :  { %3517 = vmatpush.bf16.msra.mxu2 %v6611_v50  ;;  %v8448_v8 = vld [vmem:[%s12916_s1 + $0xda4] sm:$0xf]  ;;  %v7072_v10 = vld [vmem:[%s12916_s1 + $0xdb0] sm:$0xf0]  ;;  %v6947_v15 = vor.u32 %v8416_v6, %v6944_v7  ;;  %v3285_v39 = vpop.f32.mrf.mxu0 }
  0xe5   :  { %3530 = vmatpush.bf16.msra.mxu3 %v6739_v53  ;;  %3492 = vmatmul.bf16.vlgmr.msra.gmra.mxu0 %v9379_v25  ;;  %v8480_v11 = vld [vmem:[%s12916_s1 + $0xea4] sm:$0xf]  ;;  %v7200_v12 = vld [vmem:[%s12916_s1 + $0xeb0] sm:$0xf0]  ;;  %v7075_v17 = vor.u32 %v8448_v8, %v7072_v10  ;;  %v3286_v16 = vadd.f32 %v3285_v39, %v10110_v62  ;;  %v3298_v46 = vpop.f32.mrf.mxu1 }
  0xe6   :  { %3536 = vmatpush.bf16.msrb.mxu0 %v6979_v54  ;;  %3505 = vmatmul.bf16.vlgmr.msra.gmra.mxu1 %v9392_v30  ;;  %v8512_v13 = vld [vmem:[%s12916_s1 + $0xfa4] sm:$0xf]  ;;  %v7328_v14 = vld [vmem:[%s12916_s1 + $0xfb0] sm:$0xf0]  ;;  %v7203_v21 = vor.u32 %v8480_v11, %v7200_v12 }
  0xe7   :  { %3549 = vmatpush.bf16.msrb.mxu1 %v7107_v55  ;;  %3518 = vmatmul.bf16.vlgmr.msra.gmra.mxu2 %v9390_v29  ;;  %v8412_v24 = vld [vmem:[%s12916_s1 + $0xc84] sm:$0xf]  ;;  %v6928_v26 = vld [vmem:[%s12916_s1 + $0xc90] sm:$0xf0]  ;;  %v7331_v32 = vor.u32 %v8512_v13, %v7328_v14  ;;  %v3299_v52 = vadd.f32 %v3298_v46, %v3286_v16 }
  0xe8   :  { %3562 = vmatpush.bf16.msrb.mxu2 %v7235_v56  ;;  %3531 = vmatmul.bf16.vlgmr.msra.gmra.mxu3 %v9400_v33  ;;  %v8444_v27 = vld [vmem:[%s12916_s1 + $0xd84] sm:$0xf]  ;;  %v7056_v34 = vld [vmem:[%s12916_s1 + $0xd90] sm:$0xf0]  ;;  %v6931_v45 = vor.u32 %v8412_v24, %v6928_v26 }
  0xe9   :  { %3575 = vmatpush.bf16.msrb.mxu3 %v7363_v60  ;;  %v8476_v36 = vld [vmem:[%s12916_s1 + $0xe84] sm:$0xf]  ;;  %v7184_v37 = vld [vmem:[%s12916_s1 + $0xe90] sm:$0xf0]  ;;  %v7059_v47 = vor.u32 %v8444_v27, %v7056_v34  ;;  %v3311_v2 = vpop.f32.mrf.mxu2 }
  0xea   :  { %3537 = vmatpush.bf16.msrb.mxu0 %v6963_v3  ;;  %v8508_v40 = vld [vmem:[%s12916_s1 + $0xf84] sm:$0xf]  ;;  %v7312_v43 = vld [vmem:[%s12916_s1 + $0xf90] sm:$0xf0]  ;;  %v7187_v48 = vor.u32 %v8476_v36, %v7184_v37  ;;  %v3312_v6 = vadd.f32 %v3311_v2, %v3299_v52 }
  0xeb   :  { %3550 = vmatpush.bf16.msrb.mxu1 %v7091_v4  ;;  %v8408_v49 = vld [vmem:[%s12916_s1 + $0xc64] sm:$0xf]  ;;  %v6912_v50 = vld [vmem:[%s12916_s1 + $0xc70] sm:$0xf0]  ;;  %v7315_v62 = vor.u32 %v8508_v40, %v7312_v43 }
  0xec   :  { %3563 = vmatpush.bf16.msrb.mxu2 %v7219_v5  ;;  %v8440_v51 = vld [vmem:[%s12916_s1 + $0xd64] sm:$0xf]  ;;  %v7040_v53 = vld [vmem:[%s12916_s1 + $0xd70] sm:$0xf0]  ;;  %v6915_v58 = vor.u32 %v8408_v49, %v6912_v50  ;;  %v3287_v10 = vpop.f32.mrf.mxu0 }
  0xed   :  { %3576 = vmatpush.bf16.msrb.mxu3 %v7347_v9  ;;  %v8472_v54 = vld [vmem:[%s12916_s1 + $0xe64] sm:$0xf]  ;;  %v7168_v55 = vld [vmem:[%s12916_s1 + $0xe70] sm:$0xf0]  ;;  %v7043_v59 = vor.u32 %v8440_v51, %v7040_v53  ;;  %v3324_v7 = vpop.f32.mrf.mxu3  ;;  %v3300_v12 = vpop.f32.mrf.mxu1  ;;  %v5446_v53 = vld [vmem:[%s12916_s1 + $0xe8] sm:$0xf] }
  0xee   :  { %3538 = vmatpush.bf16.msrb.mxu0 %v6947_v15  ;;  %v8504_v56 = vld [vmem:[%s12916_s1 + $0xf64] sm:$0xf]  ;;  %v7296_v57 = vld [vmem:[%s12916_s1 + $0xf70] sm:$0xf0]  ;;  %v7171_v60 = vor.u32 %v8472_v54, %v7168_v55  ;;  %v10309_v13 = vadd.f32 %v3324_v7, %v3312_v6  ;;  %v8043_v54 = vld [vmem:[%s12916_s1 + $0xf4] sm:$0xf0] }
  0xef   :  { %3551 = vmatpush.bf16.msrb.mxu1 %v7075_v17  ;;  %v8404_v61 = vld [vmem:[%s12916_s1 + $0xc44] sm:$0xf]  ;;  %v6896_v63 = vld [vmem:[%s12916_s1 + $0xc50] sm:$0xf0]  ;;  %v7299_v1 = vor.u32 %v8504_v56, %v7296_v57  ;;  %v5574_v55 = vld [vmem:[%s12916_s1 + $0x1e8] sm:$0xf] }
  0xf0   :  { %3564 = vmatpush.bf16.msrb.mxu2 %v7203_v21  ;;  %v8436_v0 = vld [vmem:[%s12916_s1 + $0xd44] sm:$0xf]  ;;  %v7024_v3 = vld [vmem:[%s12916_s1 + $0xd50] sm:$0xf0]  ;;  %v6899_v11 = vor.u32 %v8404_v61, %v6896_v63  ;;  %v5430_v6 = vld [vmem:[%s12916_s1 + $0xc8] sm:$0xf] }
  0xf1   :  { %3577 = vmatpush.bf16.msrb.mxu3 %v7331_v32  ;;  %v8468_v4 = vld [vmem:[%s12916_s1 + $0xe44] sm:$0xf]  ;;  %v7152_v5 = vld [vmem:[%s12916_s1 + $0xe50] sm:$0xf0]  ;;  %v7027_v14 = vor.u32 %v8436_v0, %v7024_v3  ;;  %v3313_v52 = vpop.f32.mrf.mxu2  ;;  %v5830_v0 = vld [vmem:[%s12916_s1 + $0x3e8] sm:$0xf]  ;;  %v5447_v3 = vor.u32 %v8043_v54, %v5446_v53 }
  0xf2   :  { %3539 = vmatpush.bf16.msrb.mxu0 %v6931_v45  ;;  %v8500_v8 = vld [vmem:[%s12916_s1 + $0xf44] sm:$0xf]  ;;  %v7280_v9 = vld [vmem:[%s12916_s1 + $0xf50] sm:$0xf0]  ;;  %v7155_v15 = vor.u32 %v8468_v4, %v7152_v5  ;;  %v8039_v7 = vld [vmem:[%s12916_s1 + $0xd4] sm:$0xf0] }
  0xf3   :  { %3552 = vmatpush.bf16.msrb.mxu1 %v7059_v47  ;;  %v8400_v17 = vld [vmem:[%s12916_s1 + $0xc24] sm:$0xf]  ;;  %v6880_v21 = vld [vmem:[%s12916_s1 + $0xc30] sm:$0xf0]  ;;  %v7283_v26 = vor.u32 %v8500_v8, %v7280_v9  ;;  %v5558_v8 = vld [vmem:[%s12916_s1 + $0x1c8] sm:$0xf] }
  0xf4   :  { %3565 = vmatpush.bf16.msrb.mxu2 %v7187_v48  ;;  %v8432_v24 = vld [vmem:[%s12916_s1 + $0xd24] sm:$0xf]  ;;  %v7008_v27 = vld [vmem:[%s12916_s1 + $0xd30] sm:$0xf0]  ;;  %v6883_v39 = vor.u32 %v8400_v17, %v6880_v21  ;;  %v8071_v10 = vld [vmem:[%s12916_s1 + $0x1d4] sm:$0xf0]  ;;  %v5431_v17 = vor.u32 %v8039_v7, %v5430_v6 }
  0xf5   :  { %3578 = vmatpush.bf16.msrb.mxu3 %v7315_v62  ;;  %v8464_v32 = vld [vmem:[%s12916_s1 + $0xe24] sm:$0xf]  ;;  %v7136_v34 = vld [vmem:[%s12916_s1 + $0xe30] sm:$0xf0]  ;;  %v7011_v16 = vor.u32 %v8432_v24, %v7008_v27  ;;  %v3326_v56 = vpop.f32.mrf.mxu3  ;;  %v8103_v12 = vld [vmem:[%s12916_s1 + $0x2d4] sm:$0xf0]  ;;  %v5559_v21 = vor.u32 %v8071_v10, %v5558_v8 }
  0xf6   :  { %3540 = vmatpush.bf16.msrb.mxu0 %v6915_v58  ;;  %v8496_v36 = vld [vmem:[%s12916_s1 + $0xf24] sm:$0xf]  ;;  %v7264_v37 = vld [vmem:[%s12916_s1 + $0xf30] sm:$0xf0]  ;;  %v7139_v45 = vor.u32 %v8464_v32, %v7136_v34  ;;  %v8075_v58 = vld [vmem:[%s12916_s1 + $0x1f4] sm:$0xf0] }
  0xf7   :  { %3553 = vmatpush.bf16.msrb.mxu1 %v7043_v59  ;;  %v8396_v40 = vld [vmem:[%s12916_s1 + $0xc04] sm:$0xf]  ;;  %v6864_v43 = vld [vmem:[%s12916_s1 + $0xc10] sm:$0xf0]  ;;  %v7267_v49 = vor.u32 %v8496_v36, %v7264_v37  ;;  %v5702_v59 = vld [vmem:[%s12916_s1 + $0x2e8] sm:$0xf]  ;;  %v5575_v4 = vor.u32 %v8075_v58, %v5574_v55 }
  0xf8   :  { %3566 = vmatpush.bf16.msrb.mxu2 %v7171_v60  ;;  %v8428_v46 = vld [vmem:[%s12916_s1 + $0xd04] sm:$0xf]  ;;  %v6992_v47 = vld [vmem:[%s12916_s1 + $0xd10] sm:$0xf0]  ;;  %v6867_v57 = vor.u32 %v8396_v40, %v6864_v43  ;;  %v8107_v60 = vld [vmem:[%s12916_s1 + $0x2f4] sm:$0xf0] }
  0xf9   :  { %3579 = vmatpush.bf16.msrb.mxu3 %v7299_v1  ;;  %v8460_v48 = vld [vmem:[%s12916_s1 + $0xe04] sm:$0xf]  ;;  %v7120_v50 = vld [vmem:[%s12916_s1 + $0xe10] sm:$0xf0]  ;;  %v6995_v61 = vor.u32 %v8428_v46, %v6992_v47  ;;  %v8139_v1 = vld [vmem:[%s12916_s1 + $0x3f4] sm:$0xf0]  ;;  %v5703_v5 = vor.u32 %v8107_v60, %v5702_v59 }
  0xfa   :  { %3541 = vmatpush.bf16.msrb.mxu0 %v6899_v11  ;;  %v8492_v51 = vld [vmem:[%s12916_s1 + $0xf04] sm:$0xf]  ;;  %v7248_v62 = vld [vmem:[%s12916_s1 + $0xf10] sm:$0xf0]  ;;  %v7123_v63 = vor.u32 %v8460_v48, %v7120_v50  ;;  %v5831_v9 = vor.u32 %v8139_v1, %v5830_v0  ;;  %v5686_v11 = vld [vmem:[%s12916_s1 + $0x2c8] sm:$0xf] }
  0xfb   :  { %3554 = vmatpush.bf16.msrb.mxu1 %v7027_v14  ;;  %v7251_v2 = vor.u32 %v8492_v51, %v7248_v62  ;;  %v5814_v14 = vld [vmem:[%s12916_s1 + $0x3c8] sm:$0xf]  ;;  %v5687_v24 = vor.u32 %v8103_v12, %v5686_v11  ;;  %v8035_v27 = vld [vmem:[%s12916_s1 + $0xb4] sm:$0xf0] }
  0xfc   :  { %3567 = vmatpush.bf16.msrb.mxu2 %v7155_v15  ;;  %v8135_v15 = vld [vmem:[%s12916_s1 + $0x3d4] sm:$0xf0]  ;;  %v5542_v32 = vld [vmem:[%s12916_s1 + $0x1a8] sm:$0xf] }
  0xfd   :  { %3580 = vmatpush.bf16.msrb.mxu3 %v7283_v26  ;;  %v5414_v26 = vld [vmem:[%s12916_s1 + $0xa8] sm:$0xf]  ;;  %v5815_v34 = vor.u32 %v8135_v15, %v5814_v14  ;;  %v8067_v36 = vld [vmem:[%s12916_s1 + $0x1b4] sm:$0xf0] }
  0xfe   :  { %3542 = vmatpush.bf16.msrb.mxu0 %v6883_v39  ;;  %v5670_v37 = vld [vmem:[%s12916_s1 + $0x2a8] sm:$0xf]  ;;  %v8099_v39 = vld [vmem:[%s12916_s1 + $0x2b4] sm:$0xf0] }
  0xff   :  { %3555 = vmatpush.bf16.msrb.mxu1 %v7011_v16  ;;  %v5798_v40 = vld [vmem:[%s12916_s1 + $0x3a8] sm:$0xf]  ;;  %v8131_v43 = vld [vmem:[%s12916_s1 + $0x3b4] sm:$0xf0]  ;;  %v5415_v16 = vor.u32 %v8035_v27, %v5414_v26  ;;  %v5671_v46 = vor.u32 %v8099_v39, %v5670_v37 }
 0x100   :  { %3568 = vmatpush.bf16.msrb.mxu2 %v7139_v45  ;;  %v5543_v45 = vor.u32 %v8067_v36, %v5542_v32  ;;  %v5398_v47 = vld [vmem:[%s12916_s1 + $0x88] sm:$0xf]  ;;  %v8031_v48 = vld [vmem:[%s12916_s1 + $0x94] sm:$0xf0]  ;;  %v5799_v50 = vor.u32 %v8131_v43, %v5798_v40 }
 0x101   :  { %3581 = vmatpush.bf16.msrb.mxu3 %v7267_v49  ;;  %v5526_v49 = vld [vmem:[%s12916_s1 + $0x188] sm:$0xf]  ;;  %v8063_v51 = vld [vmem:[%s12916_s1 + $0x194] sm:$0xf0] }
 0x102   :  { %3543 = vmatpush.bf16.msrb.mxu0 %v6867_v57  ;;  %v5654_v62 = vld [vmem:[%s12916_s1 + $0x288] sm:$0xf]  ;;  %v8095_v52 = vld [vmem:[%s12916_s1 + $0x294] sm:$0xf0]  ;;  %v5399_v57 = vor.u32 %v8031_v48, %v5398_v47  ;;  %v5527_v59 = vor.u32 %v8063_v51, %v5526_v49 }
 0x103   :  { %3556 = vmatpush.bf16.msrb.mxu1 %v6995_v61  ;;  %v5782_v54 = vld [vmem:[%s12916_s1 + $0x388] sm:$0xf]  ;;  %v8127_v55 = vld [vmem:[%s12916_s1 + $0x394] sm:$0xf0]  ;;  %v3350_v58 = vpop.f32.mrf.mxu1  ;;  %v5655_v60 = vor.u32 %v8095_v52, %v5654_v62 }
 0x104   :  { %3569 = vmatpush.bf16.msrb.mxu2 %v7123_v63  ;;  %v3337_v53 = vpop.f32.mrf.mxu0  ;;  %v5382_v61 = vld [vmem:[%s12916_s1 + $0x68] sm:$0xf]  ;;  %v8027_v63 = vld [vmem:[%s12916_s1 + $0x74] sm:$0xf0] }
 0x105   :  { %3582 = vmatpush.bf16.msrb.mxu3 %v7251_v2  ;;  %3544 = vmatmul.bf16.vlgmr.msrb.gmra.mxu0 %v9589_v23  ;;  %v3338_v56 = vadd.f32 %v3337_v53, %v10309_v13  ;;  %v5510_v0 = vld [vmem:[%s12916_s1 + $0x168] sm:$0xf]  ;;  %v5783_v13 = vor.u32 %v8127_v55, %v5782_v54  ;;  %v8059_v2 = vld [vmem:[%s12916_s1 + $0x174] sm:$0xf0]  ;;  %v5383_v7 = vor.u32 %v8027_v63, %v5382_v61 }
 0x106   :  { %3588 = vmatpush.bf16.msra.mxu0 %v5447_v3  ;;  %3557 = vmatmul.bf16.vlgmr.msrb.gmra.mxu1 %v9602_v31  ;;  %v5638_v3 = vld [vmem:[%s12916_s1 + $0x268] sm:$0xf]  ;;  %v8123_v6 = vld [vmem:[%s12916_s1 + $0x374] sm:$0xf0]  ;;  %v5511_v8 = vor.u32 %v8059_v2, %v5510_v0 }
 0x107   :  { %3601 = vmatpush.bf16.msra.mxu1 %v5575_v4  ;;  %3570 = vmatmul.bf16.vlgmr.msrb.gmra.mxu2 %v9600_v28  ;;  %v3351_v1 = vadd.f32 %v3350_v58, %v3338_v56  ;;  %v8091_v4 = vld [vmem:[%s12916_s1 + $0x274] sm:$0xf0]  ;;  %v5366_v10 = vld [vmem:[%s12916_s1 + $0x48] sm:$0xf] }
 0x108   :  { %3614 = vmatpush.bf16.msra.mxu2 %v5703_v5  ;;  %3583 = vmatmul.bf16.vlgmr.msrb.gmra.mxu3 %v9610_v35  ;;  %v5766_v5 = vld [vmem:[%s12916_s1 + $0x368] sm:$0xf]  ;;  %v8023_v11 = vld [vmem:[%s12916_s1 + $0x54] sm:$0xf0] }
 0x109   :  { %3627 = vmatpush.bf16.msra.mxu3 %v5831_v9  ;;  %v5639_v9 = vor.u32 %v8091_v4, %v5638_v3  ;;  %v5494_v12 = vld [vmem:[%s12916_s1 + $0x148] sm:$0xf]  ;;  %v5767_v14 = vor.u32 %v8123_v6, %v5766_v5  ;;  %v5367_v37 = vor.u32 %v8023_v11, %v5366_v10  ;;  %v8051_v49 = vld [vmem:[%s12916_s1 + $0x134] sm:$0xf0] }
 0x10a   :  { %3589 = vmatpush.bf16.msra.mxu0 %v5431_v17  ;;  %v8055_v17 = vld [vmem:[%s12916_s1 + $0x154] sm:$0xf0]  ;;  %v5750_v32 = vld [vmem:[%s12916_s1 + $0x348] sm:$0xf] }
 0x10b   :  { %3602 = vmatpush.bf16.msra.mxu1 %v5559_v21  ;;  %v5622_v21 = vld [vmem:[%s12916_s1 + $0x248] sm:$0xf]  ;;  %v3376_v27 = vpop.f32.mrf.mxu3  ;;  %v3352_v39 = vpop.f32.mrf.mxu1  ;;  %v5495_v43 = vor.u32 %v8055_v17, %v5494_v12  ;;  %v8083_v51 = vld [vmem:[%s12916_s1 + $0x234] sm:$0xf0] }
 0x10c   :  { %3615 = vmatpush.bf16.msra.mxu2 %v5687_v24  ;;  %v3363_v15 = vpop.f32.mrf.mxu2  ;;  %v8087_v24 = vld [vmem:[%s12916_s1 + $0x254] sm:$0xf0]  ;;  %v3339_v36 = vpop.f32.mrf.mxu0  ;;  %v5478_v47 = vld [vmem:[%s12916_s1 + $0x128] sm:$0xf] }
 0x10d   :  { %3628 = vmatpush.bf16.msra.mxu3 %v5815_v34  ;;  %v3364_v26 = vadd.f32 %v3363_v15, %v3351_v1  ;;  %v8119_v34 = vld [vmem:[%s12916_s1 + $0x354] sm:$0xf0]  ;;  %v5734_v62 = vld [vmem:[%s12916_s1 + $0x328] sm:$0xf]  ;;  %v5479_v56 = vor.u32 %v8051_v49, %v5478_v47 }
 0x10e   :  { %3590 = vmatpush.bf16.msra.mxu0 %v5415_v16  ;;  %v5623_v16 = vor.u32 %v8087_v24, %v5622_v21  ;;  %v5751_v48 = vor.u32 %v8119_v34, %v5750_v32  ;;  %v8115_v52 = vld [vmem:[%s12916_s1 + $0x334] sm:$0xf0]  ;;  %v5334_v54 = vld [vmem:[%s12916_s1 + $0x8] sm:$0xf] }
 0x10f   :  { %3603 = vmatpush.bf16.msra.mxu1 %v5543_v45  ;;  %v10508_v40 = vadd.f32 %v3376_v27, %v3364_v26  ;;  %v5350_v45 = vld [vmem:[%s12916_s1 + $0x28] sm:$0xf]  ;;  %v8015_v55 = vld [vmem:[%s12916_s1 + $0x14] sm:$0xf0]  ;;  %v5735_v61 = vor.u32 %v8115_v52, %v5734_v62 }
 0x110   :  { %3616 = vmatpush.bf16.msra.mxu2 %v5671_v46  ;;  %v8019_v46 = vld [vmem:[%s12916_s1 + $0x34] sm:$0xf0]  ;;  %v5462_v58 = vld [vmem:[%s12916_s1 + $0x108] sm:$0xf]  ;;  %v5335_v6 = vor.u32 %v8015_v55, %v5334_v54 }
 0x111   :  { %3629 = vmatpush.bf16.msra.mxu3 %v5799_v50  ;;  %v5606_v50 = vld [vmem:[%s12916_s1 + $0x228] sm:$0xf]  ;;  %v5351_v53 = vor.u32 %v8019_v46, %v5350_v45  ;;  %v8079_v63 = vld [vmem:[%s12916_s1 + $0x214] sm:$0xf0] }
 0x112   :  { %3591 = vmatpush.bf16.msra.mxu0 %v5399_v57  ;;  %v5607_v57 = vor.u32 %v8083_v51, %v5606_v50  ;;  %v5718_v0 = vld [vmem:[%s12916_s1 + $0x308] sm:$0xf]  ;;  %v8171_v3 = vld [vmem:[%s12916_s1 + $0x4f4] sm:$0xf0] }
 0x113   :  { %3604 = vmatpush.bf16.msra.mxu1 %v5527_v59  ;;  %v8047_v59 = vld [vmem:[%s12916_s1 + $0x114] sm:$0xf0]  ;;  %v5958_v2 = vld [vmem:[%s12916_s1 + $0x4e8] sm:$0xf]  ;;  %v3378_v5 = vpop.f32.mrf.mxu3 }
 0x114   :  { %3617 = vmatpush.bf16.msra.mxu2 %v5655_v60  ;;  %v5590_v60 = vld [vmem:[%s12916_s1 + $0x208] sm:$0xf]  ;;  %v3365_v1 = vpop.f32.mrf.mxu2  ;;  %v5463_v10 = vor.u32 %v8047_v59, %v5462_v58  ;;  %v5959_v17 = vor.u32 %v8171_v3, %v5958_v2  ;;  %v8167_v27 = vld [vmem:[%s12916_s1 + $0x4d4] sm:$0xf0] }
 0x115   :  { %3630 = vmatpush.bf16.msra.mxu3 %v5783_v13  ;;  %v8111_v13 = vld [vmem:[%s12916_s1 + $0x314] sm:$0xf0]  ;;  %v6086_v4 = vld [vmem:[%s12916_s1 + $0x5e8] sm:$0xf]  ;;  %v5591_v11 = vor.u32 %v8079_v63, %v5590_v60  ;;  %v8685_v63 = vld [vmem:[%s12918_s2] sm:$0xf] }
 0x116   :  { %3592 = vmatpush.bf16.msra.mxu0 %v5383_v7  ;;  %v8203_v7 = vld [vmem:[%s12916_s1 + $0x5f4] sm:$0xf0]  ;;  %v6342_v12 = vld [vmem:[%s12916_s1 + $0x7e8] sm:$0xf]  ;;  %v5719_v15 = vor.u32 %v8111_v13, %v5718_v0  ;;  %v549_v0 = vperm.slane %v8685_v63, 1 }
 0x117   :  { %3605 = vmatpush.bf16.msra.mxu1 %v5511_v8  ;;  %v6214_v8 = vld [vmem:[%s12916_s1 + $0x6e8] sm:$0xf]  ;;  %v6087_v21 = vor.u32 %v8203_v7, %v6086_v4  ;;  %v8199_v36 = vld [vmem:[%s12916_s1 + $0x5d4] sm:$0xf0] }
 0x118   :  { %3618 = vmatpush.bf16.msra.mxu2 %v5639_v9  ;;  %v8235_v9 = vld [vmem:[%s12916_s1 + $0x6f4] sm:$0xf0]  ;;  %v5942_v26 = vld [vmem:[%s12916_s1 + $0x4c8] sm:$0xf] }
 0x119   :  { %3631 = vmatpush.bf16.msra.mxu3 %v5767_v14  ;;  %v8267_v14 = vld [vmem:[%s12916_s1 + $0x7f4] sm:$0xf0]  ;;  %v6215_v24 = vor.u32 %v8235_v9, %v6214_v8  ;;  %v6070_v32 = vld [vmem:[%s12916_s1 + $0x5c8] sm:$0xf]  ;;  %v5943_v45 = vor.u32 %v8167_v27, %v5942_v26 }
 0x11a   :  { %3593 = vmatpush.bf16.msra.mxu0 %v5367_v37  ;;  %v6343_v34 = vor.u32 %v8267_v14, %v6342_v12  ;;  %v6198_v37 = vld [vmem:[%s12916_s1 + $0x6c8] sm:$0xf]  ;;  %v8231_v39 = vld [vmem:[%s12916_s1 + $0x6d4] sm:$0xf0]  ;;  %v6071_v46 = vor.u32 %v8199_v36, %v6070_v32 }
 0x11b   :  { %3606 = vmatpush.bf16.msra.mxu1 %v5495_v43  ;;  %v6326_v43 = vld [vmem:[%s12916_s1 + $0x7c8] sm:$0xf]  ;;  %v6199_v47 = vor.u32 %v8231_v39, %v6198_v37  ;;  %v8163_v49 = vld [vmem:[%s12916_s1 + $0x4b4] sm:$0xf0] }
 0x11c   :  { %3619 = vmatpush.bf16.msra.mxu2 %v5623_v16  ;;  %v8263_v16 = vld [vmem:[%s12916_s1 + $0x7d4] sm:$0xf0]  ;;  %v6054_v50 = vld [vmem:[%s12916_s1 + $0x5a8] sm:$0xf] }
 0x11d   :  { %3632 = vmatpush.bf16.msra.mxu3 %v5751_v48  ;;  %v5926_v48 = vld [vmem:[%s12916_s1 + $0x4a8] sm:$0xf]  ;;  %v6327_v51 = vor.u32 %v8263_v16, %v6326_v43  ;;  %v8195_v62 = vld [vmem:[%s12916_s1 + $0x5b4] sm:$0xf0] }
 0x11e   :  { %3594 = vmatpush.bf16.msra.mxu0 %v5351_v53  ;;  %v6182_v52 = vld [vmem:[%s12916_s1 + $0x6a8] sm:$0xf]  ;;  %v8227_v53 = vld [vmem:[%s12916_s1 + $0x6b4] sm:$0xf0]  ;;  %v6055_v58 = vor.u32 %v8195_v62, %v6054_v50 }
 0x11f   :  { %3607 = vmatpush.bf16.msra.mxu1 %v5479_v56  ;;  %v6310_v54 = vld [vmem:[%s12916_s1 + $0x7a8] sm:$0xf]  ;;  %v8259_v55 = vld [vmem:[%s12916_s1 + $0x7b4] sm:$0xf0]  ;;  %v5927_v56 = vor.u32 %v8163_v49, %v5926_v48  ;;  %v6183_v59 = vor.u32 %v8227_v53, %v6182_v52 }
 0x120   :  { %3620 = vmatpush.bf16.msra.mxu2 %v5607_v57  ;;  %v5910_v57 = vld [vmem:[%s12916_s1 + $0x488] sm:$0xf]  ;;  %v8159_v60 = vld [vmem:[%s12916_s1 + $0x494] sm:$0xf0]  ;;  %v6311_v13 = vor.u32 %v8259_v55, %v6310_v54 }
 0x121   :  { %3633 = vmatpush.bf16.msra.mxu3 %v5735_v61  ;;  %v6038_v61 = vld [vmem:[%s12916_s1 + $0x588] sm:$0xf]  ;;  %v8191_v1 = vld [vmem:[%s12916_s1 + $0x594] sm:$0xf0] }
 0x122   :  { %3595 = vmatpush.bf16.msra.mxu0 %v5335_v6  ;;  %v6166_v2 = vld [vmem:[%s12916_s1 + $0x688] sm:$0xf]  ;;  %v8223_v3 = vld [vmem:[%s12916_s1 + $0x694] sm:$0xf0]  ;;  %v5911_v6 = vor.u32 %v8159_v60, %v5910_v57  ;;  %v3389_v7 = vpop.f32.mrf.mxu0  ;;  %v6039_v8 = vor.u32 %v8191_v1, %v6038_v61 }
 0x123   :  { %3608 = vmatpush.bf16.msra.mxu1 %v5463_v10  ;;  %v6294_v4 = vld [vmem:[%s12916_s1 + $0x788] sm:$0xf]  ;;  %v8255_v5 = vld [vmem:[%s12916_s1 + $0x794] sm:$0xf0]  ;;  %v6167_v9 = vor.u32 %v8223_v3, %v6166_v2  ;;  %v3390_v14 = vadd.f32 %v3389_v7, %v549_v0 }
 0x124   :  { %3621 = vmatpush.bf16.msra.mxu2 %v5591_v11  ;;  %v5894_v10 = vld [vmem:[%s12916_s1 + $0x468] sm:$0xf]  ;;  %v8155_v11 = vld [vmem:[%s12916_s1 + $0x474] sm:$0xf0] }
 0x125   :  { %3634 = vmatpush.bf16.msra.mxu3 %v5719_v15  ;;  %3596 = vmatmul.bf16.vlgmr.msra.gmra.mxu0 %v9024_v19  ;;  %v6022_v12 = vld [vmem:[%s12916_s1 + $0x568] sm:$0xf]  ;;  %v3402_v15 = vpop.f32.mrf.mxu1  ;;  %v8219_v26 = vld [vmem:[%s12916_s1 + $0x674] sm:$0xf0]  ;;  %v5895_v36 = vor.u32 %v8155_v11, %v5894_v10 }
 0x126   :  { %3640 = vmatpush.bf16.msrb.mxu0 %v5959_v17  ;;  %3609 = vmatmul.bf16.vlgmr.msra.gmra.mxu1 %v9028_v22  ;;  %v6295_v17 = vor.u32 %v8255_v5, %v6294_v4  ;;  %v6278_v27 = vld [vmem:[%s12916_s1 + $0x768] sm:$0xf]  ;;  %v8251_v32 = vld [vmem:[%s12916_s1 + $0x774] sm:$0xf0] }
 0x127   :  { %3653 = vmatpush.bf16.msrb.mxu1 %v6087_v21  ;;  %3622 = vmatmul.bf16.vlgmr.msra.gmra.mxu2 %v9022_v18  ;;  %v8187_v21 = vld [vmem:[%s12916_s1 + $0x574] sm:$0xf0]  ;;  %v5878_v43 = vld [vmem:[%s12916_s1 + $0x448] sm:$0xf] }
 0x128   :  { %3666 = vmatpush.bf16.msrb.mxu2 %v6215_v24  ;;  %3635 = vmatmul.bf16.vlgmr.msra.gmra.mxu3 %v9026_v20  ;;  %v6150_v24 = vld [vmem:[%s12916_s1 + $0x668] sm:$0xf]  ;;  %v6023_v37 = vor.u32 %v8187_v21, %v6022_v12  ;;  %v8151_v16 = vld [vmem:[%s12916_s1 + $0x454] sm:$0xf0] }
 0x129   :  { %3679 = vmatpush.bf16.msrb.mxu3 %v6343_v34  ;;  %v3403_v34 = vadd.f32 %v3402_v15, %v3390_v14  ;;  %v6151_v39 = vor.u32 %v8219_v26, %v6150_v24  ;;  %v8183_v48 = vld [vmem:[%s12916_s1 + $0x554] sm:$0xf0]  ;;  %v6134_v49 = vld [vmem:[%s12916_s1 + $0x648] sm:$0xf]  ;;  %v5879_v54 = vor.u32 %v8151_v16, %v5878_v43 }
 0x12a   :  { %3641 = vmatpush.bf16.msrb.mxu0 %v5943_v45  ;;  %v6006_v45 = vld [vmem:[%s12916_s1 + $0x548] sm:$0xf]  ;;  %v8215_v50 = vld [vmem:[%s12916_s1 + $0x654] sm:$0xf0] }
 0x12b   :  { %3654 = vmatpush.bf16.msrb.mxu1 %v6071_v46  ;;  %v3415_v46 = vpop.f32.mrf.mxu2  ;;  %v3428_v62 = vpop.f32.mrf.mxu3  ;;  %v6262_v52 = vld [vmem:[%s12916_s1 + $0x748] sm:$0xf]  ;;  %v8247_v53 = vld [vmem:[%s12916_s1 + $0x754] sm:$0xf0]  ;;  %v6007_v57 = vor.u32 %v8183_v48, %v6006_v45 }
 0x12c   :  { %3667 = vmatpush.bf16.msrb.mxu2 %v6199_v47  ;;  %v6279_v47 = vor.u32 %v8251_v32, %v6278_v27  ;;  %v8147_v60 = vld [vmem:[%s12916_s1 + $0x434] sm:$0xf0]  ;;  %v5990_v61 = vld [vmem:[%s12916_s1 + $0x528] sm:$0xf]  ;;  %v6263_v0 = vor.u32 %v8247_v53, %v6262_v52 }
 0x12d   :  { %3680 = vmatpush.bf16.msrb.mxu3 %v6327_v51  ;;  %v3416_v51 = vadd.f32 %v3415_v46, %v3403_v34  ;;  %v3404_v63 = vpop.f32.mrf.mxu1  ;;  %v6118_v1 = vld [vmem:[%s12916_s1 + $0x628] sm:$0xf]  ;;  %v8211_v2 = vld [vmem:[%s12916_s1 + $0x634] sm:$0xf0] }
 0x12e   :  { %3642 = vmatpush.bf16.msrb.mxu0 %v5927_v56  ;;  %v3391_v56 = vpop.f32.mrf.mxu0  ;;  %v6246_v3 = vld [vmem:[%s12916_s1 + $0x728] sm:$0xf]  ;;  %v8243_v4 = vld [vmem:[%s12916_s1 + $0x734] sm:$0xf0] }
 0x12f   :  { %3655 = vmatpush.bf16.msrb.mxu1 %v6055_v58  ;;  %v10709_v55 = vadd.f32 %v3428_v62, %v3416_v51  ;;  %v6135_v58 = vor.u32 %v8215_v50, %v6134_v49  ;;  %v8143_v7 = vld [vmem:[%s12916_s1 + $0x414] sm:$0xf0]  ;;  %v5974_v10 = vld [vmem:[%s12916_s1 + $0x508] sm:$0xf]  ;;  %v6247_v15 = vor.u32 %v8243_v4, %v6246_v3 }
 0x130   :  { %3668 = vmatpush.bf16.msrb.mxu2 %v6183_v59  ;;  %v5862_v59 = vld [vmem:[%s12916_s1 + $0x428] sm:$0xf]  ;;  %v8175_v11 = vld [vmem:[%s12916_s1 + $0x514] sm:$0xf0] }
 0x131   :  { %3681 = vmatpush.bf16.msrb.mxu3 %v6311_v13  ;;  %v8179_v13 = vld [vmem:[%s12916_s1 + $0x534] sm:$0xf0]  ;;  %v5863_v5 = vor.u32 %v8147_v60, %v5862_v59  ;;  %v6102_v12 = vld [vmem:[%s12916_s1 + $0x608] sm:$0xf]  ;;  %v5975_v16 = vor.u32 %v8175_v11, %v5974_v10 }
 0x132   :  { %3643 = vmatpush.bf16.msrb.mxu0 %v5911_v6  ;;  %v5846_v6 = vld [vmem:[%s12916_s1 + $0x408] sm:$0xf]  ;;  %v8239_v24 = vld [vmem:[%s12916_s1 + $0x714] sm:$0xf0] }
 0x133   :  { %3656 = vmatpush.bf16.msrb.mxu1 %v6039_v8  ;;  %v5991_v8 = vor.u32 %v8179_v13, %v5990_v61  ;;  %v3417_v14 = vpop.f32.mrf.mxu2  ;;  %v6230_v21 = vld [vmem:[%s12916_s1 + $0x708] sm:$0xf]  ;;  %v3430_v26 = vpop.f32.mrf.mxu3  ;;  %v8299_v32 = vld [vmem:[%s12916_s1 + $0x8f4] sm:$0xf0] }
 0x134   :  { %3669 = vmatpush.bf16.msrb.mxu2 %v6167_v9  ;;  %v6119_v9 = vor.u32 %v8211_v2, %v6118_v1  ;;  %v6470_v27 = vld [vmem:[%s12916_s1 + $0x8e8] sm:$0xf]  ;;  %v8363_v43 = vld [vmem:[%s12916_s1 + $0xaf4] sm:$0xf0]  ;;  %v6231_v48 = vor.u32 %v8239_v24, %v6230_v21 }
 0x135   :  { %3682 = vmatpush.bf16.msrb.mxu3 %v6295_v17  ;;  %v8207_v17 = vld [vmem:[%s12916_s1 + $0x614] sm:$0xf0]  ;;  %v6598_v34 = vld [vmem:[%s12916_s1 + $0x9e8] sm:$0xf]  ;;  %v6471_v49 = vor.u32 %v8299_v32, %v6470_v27 }
 0x136   :  { %3644 = vmatpush.bf16.msrb.mxu0 %v5895_v36  ;;  %v5847_v36 = vor.u32 %v8143_v7, %v5846_v6  ;;  %v6103_v45 = vor.u32 %v8207_v17, %v6102_v12  ;;  %v6854_v46 = vld [vmem:[%s12916_s1 + $0xbe8] sm:$0xf]  ;;  %v8295_v52 = vld [vmem:[%s12916_s1 + $0x8d4] sm:$0xf0] }
 0x137   :  { %3657 = vmatpush.bf16.msrb.mxu1 %v6023_v37  ;;  %v8331_v37 = vld [vmem:[%s12916_s1 + $0x9f4] sm:$0xf0]  ;;  %v6454_v62 = vld [vmem:[%s12916_s1 + $0x8c8] sm:$0xf] }
 0x138   :  { %3670 = vmatpush.bf16.msrb.mxu2 %v6151_v39  ;;  %v6726_v39 = vld [vmem:[%s12916_s1 + $0xae8] sm:$0xf]  ;;  %v6599_v50 = vor.u32 %v8331_v37, %v6598_v34  ;;  %v8327_v56 = vld [vmem:[%s12916_s1 + $0x9d4] sm:$0xf0]  ;;  %v6455_v61 = vor.u32 %v8295_v52, %v6454_v62 }
 0x139   :  { %3683 = vmatpush.bf16.msrb.mxu3 %v6279_v47  ;;  %v8395_v47 = vld [vmem:[%s12916_s1 + $0xbf4] sm:$0xf0]  ;;  %v6727_v51 = vor.u32 %v8363_v43, %v6726_v39  ;;  %v6582_v53 = vld [vmem:[%s12916_s1 + $0x9c8] sm:$0xf] }
 0x13a   :  { %3645 = vmatpush.bf16.msrb.mxu0 %v5879_v54  ;;  %v6855_v54 = vor.u32 %v8395_v47, %v6854_v46  ;;  %v6838_v59 = vld [vmem:[%s12916_s1 + $0xbc8] sm:$0xf]  ;;  %v8391_v60 = vld [vmem:[%s12916_s1 + $0xbd4] sm:$0xf0]  ;;  %v6583_v63 = vor.u32 %v8327_v56, %v6582_v53 }
 0x13b   :  { %3658 = vmatpush.bf16.msrb.mxu1 %v6007_v57  ;;  %v6710_v57 = vld [vmem:[%s12916_s1 + $0xac8] sm:$0xf]  ;;  %v8291_v1 = vld [vmem:[%s12916_s1 + $0x8b4] sm:$0xf0]  ;;  %v6839_v3 = vor.u32 %v8391_v60, %v6838_v59 }
 0x13c   :  { %3671 = vmatpush.bf16.msrb.mxu2 %v6135_v58  ;;  %v8359_v58 = vld [vmem:[%s12916_s1 + $0xad4] sm:$0xf0]  ;;  %v6438_v13 = vld [vmem:[%s12916_s1 + $0x8a8] sm:$0xf] }
 0x13d   :  { %3684 = vmatpush.bf16.msrb.mxu3 %v6263_v0  ;;  %v6711_v0 = vor.u32 %v8359_v58, %v6710_v57  ;;  %v6566_v2 = vld [vmem:[%s12916_s1 + $0x9a8] sm:$0xf]  ;;  %v8323_v4 = vld [vmem:[%s12916_s1 + $0x9b4] sm:$0xf0] }
 0x13e   :  { %3646 = vmatpush.bf16.msrb.mxu0 %v5863_v5  ;;  %v6694_v5 = vld [vmem:[%s12916_s1 + $0xaa8] sm:$0xf]  ;;  %v8355_v6 = vld [vmem:[%s12916_s1 + $0xab4] sm:$0xf0]  ;;  %v6567_v10 = vor.u32 %v8323_v4, %v6566_v2 }
 0x13f   :  { %3659 = vmatpush.bf16.msrb.mxu1 %v5991_v8  ;;  %v6822_v7 = vld [vmem:[%s12916_s1 + $0xba8] sm:$0xf]  ;;  %v8387_v8 = vld [vmem:[%s12916_s1 + $0xbb4] sm:$0xf0]  ;;  %v6695_v11 = vor.u32 %v8355_v6, %v6694_v5 }
 0x140   :  { %3672 = vmatpush.bf16.msrb.mxu2 %v6119_v9  ;;  %v6439_v9 = vor.u32 %v8291_v1, %v6438_v13  ;;  %v6422_v12 = vld [vmem:[%s12916_s1 + $0x888] sm:$0xf]  ;;  %v8287_v14 = vld [vmem:[%s12916_s1 + $0x894] sm:$0xf0]  ;;  %v6823_v17 = vor.u32 %v8387_v8, %v6822_v7 }
 0x141   :  { %3685 = vmatpush.bf16.msrb.mxu3 %v6247_v15  ;;  %v6550_v15 = vld [vmem:[%s12916_s1 + $0x988] sm:$0xf]  ;;  %v8319_v21 = vld [vmem:[%s12916_s1 + $0x994] sm:$0xf0]  ;;  %v6423_v34 = vor.u32 %v8287_v14, %v6422_v12 }
 0x142   :  { %3647 = vmatpush.bf16.msrb.mxu0 %v5847_v36  ;;  %v6678_v24 = vld [vmem:[%s12916_s1 + $0xa88] sm:$0xf]  ;;  %v8351_v26 = vld [vmem:[%s12916_s1 + $0xa94] sm:$0xf0]  ;;  %v3441_v36 = vpop.f32.mrf.mxu0  ;;  %v6551_v37 = vor.u32 %v8319_v21, %v6550_v15 }
 0x143   :  { %3660 = vmatpush.bf16.msrb.mxu1 %v5975_v16  ;;  %v6806_v27 = vld [vmem:[%s12916_s1 + $0xb88] sm:$0xf]  ;;  %v8383_v32 = vld [vmem:[%s12916_s1 + $0xb94] sm:$0xf0]  ;;  %v6679_v39 = vor.u32 %v8351_v26, %v6678_v24  ;;  %v3442_v46 = vadd.f32 %v3441_v36, %v10709_v55  ;;  %v3454_v47 = vpop.f32.mrf.mxu1 }
 0x144   :  { %3673 = vmatpush.bf16.msrb.mxu2 %v6103_v45  ;;  %v6406_v43 = vld [vmem:[%s12916_s1 + $0x868] sm:$0xf]  ;;  %v8283_v16 = vld [vmem:[%s12916_s1 + $0x874] sm:$0xf0] }
 0x145   :  { %3686 = vmatpush.bf16.msrb.mxu3 %v6231_v48  ;;  %3648 = vmatmul.bf16.vlgmr.msrb.gmra.mxu0 %v9186_v41  ;;  %v6534_v45 = vld [vmem:[%s12916_s1 + $0x968] sm:$0xf]  ;;  %v6807_v48 = vor.u32 %v8383_v32, %v6806_v27  ;;  %v8379_v55 = vld [vmem:[%s12916_s1 + $0xb74] sm:$0xf0]  ;;  %v3455_v52 = vadd.f32 %v3454_v47, %v3442_v46  ;;  %v6407_v53 = vor.u32 %v8283_v16, %v6406_v43 }
 0x146   :  { %3692 = vmatpush.bf16.msra.mxu0 %v6471_v49  ;;  %3661 = vmatmul.bf16.vlgmr.msrb.gmra.mxu1 %v9190_v44  ;;  %v8315_v49 = vld [vmem:[%s12916_s1 + $0x974] sm:$0xf0]  ;;  %v6790_v62 = vld [vmem:[%s12916_s1 + $0xb68] sm:$0xf] }
 0x147   :  { %3705 = vmatpush.bf16.msra.mxu1 %v6599_v50  ;;  %3674 = vmatmul.bf16.vlgmr.msrb.gmra.mxu2 %v9178_v38  ;;  %v6662_v50 = vld [vmem:[%s12916_s1 + $0xa68] sm:$0xf]  ;;  %v8279_v58 = vld [vmem:[%s12916_s1 + $0x854] sm:$0xf0] }
 0x148   :  { %3718 = vmatpush.bf16.msra.mxu2 %v6727_v51  ;;  %3687 = vmatmul.bf16.vlgmr.msrb.gmra.mxu3 %v9188_v42  ;;  %v8347_v51 = vld [vmem:[%s12916_s1 + $0xa74] sm:$0xf0]  ;;  %v6390_v57 = vld [vmem:[%s12916_s1 + $0x848] sm:$0xf] }
 0x149   :  { %3731 = vmatpush.bf16.msra.mxu3 %v6855_v54  ;;  %v6535_v54 = vor.u32 %v8315_v49, %v6534_v45  ;;  %v6663_v56 = vor.u32 %v8347_v51, %v6662_v50  ;;  %v6518_v59 = vld [vmem:[%s12916_s1 + $0x948] sm:$0xf]  ;;  %v8343_v13 = vld [vmem:[%s12916_s1 + $0xa54] sm:$0xf0]  ;;  %v6391_v5 = vor.u32 %v8279_v58, %v6390_v57 }
 0x14a   :  { %3693 = vmatpush.bf16.msra.mxu0 %v6455_v61  ;;  %v3467_v60 = vpop.f32.mrf.mxu2  ;;  %v6791_v61 = vor.u32 %v8379_v55, %v6790_v62  ;;  %v8375_v4 = vld [vmem:[%s12916_s1 + $0xb54] sm:$0xf0]  ;;  %v3443_v7 = vpop.f32.mrf.mxu0  ;;  %v6502_v12 = vld [vmem:[%s12916_s1 + $0x928] sm:$0xf] }
 0x14b   :  { %3706 = vmatpush.bf16.msra.mxu1 %v6583_v63  ;;  %v8311_v63 = vld [vmem:[%s12916_s1 + $0x954] sm:$0xf0]  ;;  %v3468_v1 = vadd.f32 %v3467_v60, %v3455_v52  ;;  %v3480_v2 = vpop.f32.mrf.mxu3  ;;  %v3456_v14 = vpop.f32.mrf.mxu1  ;;  %v6630_v21 = vld [vmem:[%s12916_s1 + $0xa28] sm:$0xf] }
 0x14c   :  { %3719 = vmatpush.bf16.msra.mxu2 %v6711_v0  ;;  %v6646_v0 = vld [vmem:[%s12916_s1 + $0xa48] sm:$0xf]  ;;  %v6519_v8 = vor.u32 %v8311_v63, %v6518_v59  ;;  %v8339_v24 = vld [vmem:[%s12916_s1 + $0xa34] sm:$0xf0] }
 0x14d   :  { %3732 = vmatpush.bf16.msra.mxu3 %v6839_v3  ;;  %v6774_v3 = vld [vmem:[%s12916_s1 + $0xb48] sm:$0xf]  ;;  %v10908_v6 = vadd.f32 %v3480_v2, %v3468_v1  ;;  %v8371_v27 = vld [vmem:[%s12916_s1 + $0xb34] sm:$0xf0] }
 0x14e   :  { %3694 = vmatpush.bf16.msra.mxu0 %v6439_v9  ;;  %v6647_v9 = vor.u32 %v8343_v13, %v6646_v0  ;;  %v6775_v15 = vor.u32 %v8375_v4, %v6774_v3  ;;  %v6758_v26 = vld [vmem:[%s12916_s1 + $0xb28] sm:$0xf]  ;;  %v8271_v36 = vld [vmem:[%s12916_s1 + $0x814] sm:$0xf0] }
 0x14f   :  { %3707 = vmatpush.bf16.msra.mxu1 %v6567_v10  ;;  %v6374_v10 = vld [vmem:[%s12916_s1 + $0x828] sm:$0xf]  ;;  %v8303_v16 = vld [vmem:[%s12916_s1 + $0x914] sm:$0xf0]  ;;  %v6759_v47 = vor.u32 %v8371_v27, %v6758_v26 }
 0x150   :  { %3720 = vmatpush.bf16.msra.mxu2 %v6695_v11  ;;  %v8275_v11 = vld [vmem:[%s12916_s1 + $0x834] sm:$0xf0]  ;;  %v6486_v43 = vld [vmem:[%s12916_s1 + $0x908] sm:$0xf] }
 0x151   :  { %3733 = vmatpush.bf16.msra.mxu3 %v6823_v17  ;;  %v8307_v17 = vld [vmem:[%s12916_s1 + $0x934] sm:$0xf0]  ;;  %v6375_v32 = vor.u32 %v8275_v11, %v6374_v10  ;;  %v6614_v45 = vld [vmem:[%s12916_s1 + $0xa08] sm:$0xf]  ;;  %v6487_v58 = vor.u32 %v8303_v16, %v6486_v43 }
 0x152   :  { %3695 = vmatpush.bf16.msra.mxu0 %v6423_v34  ;;  %v6358_v34 = vld [vmem:[%s12916_s1 + $0x808] sm:$0xf]  ;;  %v3469_v46 = vpop.f32.mrf.mxu2  ;;  %v8367_v50 = vld [vmem:[%s12916_s1 + $0xb14] sm:$0xf0] }
 0x153   :  { %3708 = vmatpush.bf16.msra.mxu1 %v6551_v37  ;;  %v6503_v37 = vor.u32 %v8307_v17, %v6502_v12  ;;  %v6742_v49 = vld [vmem:[%s12916_s1 + $0xb08] sm:$0xf]  ;;  %v3482_v51 = vpop.f32.mrf.mxu3  ;;  %v8427_v55 = vld [vmem:[%s12916_s1 + $0xcf4] sm:$0xf0] }
 0x154   :  { %3721 = vmatpush.bf16.msra.mxu2 %v6679_v39  ;;  %v6631_v39 = vor.u32 %v8339_v24, %v6630_v21  ;;  %v6982_v62 = vld [vmem:[%s12916_s1 + $0xce8] sm:$0xf]  ;;  %v8491_v57 = vld [vmem:[%s12916_s1 + $0xef4] sm:$0xf0]  ;;  %v6743_v63 = vor.u32 %v8367_v50, %v6742_v49 }
 0x155   :  { %3734 = vmatpush.bf16.msra.mxu3 %v6807_v48  ;;  %v8335_v48 = vld [vmem:[%s12916_s1 + $0xa14] sm:$0xf0]  ;;  %v7110_v52 = vld [vmem:[%s12916_s1 + $0xde8] sm:$0xf]  ;;  %v6983_v0 = vor.u32 %v8427_v55, %v6982_v62 }
 0x156   :  { %3696 = vmatpush.bf16.msra.mxu0 %v6407_v53  ;;  %v6359_v53 = vor.u32 %v8271_v36, %v6358_v34  ;;  %v6615_v59 = vor.u32 %v8335_v48, %v6614_v45  ;;  %v7366_v60 = vld [vmem:[%s12916_s1 + $0xfe8] sm:$0xf]  ;;  %v8423_v3 = vld [vmem:[%s12916_s1 + $0xcd4] sm:$0xf0] }
 0x157   :  { %3709 = vmatpush.bf16.msra.mxu1 %v6535_v54  ;;  %v8459_v54 = vld [vmem:[%s12916_s1 + $0xdf4] sm:$0xf0]  ;;  %v6966_v2 = vld [vmem:[%s12916_s1 + $0xcc8] sm:$0xf] }
 0x158   :  { %3722 = vmatpush.bf16.msra.mxu2 %v6663_v56  ;;  %v7238_v56 = vld [vmem:[%s12916_s1 + $0xee8] sm:$0xf]  ;;  %v7111_v13 = vor.u32 %v8459_v54, %v7110_v52  ;;  %v8455_v7 = vld [vmem:[%s12916_s1 + $0xdd4] sm:$0xf0]  ;;  %v6967_v12 = vor.u32 %v8423_v3, %v6966_v2 }
 0x159   :  { %3735 = vmatpush.bf16.msra.mxu3 %v6791_v61  ;;  %v8523_v61 = vld [vmem:[%s12916_s1 + $0xff4] sm:$0xf0]  ;;  %v7239_v1 = vor.u32 %v8491_v57, %v7238_v56  ;;  %v7094_v4 = vld [vmem:[%s12916_s1 + $0xdc8] sm:$0xf] }
 0x15a   :  { %3697 = vmatpush.bf16.msra.mxu0 %v6391_v5  ;;  %v7367_v5 = vor.u32 %v8523_v61, %v7366_v60  ;;  %v7350_v10 = vld [vmem:[%s12916_s1 + $0xfc8] sm:$0xf]  ;;  %v8519_v11 = vld [vmem:[%s12916_s1 + $0xfd4] sm:$0xf0]  ;;  %v7095_v14 = vor.u32 %v8455_v7, %v7094_v4 }
 0x15b   :  { %3710 = vmatpush.bf16.msra.mxu1 %v6519_v8  ;;  %v7222_v8 = vld [vmem:[%s12916_s1 + $0xec8] sm:$0xf]  ;;  %v8419_v21 = vld [vmem:[%s12916_s1 + $0xcb4] sm:$0xf0]  ;;  %v7351_v26 = vor.u32 %v8519_v11, %v7350_v10 }
 0x15c   :  { %3723 = vmatpush.bf16.msra.mxu2 %v6647_v9  ;;  %v8487_v9 = vld [vmem:[%s12916_s1 + $0xed4] sm:$0xf0]  ;;  %v6950_v17 = vld [vmem:[%s12916_s1 + $0xca8] sm:$0xf] }
 0x15d   :  { %3736 = vmatpush.bf16.msra.mxu3 %v6775_v15  ;;  %v7223_v15 = vor.u32 %v8487_v9, %v7222_v8  ;;  %v7078_v24 = vld [vmem:[%s12916_s1 + $0xda8] sm:$0xf]  ;;  %v8451_v27 = vld [vmem:[%s12916_s1 + $0xdb4] sm:$0xf0] }
 0x15e   :  { %3698 = vmatpush.bf16.msra.mxu0 %v6375_v32  ;;  %v7206_v32 = vld [vmem:[%s12916_s1 + $0xea8] sm:$0xf]  ;;  %v8483_v34 = vld [vmem:[%s12916_s1 + $0xeb4] sm:$0xf0]  ;;  %v7079_v43 = vor.u32 %v8451_v27, %v7078_v24 }
 0x15f   :  { %3711 = vmatpush.bf16.msra.mxu1 %v6503_v37  ;;  %v7334_v36 = vld [vmem:[%s12916_s1 + $0xfa8] sm:$0xf]  ;;  %v8515_v37 = vld [vmem:[%s12916_s1 + $0xfb4] sm:$0xf0]  ;;  %v7207_v16 = vor.u32 %v8483_v34, %v7206_v32 }
 0x160   :  { %3724 = vmatpush.bf16.msra.mxu2 %v6631_v39  ;;  %v6951_v39 = vor.u32 %v8419_v21, %v6950_v17  ;;  %v6934_v45 = vld [vmem:[%s12916_s1 + $0xc88] sm:$0xf]  ;;  %v8415_v46 = vld [vmem:[%s12916_s1 + $0xc94] sm:$0xf0]  ;;  %v7335_v48 = vor.u32 %v8515_v37, %v7334_v36 }
 0x161   :  { %3737 = vmatpush.bf16.msra.mxu3 %v6759_v47  ;;  %v7062_v47 = vld [vmem:[%s12916_s1 + $0xd88] sm:$0xf]  ;;  %v8447_v49 = vld [vmem:[%s12916_s1 + $0xd94] sm:$0xf0]  ;;  %v6935_v54 = vor.u32 %v8415_v46, %v6934_v45 }
 0x162   :  { %3699 = vmatpush.bf16.msra.mxu0 %v6359_v53  ;;  %v7190_v50 = vld [vmem:[%s12916_s1 + $0xe88] sm:$0xf]  ;;  %v8479_v51 = vld [vmem:[%s12916_s1 + $0xe94] sm:$0xf0]  ;;  %v3493_v62 = vpop.f32.mrf.mxu0  ;;  %v7063_v57 = vor.u32 %v8447_v49, %v7062_v47 }
 0x163   :  { %3712 = vmatpush.bf16.msra.mxu1 %v6487_v58  ;;  %v7318_v55 = vld [vmem:[%s12916_s1 + $0xf88] sm:$0xf]  ;;  %v8511_v52 = vld [vmem:[%s12916_s1 + $0xf94] sm:$0xf0]  ;;  %v3494_v53 = vadd.f32 %v3493_v62, %v10908_v6  ;;  %v3506_v56 = vpop.f32.mrf.mxu1  ;;  %v7191_v58 = vor.u32 %v8479_v51, %v7190_v50 }
 0x164   :  { %3725 = vmatpush.bf16.msra.mxu2 %v6615_v59  ;;  %v6918_v59 = vld [vmem:[%s12916_s1 + $0xc68] sm:$0xf]  ;;  %v8411_v60 = vld [vmem:[%s12916_s1 + $0xc74] sm:$0xf0]  ;;  %v7319_v6 = vor.u32 %v8511_v52, %v7318_v55 }
 0x165   :  { %3738 = vmatpush.bf16.msra.mxu3 %v6743_v63  ;;  %3700 = vmatmul.bf16.vlgmr.msra.gmra.mxu0 %v9379_v25  ;;  %v7046_v61 = vld [vmem:[%s12916_s1 + $0xd68] sm:$0xf]  ;;  %v3507_v63 = vadd.f32 %v3506_v56, %v3494_v53  ;;  %v8507_v3 = vld [vmem:[%s12916_s1 + $0xf74] sm:$0xf0]  ;;  %v6919_v4 = vor.u32 %v8411_v60, %v6918_v59 }
 0x166   :  { %3744 = vmatpush.bf16.msrb.mxu0 %v6983_v0  ;;  %3713 = vmatmul.bf16.vlgmr.msra.gmra.mxu1 %v9392_v30  ;;  %v8443_v0 = vld [vmem:[%s12916_s1 + $0xd74] sm:$0xf0]  ;;  %v7302_v2 = vld [vmem:[%s12916_s1 + $0xf68] sm:$0xf] }
 0x167   :  { %3757 = vmatpush.bf16.msrb.mxu1 %v7111_v13  ;;  %3726 = vmatmul.bf16.vlgmr.msra.gmra.mxu2 %v9390_v29  ;;  %v7174_v13 = vld [vmem:[%s12916_s1 + $0xe68] sm:$0xf]  ;;  %v8407_v9 = vld [vmem:[%s12916_s1 + $0xc54] sm:$0xf0]  ;;  %v7303_v11 = vor.u32 %v8507_v3, %v7302_v2  ;;  %v8073_v2 = vld [vmem:[%s12916_s1 + $0x1ec] sm:$0xf] }
 0x168   :  { %3770 = vmatpush.bf16.msrb.mxu2 %v7239_v1  ;;  %3739 = vmatmul.bf16.vlgmr.msra.gmra.mxu3 %v9400_v33  ;;  %v8475_v1 = vld [vmem:[%s12916_s1 + $0xe74] sm:$0xf0]  ;;  %v6902_v8 = vld [vmem:[%s12916_s1 + $0xc48] sm:$0xf] }
 0x169   :  { %3783 = vmatpush.bf16.msrb.mxu3 %v7367_v5  ;;  %v7047_v5 = vor.u32 %v8443_v0, %v7046_v61  ;;  %v7175_v7 = vor.u32 %v8475_v1, %v7174_v13  ;;  %v7030_v10 = vld [vmem:[%s12916_s1 + $0xd48] sm:$0xf]  ;;  %v8471_v17 = vld [vmem:[%s12916_s1 + $0xe54] sm:$0xf0]  ;;  %v6903_v34 = vor.u32 %v8407_v9, %v6902_v8  ;;  %v8041_v13 = vld [vmem:[%s12916_s1 + $0xec] sm:$0xf] }
 0x16a   :  { %3745 = vmatpush.bf16.msrb.mxu0 %v6967_v12  ;;  %v3519_v12 = vpop.f32.mrf.mxu2  ;;  %v8503_v27 = vld [vmem:[%s12916_s1 + $0xf54] sm:$0xf0]  ;;  %v3495_v32 = vpop.f32.mrf.mxu0  ;;  %v7014_v46 = vld [vmem:[%s12916_s1 + $0xd28] sm:$0xf]  ;;  %v5448_v1 = vld [vmem:[%s12916_s1 + $0xf8] sm:$0xf0] }
 0x16b   :  { %3758 = vmatpush.bf16.msrb.mxu1 %v7095_v14  ;;  %v8439_v14 = vld [vmem:[%s12916_s1 + $0xd54] sm:$0xf0]  ;;  %v3520_v21 = vadd.f32 %v3519_v12, %v3507_v63  ;;  %v3532_v24 = vpop.f32.mrf.mxu3  ;;  %v3508_v36 = vpop.f32.mrf.mxu1  ;;  %v7142_v49 = vld [vmem:[%s12916_s1 + $0xe28] sm:$0xf]  ;;  %v5704_v8 = vld [vmem:[%s12916_s1 + $0x2f8] sm:$0xf0] }
 0x16c   :  { %3771 = vmatpush.bf16.msrb.mxu2 %v7223_v15  ;;  %v7158_v15 = vld [vmem:[%s12916_s1 + $0xe48] sm:$0xf]  ;;  %v8403_v45 = vld [vmem:[%s12916_s1 + $0xc34] sm:$0xf0]  ;;  %v5832_v12 = vld [vmem:[%s12916_s1 + $0x3f8] sm:$0xf0] }
 0x16d   :  { %3784 = vmatpush.bf16.msrb.mxu3 %v7351_v26  ;;  %v7286_v26 = vld [vmem:[%s12916_s1 + $0xf48] sm:$0xf]  ;;  %v11107_v37 = vadd.f32 %v3532_v24, %v3520_v21  ;;  %v8467_v50 = vld [vmem:[%s12916_s1 + $0xe34] sm:$0xf0]  ;;  %v8037_v24 = vld [vmem:[%s12916_s1 + $0xcc] sm:$0xf] }
 0x16e   :  { %3746 = vmatpush.bf16.msrb.mxu0 %v6951_v39  ;;  %v7031_v39 = vor.u32 %v8439_v14, %v7030_v10  ;;  %v7287_v47 = vor.u32 %v8503_v27, %v7286_v26  ;;  %v7270_v51 = vld [vmem:[%s12916_s1 + $0xf28] sm:$0xf]  ;;  %v8499_v62 = vld [vmem:[%s12916_s1 + $0xf34] sm:$0xf0]  ;;  %v7143_v56 = vor.u32 %v8467_v50, %v7142_v49  ;;  %v5432_v26 = vld [vmem:[%s12916_s1 + $0xd8] sm:$0xf0] }
 0x16f   :  { %3759 = vmatpush.bf16.msrb.mxu1 %v7079_v43  ;;  %v7159_v43 = vor.u32 %v8471_v17, %v7158_v15  ;;  %v6870_v52 = vld [vmem:[%s12916_s1 + $0xc08] sm:$0xf]  ;;  %v8399_v53 = vld [vmem:[%s12916_s1 + $0xc14] sm:$0xf0]  ;;  %v7271_v60 = vor.u32 %v8499_v62, %v7270_v51  ;;  %v5451_v15 = vor.u32 %v8041_v13, %v5448_v1  ;;  %v8069_v27 = vld [vmem:[%s12916_s1 + $0x1cc] sm:$0xf] }
 0x170   :  { %3772 = vmatpush.bf16.msrb.mxu2 %v7207_v16  ;;  %v6886_v16 = vld [vmem:[%s12916_s1 + $0xc28] sm:$0xf]  ;;  %v8463_v61 = vld [vmem:[%s12916_s1 + $0xe14] sm:$0xf0]  ;;  %v8101_v36 = vld [vmem:[%s12916_s1 + $0x2cc] sm:$0xf] }
 0x171   :  { %3785 = vmatpush.bf16.msrb.mxu3 %v7335_v48  ;;  %v8435_v48 = vld [vmem:[%s12916_s1 + $0xd34] sm:$0xf0]  ;;  %v6887_v55 = vor.u32 %v8403_v45, %v6886_v16  ;;  %v7126_v59 = vld [vmem:[%s12916_s1 + $0xe08] sm:$0xf]  ;;  %v5816_v16 = vld [vmem:[%s12916_s1 + $0x3d8] sm:$0xf0]  ;;  %v5435_v45 = vor.u32 %v8037_v24, %v5432_v26 }
 0x172   :  { %3747 = vmatpush.bf16.msrb.mxu0 %v6935_v54  ;;  %v7015_v54 = vor.u32 %v8435_v48, %v7014_v46  ;;  %v8495_v63 = vld [vmem:[%s12916_s1 + $0xf14] sm:$0xf0]  ;;  %v3521_v0 = vpop.f32.mrf.mxu2  ;;  %v7127_v10 = vor.u32 %v8463_v61, %v7126_v59  ;;  %v8033_v48 = vld [vmem:[%s12916_s1 + $0xac] sm:$0xf]  ;;  %v5416_v49 = vld [vmem:[%s12916_s1 + $0xb8] sm:$0xf0] }
 0x173   :  { %3760 = vmatpush.bf16.msrb.mxu1 %v7063_v57  ;;  %v6998_v57 = vld [vmem:[%s12916_s1 + $0xd08] sm:$0xf]  ;;  %v3534_v3 = vpop.f32.mrf.mxu3  ;;  %v8065_v50 = vld [vmem:[%s12916_s1 + $0x1ac] sm:$0xf]  ;;  %v5544_v62 = vld [vmem:[%s12916_s1 + $0x1b8] sm:$0xf0] }
 0x174   :  { %3773 = vmatpush.bf16.msrb.mxu2 %v7191_v58  ;;  %v8431_v58 = vld [vmem:[%s12916_s1 + $0xd14] sm:$0xf0]  ;;  %v8029_v59 = vld [vmem:[%s12916_s1 + $0x8c] sm:$0xf]  ;;  %v5656_v13 = vld [vmem:[%s12916_s1 + $0x298] sm:$0xf0] }
 0x175   :  { %3786 = vmatpush.bf16.msrb.mxu3 %v7319_v6  ;;  %v7254_v6 = vld [vmem:[%s12916_s1 + $0xf08] sm:$0xf]  ;;  %v6999_v9 = vor.u32 %v8431_v58, %v6998_v57  ;;  %v5547_v57 = vor.u32 %v8065_v50, %v5544_v62  ;;  %v8061_v61 = vld [vmem:[%s12916_s1 + $0x18c] sm:$0xf]  ;;  %v5784_v3 = vld [vmem:[%s12916_s1 + $0x398] sm:$0xf0] }
 0x176   :  { %3748 = vmatpush.bf16.msrb.mxu0 %v6919_v4  ;;  %v6871_v4 = vor.u32 %v8399_v53, %v6870_v52  ;;  %v7255_v14 = vor.u32 %v8495_v63, %v7254_v6  ;;  %v5672_v52 = vld [vmem:[%s12916_s1 + $0x2b8] sm:$0xf0]  ;;  %v8129_v53 = vld [vmem:[%s12916_s1 + $0x3ac] sm:$0xf] }
 0x177   :  { %3761 = vmatpush.bf16.msrb.mxu1 %v7047_v5  ;;  %v5576_v5 = vld [vmem:[%s12916_s1 + $0x1f8] sm:$0xf0]  ;;  %v8093_v0 = vld [vmem:[%s12916_s1 + $0x28c] sm:$0xf] }
 0x178   :  { %3774 = vmatpush.bf16.msrb.mxu2 %v7175_v7  ;;  %v8105_v7 = vld [vmem:[%s12916_s1 + $0x2ec] sm:$0xf]  ;;  %v5579_v17 = vor.u32 %v8073_v2, %v5576_v5  ;;  %v5528_v63 = vld [vmem:[%s12916_s1 + $0x198] sm:$0xf0] }
 0x179   :  { %3787 = vmatpush.bf16.msrb.mxu3 %v7303_v11  ;;  %v8137_v11 = vld [vmem:[%s12916_s1 + $0x3ec] sm:$0xf]  ;;  %v5707_v21 = vor.u32 %v8105_v7, %v5704_v8  ;;  %v5531_v8 = vor.u32 %v8061_v61, %v5528_v63  ;;  %v5768_v26 = vld [vmem:[%s12916_s1 + $0x378] sm:$0xf0] }
 0x17a   :  { %3749 = vmatpush.bf16.msrb.mxu0 %v6903_v34  ;;  %v5835_v32 = vor.u32 %v8137_v11, %v5832_v12  ;;  %v5560_v34 = vld [vmem:[%s12916_s1 + $0x1d8] sm:$0xf0]  ;;  %v8125_v2 = vld [vmem:[%s12916_s1 + $0x38c] sm:$0xf] }
 0x17b   :  { %3762 = vmatpush.bf16.msrb.mxu1 %v7031_v39  ;;  %v5688_v39 = vld [vmem:[%s12916_s1 + $0x2d8] sm:$0xf0]  ;;  %v5563_v46 = vor.u32 %v8069_v27, %v5560_v34  ;;  %v8057_v12 = vld [vmem:[%s12916_s1 + $0x16c] sm:$0xf] }
 0x17c   :  { %3775 = vmatpush.bf16.msrb.mxu2 %v7159_v43  ;;  %v8133_v43 = vld [vmem:[%s12916_s1 + $0x3cc] sm:$0xf]  ;;  %v5384_v11 = vld [vmem:[%s12916_s1 + $0x78] sm:$0xf0] }
 0x17d   :  { %3788 = vmatpush.bf16.msrb.mxu3 %v7287_v47  ;;  %v5691_v47 = vor.u32 %v8101_v36, %v5688_v39  ;;  %v5819_v51 = vor.u32 %v8133_v43, %v5816_v16  ;;  %v8121_v24 = vld [vmem:[%s12916_s1 + $0x36c] sm:$0xf]  ;;  %v5368_v39 = vld [vmem:[%s12916_s1 + $0x58] sm:$0xf0] }
 0x17e   :  { %3750 = vmatpush.bf16.msrb.mxu0 %v6887_v55  ;;  %v8097_v55 = vld [vmem:[%s12916_s1 + $0x2ac] sm:$0xf]  ;;  %v5771_v16 = vor.u32 %v8121_v24, %v5768_v26  ;;  %v5752_v62 = vld [vmem:[%s12916_s1 + $0x358] sm:$0xf0] }
 0x17f   :  { %3763 = vmatpush.bf16.msrb.mxu1 %v7015_v54  ;;  %v5800_v54 = vld [vmem:[%s12916_s1 + $0x3b8] sm:$0xf0]  ;;  %v5675_v58 = vor.u32 %v8097_v55, %v5672_v52  ;;  %v8021_v36 = vld [vmem:[%s12916_s1 + $0x4c] sm:$0xf] }
 0x180   :  { %3776 = vmatpush.bf16.msrb.mxu2 %v7143_v56  ;;  %v5419_v56 = vor.u32 %v8033_v48, %v5416_v49  ;;  %v5803_v6 = vor.u32 %v8129_v53, %v5800_v54  ;;  %v8053_v43 = vld [vmem:[%s12916_s1 + $0x14c] sm:$0xf]  ;;  %v5624_v48 = vld [vmem:[%s12916_s1 + $0x258] sm:$0xf0]  ;;  %v5371_v52 = vor.u32 %v8021_v36, %v5368_v39 }
 0x181   :  { %3789 = vmatpush.bf16.msrb.mxu3 %v7271_v60  ;;  %v5400_v60 = vld [vmem:[%s12916_s1 + $0x98] sm:$0xf0]  ;;  %v8081_v63 = vld [vmem:[%s12916_s1 + $0x22c] sm:$0xf] }
 0x182   :  { %3751 = vmatpush.bf16.msrb.mxu0 %v6871_v4  ;;  %v3545_v1 = vpop.f32.mrf.mxu0  ;;  %v5403_v5 = vor.u32 %v8029_v59, %v5400_v60  ;;  %v5352_v59 = vld [vmem:[%s12916_s1 + $0x38] sm:$0xf0]  ;;  %v8049_v60 = vld [vmem:[%s12916_s1 + $0x12c] sm:$0xf] }
 0x183   :  { %3764 = vmatpush.bf16.msrb.mxu1 %v6999_v9  ;;  %v3546_v4 = vadd.f32 %v3545_v1, %v11107_v37  ;;  %v3558_v7 = vpop.f32.mrf.mxu1  ;;  %v5659_v9 = vor.u32 %v8093_v0, %v5656_v13  ;;  %v5787_v37 = vor.u32 %v8125_v2, %v5784_v3  ;;  %v5608_v0 = vld [vmem:[%s12916_s1 + $0x238] sm:$0xf0]  ;;  %v8113_v13 = vld [vmem:[%s12916_s1 + $0x32c] sm:$0xf] }
 0x184   :  { %3777 = vmatpush.bf16.msrb.mxu2 %v7127_v10  ;;  %v8025_v10 = vld [vmem:[%s12916_s1 + $0x6c] sm:$0xf]  ;;  %v5736_v1 = vld [vmem:[%s12916_s1 + $0x338] sm:$0xf0] }
 0x185   :  { %3790 = vmatpush.bf16.msrb.mxu3 %v7255_v14  ;;  %3752 = vmatmul.bf16.vlgmr.msrb.gmra.mxu0 %v9589_v23  ;;  %v3559_v14 = vadd.f32 %v3558_v7, %v3546_v4  ;;  %v5387_v27 = vor.u32 %v8025_v10, %v5384_v11  ;;  %v8013_v3 = vld [vmem:[%s12916_s1 + $0xc] sm:$0xf]  ;;  %v5336_v4 = vld [vmem:[%s12916_s1 + $0x18] sm:$0xf0]  ;;  %v5611_v7 = vor.u32 %v8081_v63, %v5608_v0 }
 0x186   :  { %3796 = vmatpush.bf16.msra.mxu0 %v5451_v15  ;;  %3765 = vmatmul.bf16.vlgmr.msrb.gmra.mxu1 %v9602_v31  ;;  %v5512_v15 = vld [vmem:[%s12916_s1 + $0x178] sm:$0xf0]  ;;  %v8077_v10 = vld [vmem:[%s12916_s1 + $0x20c] sm:$0xf]  ;;  %v5739_v11 = vor.u32 %v8113_v13, %v5736_v1 }
 0x187   :  { %3809 = vmatpush.bf16.msra.mxu1 %v5579_v17  ;;  %3778 = vmatmul.bf16.vlgmr.msrb.gmra.mxu2 %v9600_v28  ;;  %v8089_v17 = vld [vmem:[%s12916_s1 + $0x26c] sm:$0xf]  ;;  %v6216_v36 = vld [vmem:[%s12916_s1 + $0x6f8] sm:$0xf0] }
 0x188   :  { %3822 = vmatpush.bf16.msra.mxu2 %v5707_v21  ;;  %3791 = vmatmul.bf16.vlgmr.msrb.gmra.mxu3 %v9610_v35  ;;  %v5640_v21 = vld [vmem:[%s12916_s1 + $0x278] sm:$0xf0]  ;;  %v8201_v24 = vld [vmem:[%s12916_s1 + $0x5ec] sm:$0xf] }
 0x189   :  { %3835 = vmatpush.bf16.msra.mxu3 %v5835_v32  ;;  %v5515_v32 = vor.u32 %v8057_v12, %v5512_v15  ;;  %v5643_v34 = vor.u32 %v8089_v17, %v5640_v21  ;;  %v5592_v12 = vld [vmem:[%s12916_s1 + $0x218] sm:$0xf0]  ;;  %v8169_v17 = vld [vmem:[%s12916_s1 + $0x4ec] sm:$0xf] }
 0x18a   :  { %3797 = vmatpush.bf16.msra.mxu0 %v5435_v45  ;;  %v3571_v45 = vpop.f32.mrf.mxu2  ;;  %v3547_v55 = vpop.f32.mrf.mxu0  ;;  %v5960_v21 = vld [vmem:[%s12916_s1 + $0x4f8] sm:$0xf0]  ;;  %v8193_v0 = vld [vmem:[%s12916_s1 + $0x5ac] sm:$0xf] }
 0x18b   :  { %3810 = vmatpush.bf16.msra.mxu1 %v5563_v46  ;;  %v5496_v46 = vld [vmem:[%s12916_s1 + $0x158] sm:$0xf0]  ;;  %v3572_v49 = vadd.f32 %v3571_v45, %v3559_v14  ;;  %v3584_v50 = vpop.f32.mrf.mxu3  ;;  %v3560_v53 = vpop.f32.mrf.mxu1 }
 0x18c   :  { %3823 = vmatpush.bf16.msra.mxu2 %v5691_v47  ;;  %v8085_v47 = vld [vmem:[%s12916_s1 + $0x24c] sm:$0xf]  ;;  %v5720_v14 = vld [vmem:[%s12916_s1 + $0x318] sm:$0xf0] }
 0x18d   :  { %3836 = vmatpush.bf16.msra.mxu3 %v5819_v51  ;;  %v8117_v51 = vld [vmem:[%s12916_s1 + $0x34c] sm:$0xf]  ;;  %v11306_v54 = vadd.f32 %v3584_v50, %v3572_v49  ;;  %v6344_v45 = vld [vmem:[%s12916_s1 + $0x7f8] sm:$0xf0] }
 0x18e   :  { %3798 = vmatpush.bf16.msra.mxu0 %v5419_v56  ;;  %v5499_v56 = vor.u32 %v8053_v43, %v5496_v46  ;;  %v5755_v61 = vor.u32 %v8117_v51, %v5752_v62  ;;  %v5595_v43 = vor.u32 %v8077_v10, %v5592_v12  ;;  %v8165_v50 = vld [vmem:[%s12916_s1 + $0x4cc] sm:$0xf]  ;;  %v5944_v51 = vld [vmem:[%s12916_s1 + $0x4d8] sm:$0xf0] }
 0x18f   :  { %3811 = vmatpush.bf16.msra.mxu1 %v5547_v57  ;;  %v5627_v57 = vor.u32 %v8085_v47, %v5624_v48  ;;  %v5963_v47 = vor.u32 %v8169_v17, %v5960_v21  ;;  %v8197_v62 = vld [vmem:[%s12916_s1 + $0x5cc] sm:$0xf]  ;;  %v5928_v63 = vld [vmem:[%s12916_s1 + $0x4b8] sm:$0xf0] }
 0x190   :  { %3824 = vmatpush.bf16.msra.mxu2 %v5675_v58  ;;  %v8017_v58 = vld [vmem:[%s12916_s1 + $0x2c] sm:$0xf]  ;;  %v6056_v1 = vld [vmem:[%s12916_s1 + $0x5b8] sm:$0xf0] }
 0x191   :  { %3837 = vmatpush.bf16.msra.mxu3 %v5803_v6  ;;  %v5480_v6 = vld [vmem:[%s12916_s1 + $0x138] sm:$0xf0]  ;;  %v5355_v2 = vor.u32 %v8017_v58, %v5352_v59  ;;  %v8229_v53 = vld [vmem:[%s12916_s1 + $0x6cc] sm:$0xf]  ;;  %v5947_v59 = vor.u32 %v8165_v50, %v5944_v51 }
 0x192   :  { %3799 = vmatpush.bf16.msra.mxu0 %v5403_v5  ;;  %v5483_v5 = vor.u32 %v8049_v60, %v5480_v6  ;;  %v3573_v15 = vpop.f32.mrf.mxu2  ;;  %v6328_v58 = vld [vmem:[%s12916_s1 + $0x7d8] sm:$0xf0]  ;;  %v8161_v6 = vld [vmem:[%s12916_s1 + $0x4ac] sm:$0xf] }
 0x193   :  { %3812 = vmatpush.bf16.msra.mxu1 %v5531_v8  ;;  %v8045_v8 = vld [vmem:[%s12916_s1 + $0x10c] sm:$0xf]  ;;  %v3586_v26 = vpop.f32.mrf.mxu3  ;;  %v5912_v10 = vld [vmem:[%s12916_s1 + $0x498] sm:$0xf0] }
 0x194   :  { %3825 = vmatpush.bf16.msra.mxu2 %v5659_v9  ;;  %v5464_v9 = vld [vmem:[%s12916_s1 + $0x118] sm:$0xf0]  ;;  %v8253_v15 = vld [vmem:[%s12916_s1 + $0x78c] sm:$0xf] }
 0x195   :  { %3838 = vmatpush.bf16.msra.mxu3 %v5787_v37  ;;  %v8109_v37 = vld [vmem:[%s12916_s1 + $0x30c] sm:$0xf]  ;;  %v5467_v39 = vor.u32 %v8045_v8, %v5464_v9  ;;  %v6296_v17 = vld [vmem:[%s12916_s1 + $0x798] sm:$0xf0] }
 0x196   :  { %3800 = vmatpush.bf16.msra.mxu0 %v5387_v27  ;;  %v5339_v27 = vor.u32 %v8013_v3, %v5336_v4  ;;  %v5723_v46 = vor.u32 %v8109_v37, %v5720_v14  ;;  %v6184_v3 = vld [vmem:[%s12916_s1 + $0x6b8] sm:$0xf0]  ;;  %v8257_v4 = vld [vmem:[%s12916_s1 + $0x7ac] sm:$0xf] }
 0x197   :  { %3813 = vmatpush.bf16.msra.mxu1 %v5515_v32  ;;  %v6088_v32 = vld [vmem:[%s12916_s1 + $0x5f8] sm:$0xf0]  ;;  %v8157_v8 = vld [vmem:[%s12916_s1 + $0x48c] sm:$0xf] }
 0x198   :  { %3826 = vmatpush.bf16.msra.mxu2 %v5643_v34  ;;  %v8233_v34 = vld [vmem:[%s12916_s1 + $0x6ec] sm:$0xf]  ;;  %v6091_v48 = vor.u32 %v8201_v24, %v6088_v32  ;;  %v6168_v14 = vld [vmem:[%s12916_s1 + $0x698] sm:$0xf0]  ;;  %v5915_v21 = vor.u32 %v8157_v8, %v5912_v10 }
 0x199   :  { %3839 = vmatpush.bf16.msra.mxu3 %v5771_v16  ;;  %v8265_v16 = vld [vmem:[%s12916_s1 + $0x7ec] sm:$0xf]  ;;  %v6219_v49 = vor.u32 %v8233_v34, %v6216_v36  ;;  %v5896_v34 = vld [vmem:[%s12916_s1 + $0x478] sm:$0xf0] }
 0x19a   :  { %3801 = vmatpush.bf16.msra.mxu0 %v5371_v52  ;;  %v6347_v55 = vor.u32 %v8265_v16, %v6344_v45  ;;  %v6072_v52 = vld [vmem:[%s12916_s1 + $0x5d8] sm:$0xf0]  ;;  %v8221_v37 = vld [vmem:[%s12916_s1 + $0x68c] sm:$0xf]  ;;  %v6299_v16 = vor.u32 %v8253_v15, %v6296_v17 }
 0x19b   :  { %3814 = vmatpush.bf16.msra.mxu1 %v5499_v56  ;;  %v6200_v56 = vld [vmem:[%s12916_s1 + $0x6d8] sm:$0xf0]  ;;  %v6075_v60 = vor.u32 %v8197_v62, %v6072_v52  ;;  %v8153_v32 = vld [vmem:[%s12916_s1 + $0x46c] sm:$0xf] }
 0x19c   :  { %3827 = vmatpush.bf16.msra.mxu2 %v5627_v57  ;;  %v8261_v57 = vld [vmem:[%s12916_s1 + $0x7cc] sm:$0xf]  ;;  %v6024_v45 = vld [vmem:[%s12916_s1 + $0x578] sm:$0xf0]  ;;  %v5899_v51 = vor.u32 %v8153_v32, %v5896_v34 }
 0x19d   :  { %3840 = vmatpush.bf16.msra.mxu3 %v5755_v61  ;;  %v6203_v61 = vor.u32 %v8229_v53, %v6200_v56  ;;  %v6331_v13 = vor.u32 %v8261_v57, %v6328_v58  ;;  %v8185_v36 = vld [vmem:[%s12916_s1 + $0x56c] sm:$0xf]  ;;  %v5880_v53 = vld [vmem:[%s12916_s1 + $0x458] sm:$0xf0] }
 0x19e   :  { %3802 = vmatpush.bf16.msra.mxu0 %v5355_v2  ;;  %v8225_v2 = vld [vmem:[%s12916_s1 + $0x6ac] sm:$0xf]  ;;  %v6027_v62 = vor.u32 %v8185_v36, %v6024_v45  ;;  %v5864_v8 = vld [vmem:[%s12916_s1 + $0x438] sm:$0xf0] }
 0x19f   :  { %3815 = vmatpush.bf16.msra.mxu1 %v5483_v5  ;;  %v6312_v5 = vld [vmem:[%s12916_s1 + $0x7b8] sm:$0xf0]  ;;  %v6187_v9 = vor.u32 %v8225_v2, %v6184_v3  ;;  %v8149_v52 = vld [vmem:[%s12916_s1 + $0x44c] sm:$0xf] }
 0x1a0   :  { %3828 = vmatpush.bf16.msra.mxu2 %v5611_v7  ;;  %v5931_v7 = vor.u32 %v8161_v6, %v5928_v63  ;;  %v6315_v12 = vor.u32 %v8257_v4, %v6312_v5  ;;  %v8181_v56 = vld [vmem:[%s12916_s1 + $0x54c] sm:$0xf]  ;;  %v5848_v15 = vld [vmem:[%s12916_s1 + $0x418] sm:$0xf0] }
 0x1a1   :  { %3841 = vmatpush.bf16.msra.mxu3 %v5739_v11  ;;  %v6104_v36 = vld [vmem:[%s12916_s1 + $0x618] sm:$0xf0]  ;;  %v8297_v45 = vld [vmem:[%s12916_s1 + $0x8ec] sm:$0xf] }
 0x1a2   :  { %3803 = vmatpush.bf16.msra.mxu0 %v5339_v27  ;;  %v3597_v24 = vpop.f32.mrf.mxu0  ;;  %v6171_v27 = vor.u32 %v8221_v37, %v6168_v14  ;;  %v8141_v14 = vld [vmem:[%s12916_s1 + $0x40c] sm:$0xf] }
 0x1a3   :  { %3816 = vmatpush.bf16.msra.mxu1 %v5467_v39 }
 0x1a4   :  { %3829 = vmatpush.bf16.msra.mxu2 %v5595_v43  ;;  %v3610_v43 = vpop.f32.mrf.mxu1 }
 0x1a5   :  { %3842 = vmatpush.bf16.msra.mxu3 %v5723_v46  ;;  %3804 = vmatmul.bf16.vlgmr.msra.gmra.mxu0 %v9024_v19  ;;  %v8189_v19 = vld [vmem:[%s12916_s1 + $0x58c] sm:$0xf] }
 0x1a6   :  { %3848 = vmatpush.bf16.msrb.mxu0 %v5963_v47  ;;  %3817 = vmatmul.bf16.vlgmr.msra.gmra.mxu1 %v9028_v22  ;;  %v6040_v22 = vld [vmem:[%s12916_s1 + $0x598] sm:$0xf0]  ;;  %v8217_v46 = vld [vmem:[%s12916_s1 + $0x66c] sm:$0xf] }
 0x1a7   :  { %3861 = vmatpush.bf16.msrb.mxu1 %v6091_v48  ;;  %3830 = vmatmul.bf16.vlgmr.msra.gmra.mxu2 %v9022_v18  ;;  %v6059_v18 = vor.u32 %v8193_v0, %v6056_v1  ;;  %v6043_v26 = vor.u32 %v8189_v19, %v6040_v22  ;;  %v6152_v47 = vld [vmem:[%s12916_s1 + $0x678] sm:$0xf0]  ;;  %v8249_v48 = vld [vmem:[%s12916_s1 + $0x76c] sm:$0xf]  ;;  %v5883_v1 = vor.u32 %v8149_v52, %v5880_v53 }
 0x1a8   :  { %3874 = vmatpush.bf16.msrb.mxu2 %v6219_v49  ;;  %3843 = vmatmul.bf16.vlgmr.msra.gmra.mxu3 %v9026_v20  ;;  %v8686_v20 = vld [vmem:[%s12918_s2] sm:$0xf]  ;;  %v6280_v49 = vld [vmem:[%s12916_s1 + $0x778] sm:$0xf0]  ;;  %v8245_v0 = vld [vmem:[%s12916_s1 + $0x74c] sm:$0xf] }
 0x1a9   :  { %3887 = vmatpush.bf16.msrb.mxu3 %v6347_v55  ;;  %v550_v11 = vperm.slane %v8686_v20, 2  ;;  %v6155_v55 = vor.u32 %v8217_v46, %v6152_v47  ;;  %v6283_v58 = vor.u32 %v8249_v48, %v6280_v49  ;;  %v5992_v19 = vld [vmem:[%s12916_s1 + $0x538] sm:$0xf0]  ;;  %v8209_v20 = vld [vmem:[%s12916_s1 + $0x62c] sm:$0xf]  ;;  %v5851_v48 = vor.u32 %v8141_v14, %v5848_v15 }
 0x1aa   :  { %3849 = vmatpush.bf16.msrb.mxu0 %v5947_v59  ;;  %v3623_v57 = vpop.f32.mrf.mxu2  ;;  %v6008_v59 = vld [vmem:[%s12916_s1 + $0x558] sm:$0xf0]  ;;  %v3599_v3 = vpop.f32.mrf.mxu0  ;;  %v8329_v47 = vld [vmem:[%s12916_s1 + $0x9ec] sm:$0xf] }
 0x1ab   :  { %3862 = vmatpush.bf16.msrb.mxu1 %v6075_v60  ;;  %v3598_v39 = vadd.f32 %v3597_v24, %v550_v11  ;;  %v8213_v60 = vld [vmem:[%s12916_s1 + $0x64c] sm:$0xf]  ;;  %v3636_v63 = vpop.f32.mrf.mxu3  ;;  %v6011_v4 = vor.u32 %v8181_v56, %v6008_v59  ;;  %v6120_v11 = vld [vmem:[%s12916_s1 + $0x638] sm:$0xf0] }
 0x1ac   :  { %3875 = vmatpush.bf16.msrb.mxu2 %v6203_v61  ;;  %v6136_v61 = vld [vmem:[%s12916_s1 + $0x658] sm:$0xf0]  ;;  %v8173_v24 = vld [vmem:[%s12916_s1 + $0x50c] sm:$0xf] }
 0x1ad   :  { %3888 = vmatpush.bf16.msrb.mxu3 %v6331_v13  ;;  %v3611_v50 = vadd.f32 %v3610_v43, %v3598_v39  ;;  %v6264_v13 = vld [vmem:[%s12916_s1 + $0x758] sm:$0xf0]  ;;  %v6139_v5 = vor.u32 %v8213_v60, %v6136_v61  ;;  %v8237_v39 = vld [vmem:[%s12916_s1 + $0x70c] sm:$0xf] }
 0x1ae   :  { %3850 = vmatpush.bf16.msrb.mxu0 %v5931_v7  ;;  %v8145_v7 = vld [vmem:[%s12916_s1 + $0x42c] sm:$0xf]  ;;  %v6267_v10 = vor.u32 %v8245_v0, %v6264_v13  ;;  %v6248_v22 = vld [vmem:[%s12916_s1 + $0x738] sm:$0xf0] }
 0x1af   :  { %3863 = vmatpush.bf16.msrb.mxu1 %v6059_v18  ;;  %v3624_v6 = vadd.f32 %v3623_v57, %v3611_v50  ;;  %v8177_v18 = vld [vmem:[%s12916_s1 + $0x52c] sm:$0xf]  ;;  %v5867_v37 = vor.u32 %v8145_v7, %v5864_v8  ;;  %v6232_v43 = vld [vmem:[%s12916_s1 + $0x718] sm:$0xf0] }
 0x1b0   :  { %3876 = vmatpush.bf16.msrb.mxu2 %v6187_v9  ;;  %v3612_v9 = vpop.f32.mrf.mxu1  ;;  %v5995_v17 = vor.u32 %v8177_v18, %v5992_v19  ;;  %v6472_v46 = vld [vmem:[%s12916_s1 + $0x8f8] sm:$0xf0]  ;;  %v8361_v50 = vld [vmem:[%s12916_s1 + $0xaec] sm:$0xf]  ;;  %v6235_v56 = vor.u32 %v8237_v39, %v6232_v43 }
 0x1b1   :  { %3889 = vmatpush.bf16.msrb.mxu3 %v6315_v12  ;;  %v11507_v2 = vadd.f32 %v3636_v63, %v3624_v6  ;;  %v8241_v12 = vld [vmem:[%s12916_s1 + $0x72c] sm:$0xf]  ;;  %v6600_v49 = vld [vmem:[%s12916_s1 + $0x9f8] sm:$0xf0]  ;;  %v6475_v57 = vor.u32 %v8297_v45, %v6472_v46 }
 0x1b2   :  { %3851 = vmatpush.bf16.msrb.mxu0 %v5915_v21  ;;  %v6123_v21 = vor.u32 %v8209_v20, %v6120_v11  ;;  %v3625_v32 = vpop.f32.mrf.mxu2  ;;  %v6251_v34 = vor.u32 %v8241_v12, %v6248_v22  ;;  %v8393_v52 = vld [vmem:[%s12916_s1 + $0xbec] sm:$0xf]  ;;  %v6856_v53 = vld [vmem:[%s12916_s1 + $0xbf8] sm:$0xf0] }
 0x1b3   :  { %3864 = vmatpush.bf16.msrb.mxu1 %v6043_v26  ;;  %v5976_v26 = vld [vmem:[%s12916_s1 + $0x518] sm:$0xf0]  ;;  %v8293_v60 = vld [vmem:[%s12916_s1 + $0x8cc] sm:$0xf]  ;;  %v6859_v63 = vor.u32 %v8393_v52, %v6856_v53 }
 0x1b4   :  { %3877 = vmatpush.bf16.msrb.mxu2 %v6171_v27  ;;  %v8205_v27 = vld [vmem:[%s12916_s1 + $0x60c] sm:$0xf]  ;;  %v6456_v61 = vld [vmem:[%s12916_s1 + $0x8d8] sm:$0xf0] }
 0x1b5   :  { %3890 = vmatpush.bf16.msrb.mxu3 %v6299_v16  ;;  %v3638_v16 = vpop.f32.mrf.mxu3  ;;  %v8325_v6 = vld [vmem:[%s12916_s1 + $0x9cc] sm:$0xf]  ;;  %v6584_v0 = vld [vmem:[%s12916_s1 + $0x9d8] sm:$0xf0] }
 0x1b6   :  { %3852 = vmatpush.bf16.msrb.mxu0 %v5899_v51  ;;  %v6728_v51 = vld [vmem:[%s12916_s1 + $0xaf8] sm:$0xf0]  ;;  %v8357_v13 = vld [vmem:[%s12916_s1 + $0xacc] sm:$0xf]  ;;  %v6587_v7 = vor.u32 %v8325_v6, %v6584_v0 }
 0x1b7   :  { %3865 = vmatpush.bf16.msrb.mxu1 %v6027_v62  ;;  %v5979_v62 = vor.u32 %v8173_v24, %v5976_v26  ;;  %v6731_v59 = vor.u32 %v8361_v50, %v6728_v51  ;;  %v8389_v3 = vld [vmem:[%s12916_s1 + $0xbcc] sm:$0xf]  ;;  %v6440_v9 = vld [vmem:[%s12916_s1 + $0x8b8] sm:$0xf0] }
 0x1b8   :  { %3878 = vmatpush.bf16.msrb.mxu2 %v6155_v55  ;;  %v6107_v55 = vor.u32 %v8205_v27, %v6104_v36  ;;  %v8289_v18 = vld [vmem:[%s12916_s1 + $0x8ac] sm:$0xf]  ;;  %v6568_v20 = vld [vmem:[%s12916_s1 + $0x9b8] sm:$0xf0] }
 0x1b9   :  { %3891 = vmatpush.bf16.msrb.mxu3 %v6283_v58  ;;  %v6603_v58 = vor.u32 %v8329_v47, %v6600_v49  ;;  %v8353_v11 = vld [vmem:[%s12916_s1 + $0xaac] sm:$0xf]  ;;  %v6696_v12 = vld [vmem:[%s12916_s1 + $0xab8] sm:$0xf0] }
 0x1ba   :  { %3853 = vmatpush.bf16.msrb.mxu0 %v5883_v1  ;;  %v6712_v1 = vld [vmem:[%s12916_s1 + $0xad8] sm:$0xf0]  ;;  %v8385_v22 = vld [vmem:[%s12916_s1 + $0xbac] sm:$0xf]  ;;  %v6699_v15 = vor.u32 %v8353_v11, %v6696_v12 }
 0x1bb   :  { %3866 = vmatpush.bf16.msrb.mxu1 %v6011_v4  ;;  %v6840_v4 = vld [vmem:[%s12916_s1 + $0xbd8] sm:$0xf0]  ;;  %v6715_v8 = vor.u32 %v8357_v13, %v6712_v1  ;;  %v8349_v24 = vld [vmem:[%s12916_s1 + $0xa8c] sm:$0xf] }
 0x1bc   :  { %3879 = vmatpush.bf16.msrb.mxu2 %v6139_v5  ;;  %v6459_v5 = vor.u32 %v8293_v60, %v6456_v61  ;;  %v6843_v19 = vor.u32 %v8389_v3, %v6840_v4  ;;  %v6680_v26 = vld [vmem:[%s12916_s1 + $0xa98] sm:$0xf0]  ;;  %v8381_v27 = vld [vmem:[%s12916_s1 + $0xb8c] sm:$0xf] }
 0x1bd   :  { %3892 = vmatpush.bf16.msrb.mxu3 %v6267_v10  ;;  %v8321_v10 = vld [vmem:[%s12916_s1 + $0x9ac] sm:$0xf]  ;;  %v6808_v32 = vld [vmem:[%s12916_s1 + $0xb98] sm:$0xf0]  ;;  %v6683_v43 = vor.u32 %v8349_v24, %v6680_v26 }
 0x1be   :  { %3854 = vmatpush.bf16.msrb.mxu0 %v5867_v37  ;;  %v6443_v37 = vor.u32 %v8289_v18, %v6440_v9  ;;  %v6571_v14 = vor.u32 %v8321_v10, %v6568_v20  ;;  %v8281_v16 = vld [vmem:[%s12916_s1 + $0x86c] sm:$0xf]  ;;  %v6408_v45 = vld [vmem:[%s12916_s1 + $0x878] sm:$0xf0] }
 0x1bf   :  { %3867 = vmatpush.bf16.msrb.mxu1 %v5995_v17  ;;  %v8285_v17 = vld [vmem:[%s12916_s1 + $0x88c] sm:$0xf]  ;;  %v6536_v49 = vld [vmem:[%s12916_s1 + $0x978] sm:$0xf0]  ;;  %v6411_v52 = vor.u32 %v8281_v16, %v6408_v45 }
 0x1c0   :  { %3880 = vmatpush.bf16.msrb.mxu2 %v6123_v21  ;;  %v6424_v21 = vld [vmem:[%s12916_s1 + $0x898] sm:$0xf0]  ;;  %v8313_v46 = vld [vmem:[%s12916_s1 + $0x96c] sm:$0xf] }
 0x1c1   :  { %3893 = vmatpush.bf16.msrb.mxu3 %v6251_v34  ;;  %v6427_v34 = vor.u32 %v8285_v17, %v6424_v21  ;;  %v8345_v50 = vld [vmem:[%s12916_s1 + $0xa6c] sm:$0xf]  ;;  %v6664_v51 = vld [vmem:[%s12916_s1 + $0xa78] sm:$0xf0]  ;;  %v6539_v53 = vor.u32 %v8313_v46, %v6536_v49 }
 0x1c2   :  { %3855 = vmatpush.bf16.msrb.mxu0 %v5851_v48  ;;  %v11657_v36 = vpop.f32.mrf.mxu0  ;;  %v6811_v48 = vor.u32 %v8381_v27, %v6808_v32  ;;  %v6520_v6 = vld [vmem:[%s12916_s1 + $0x958] sm:$0xf0]  ;;  %v8373_v1 = vld [vmem:[%s12916_s1 + $0xb4c] sm:$0xf] }
 0x1c3   :  { %3868 = vmatpush.bf16.msrb.mxu1 %v5979_v62  ;;  %v11668_v47 = vpop.f32.mrf.mxu1  ;;  %v8377_v62 = vld [vmem:[%s12916_s1 + $0xb6c] sm:$0xf]  ;;  %v6648_v0 = vld [vmem:[%s12916_s1 + $0xa58] sm:$0xf0] }
 0x1c4   :  { %3881 = vmatpush.bf16.msrb.mxu2 %v6107_v55  ;;  %v6792_v55 = vld [vmem:[%s12916_s1 + $0xb78] sm:$0xf0]  ;;  %v8273_v18 = vld [vmem:[%s12916_s1 + $0x82c] sm:$0xf] }
 0x1c5   :  { %3894 = vmatpush.bf16.msrb.mxu3 %v6235_v56  ;;  %3856 = vmatmul.bf16.vlgmr.msrb.gmra.mxu0 %v9186_v41  ;;  %v8317_v41 = vld [vmem:[%s12916_s1 + $0x98c] sm:$0xf]  ;;  %v6667_v56 = vor.u32 %v8345_v50, %v6664_v51  ;;  %v6795_v61 = vor.u32 %v8377_v62, %v6792_v55  ;;  %v6776_v3 = vld [vmem:[%s12916_s1 + $0xb58] sm:$0xf0] }
 0x1c6   :  { %3900 = vmatpush.bf16.msra.mxu0 %v6475_v57  ;;  %3869 = vmatmul.bf16.vlgmr.msrb.gmra.mxu1 %v9190_v44  ;;  %v6552_v44 = vld [vmem:[%s12916_s1 + $0x998] sm:$0xf0]  ;;  %v8277_v57 = vld [vmem:[%s12916_s1 + $0x84c] sm:$0xf]  ;;  %v6779_v20 = vor.u32 %v8373_v1, %v6776_v3 }
 0x1c7   :  { %3913 = vmatpush.bf16.msra.mxu1 %v6603_v58  ;;  %3882 = vmatmul.bf16.vlgmr.msrb.gmra.mxu2 %v9178_v38  ;;  %v6824_v38 = vld [vmem:[%s12916_s1 + $0xbb8] sm:$0xf0]  ;;  %v6555_v39 = vor.u32 %v8317_v41, %v6552_v44  ;;  %v8305_v10 = vld [vmem:[%s12916_s1 + $0x92c] sm:$0xf] }
 0x1c8   :  { %3926 = vmatpush.bf16.msra.mxu2 %v6731_v59  ;;  %3895 = vmatmul.bf16.vlgmr.msrb.gmra.mxu3 %v9188_v42  ;;  %v6827_v42 = vor.u32 %v8385_v22, %v6824_v38  ;;  %v6392_v58 = vld [vmem:[%s12916_s1 + $0x858] sm:$0xf0]  ;;  %v8309_v59 = vld [vmem:[%s12916_s1 + $0x94c] sm:$0xf] }
 0x1c9   :  { %3939 = vmatpush.bf16.msra.mxu3 %v6859_v63  ;;  %v8341_v63 = vld [vmem:[%s12916_s1 + $0xa4c] sm:$0xf]  ;;  %v6395_v4 = vor.u32 %v8277_v57, %v6392_v58  ;;  %v6376_v9 = vld [vmem:[%s12916_s1 + $0x838] sm:$0xf0] }
 0x1ca   :  { %3901 = vmatpush.bf16.msra.mxu0 %v6459_v5  ;;  %v11694_v60 = vpop.f32.mrf.mxu2  ;;  %v3651_v5 = vpop.f32.mrf.mxu0  ;;  %v6504_v11 = vld [vmem:[%s12916_s1 + $0x938] sm:$0xf0]  ;;  %v8337_v12 = vld [vmem:[%s12916_s1 + $0xa2c] sm:$0xf] }
 0x1cb   :  { %3914 = vmatpush.bf16.msra.mxu1 %v6587_v7  ;;  %v11705_v13 = vpop.f32.mrf.mxu3  ;;  %v6523_v7 = vor.u32 %v8309_v59, %v6520_v6  ;;  %v6632_v22 = vld [vmem:[%s12916_s1 + $0xa38] sm:$0xf0]  ;;  %v8369_v38 = vld [vmem:[%s12916_s1 + $0xb2c] sm:$0xf]  ;;  %v6507_v21 = vor.u32 %v8305_v10, %v6504_v11 }
 0x1cc   :  { %3927 = vmatpush.bf16.msra.mxu2 %v6715_v8  ;;  %v6651_v8 = vor.u32 %v8341_v63, %v6648_v0  ;;  %v6360_v17 = vld [vmem:[%s12916_s1 + $0x818] sm:$0xf0]  ;;  %v6635_v41 = vor.u32 %v8337_v12, %v6632_v22  ;;  %v8333_v24 = vld [vmem:[%s12916_s1 + $0xa0c] sm:$0xf] }
 0x1cd   :  { %3940 = vmatpush.bf16.msra.mxu3 %v6843_v19  ;;  %v3664_v19 = vpop.f32.mrf.mxu1  ;;  %v6488_v44 = vld [vmem:[%s12916_s1 + $0x918] sm:$0xf0]  ;;  %v8425_v16 = vld [vmem:[%s12916_s1 + $0xcec] sm:$0xf] }
 0x1ce   :  { %3902 = vmatpush.bf16.msra.mxu0 %v6443_v37  ;;  %v6760_v37 = vld [vmem:[%s12916_s1 + $0xb38] sm:$0xf0]  ;;  %v8457_v46 = vld [vmem:[%s12916_s1 + $0xdec] sm:$0xf] }
 0x1cf   :  { %3915 = vmatpush.bf16.msra.mxu1 %v6571_v14  ;;  %v6379_v14 = vor.u32 %v8273_v18, %v6376_v9  ;;  %v6763_v27 = vor.u32 %v8369_v38, %v6760_v37  ;;  %v6616_v32 = vld [vmem:[%s12916_s1 + $0xa18] sm:$0xf0]  ;;  %v8489_v50 = vld [vmem:[%s12916_s1 + $0xeec] sm:$0xf] }
 0x1d0   :  { %3928 = vmatpush.bf16.msra.mxu2 %v6699_v15  ;;  %v8269_v15 = vld [vmem:[%s12916_s1 + $0x80c] sm:$0xf]  ;;  %v6984_v45 = vld [vmem:[%s12916_s1 + $0xcf8] sm:$0xf0]  ;;  %v6619_v55 = vor.u32 %v8333_v24, %v6616_v32 }
 0x1d1   :  { %3941 = vmatpush.bf16.msra.mxu3 %v6827_v42  ;;  %v8301_v42 = vld [vmem:[%s12916_s1 + $0x90c] sm:$0xf]  ;;  %v7112_v49 = vld [vmem:[%s12916_s1 + $0xdf8] sm:$0xf0]  ;;  %v6987_v57 = vor.u32 %v8425_v16, %v6984_v45 }
 0x1d2   :  { %3903 = vmatpush.bf16.msra.mxu0 %v6427_v34  ;;  %v3677_v26 = vpop.f32.mrf.mxu2  ;;  %v8365_v34 = vld [vmem:[%s12916_s1 + $0xb0c] sm:$0xf]  ;;  %v7240_v51 = vld [vmem:[%s12916_s1 + $0xef8] sm:$0xf0]  ;;  %v6491_v62 = vor.u32 %v8301_v42, %v6488_v44  ;;  %v7115_v58 = vor.u32 %v8457_v46, %v7112_v49 }
 0x1d3   :  { %3916 = vmatpush.bf16.msra.mxu1 %v6555_v39  ;;  %v6744_v39 = vld [vmem:[%s12916_s1 + $0xb18] sm:$0xf0]  ;;  %v7243_v59 = vor.u32 %v8489_v50, %v7240_v51  ;;  %v8453_v63 = vld [vmem:[%s12916_s1 + $0xdcc] sm:$0xf] }
 0x1d4   :  { %3929 = vmatpush.bf16.msra.mxu2 %v6683_v43  ;;  %v3690_v43 = vpop.f32.mrf.mxu3  ;;  %v6968_v6 = vld [vmem:[%s12916_s1 + $0xcd8] sm:$0xf0]  ;;  %v8485_v3 = vld [vmem:[%s12916_s1 + $0xecc] sm:$0xf] }
 0x1d5   :  { %3942 = vmatpush.bf16.msra.mxu3 %v6811_v48  ;;  %v6363_v48 = vor.u32 %v8269_v15, %v6360_v17  ;;  %v7096_v1 = vld [vmem:[%s12916_s1 + $0xdd8] sm:$0xf0]  ;;  %v8517_v5 = vld [vmem:[%s12916_s1 + $0xfcc] sm:$0xf] }
 0x1d6   :  { %3904 = vmatpush.bf16.msra.mxu0 %v6411_v52  ;;  %v8521_v52 = vld [vmem:[%s12916_s1 + $0xfec] sm:$0xf]  ;;  %v7099_v18 = vor.u32 %v8453_v63, %v7096_v1  ;;  %v6952_v19 = vld [vmem:[%s12916_s1 + $0xcb8] sm:$0xf0] }
 0x1d7   :  { %3917 = vmatpush.bf16.msra.mxu1 %v6539_v53  ;;  %v7368_v53 = vld [vmem:[%s12916_s1 + $0xff8] sm:$0xf0]  ;;  %v8417_v10 = vld [vmem:[%s12916_s1 + $0xcac] sm:$0xf] }
 0x1d8   :  { %3930 = vmatpush.bf16.msra.mxu2 %v6667_v56  ;;  %v6747_v56 = vor.u32 %v8365_v34, %v6744_v39  ;;  %v7371_v0 = vor.u32 %v8521_v52, %v7368_v53  ;;  %v7080_v12 = vld [vmem:[%s12916_s1 + $0xdb8] sm:$0xf0]  ;;  %v8481_v22 = vld [vmem:[%s12916_s1 + $0xeac] sm:$0xf] }
 0x1d9   :  { %3943 = vmatpush.bf16.msra.mxu3 %v6795_v61  ;;  %v8421_v61 = vld [vmem:[%s12916_s1 + $0xccc] sm:$0xf]  ;;  %v7208_v38 = vld [vmem:[%s12916_s1 + $0xeb8] sm:$0xf0] }
 0x1da   :  { %3905 = vmatpush.bf16.msra.mxu0 %v6395_v4  ;;  %v7224_v4 = vld [vmem:[%s12916_s1 + $0xed8] sm:$0xf0]  ;;  %v7211_v17 = vor.u32 %v8481_v22, %v7208_v38  ;;  %v8477_v42 = vld [vmem:[%s12916_s1 + $0xe8c] sm:$0xf] }
 0x1db   :  { %3918 = vmatpush.bf16.msra.mxu1 %v6523_v7  ;;  %v7352_v7 = vld [vmem:[%s12916_s1 + $0xfd8] sm:$0xf0]  ;;  %v7227_v9 = vor.u32 %v8485_v3, %v7224_v4  ;;  %v8509_v26 = vld [vmem:[%s12916_s1 + $0xf8c] sm:$0xf] }
 0x1dc   :  { %3931 = vmatpush.bf16.msra.mxu2 %v6651_v8  ;;  %v6971_v8 = vor.u32 %v8421_v61, %v6968_v6  ;;  %v7355_v11 = vor.u32 %v8517_v5, %v7352_v7  ;;  %v7336_v37 = vld [vmem:[%s12916_s1 + $0xfb8] sm:$0xf0]  ;;  %v8409_v16 = vld [vmem:[%s12916_s1 + $0xc6c] sm:$0xf] }
 0x1dd   :  { %3944 = vmatpush.bf16.msra.mxu3 %v6779_v20  ;;  %v8449_v20 = vld [vmem:[%s12916_s1 + $0xdac] sm:$0xf]  ;;  %v7192_v44 = vld [vmem:[%s12916_s1 + $0xe98] sm:$0xf0] }
 0x1de   :  { %3906 = vmatpush.bf16.msra.mxu0 %v6379_v14  ;;  %v6955_v14 = vor.u32 %v8417_v10, %v6952_v19  ;;  %v7083_v15 = vor.u32 %v8449_v20, %v7080_v12  ;;  %v7195_v43 = vor.u32 %v8477_v42, %v7192_v44  ;;  %v6920_v45 = vld [vmem:[%s12916_s1 + $0xc78] sm:$0xf0]  ;;  %v8441_v46 = vld [vmem:[%s12916_s1 + $0xd6c] sm:$0xf] }
 0x1df   :  { %3919 = vmatpush.bf16.msra.mxu1 %v6507_v21  ;;  %v8445_v21 = vld [vmem:[%s12916_s1 + $0xd8c] sm:$0xf]  ;;  %v7048_v49 = vld [vmem:[%s12916_s1 + $0xd78] sm:$0xf0]  ;;  %v6923_v52 = vor.u32 %v8409_v16, %v6920_v45  ;;  %v7614_v16 = vld [vmem:[%s12919_s3 + $0x1e0] sm:$0xf] }
 0x1e0   :  { %3932 = vmatpush.bf16.msra.mxu2 %v6635_v41  ;;  %v7064_v41 = vld [vmem:[%s12916_s1 + $0xd98] sm:$0xf0]  ;;  %v8473_v50 = vld [vmem:[%s12916_s1 + $0xe6c] sm:$0xf]  ;;  %v7051_v53 = vor.u32 %v8441_v46, %v7048_v49  ;;  %v8586_v49 = vld [vmem:[%s12919_s3 + $0x1ec] sm:$0xf0] }
 0x1e1   :  { %3945 = vmatpush.bf16.msra.mxu3 %v6763_v27  ;;  %v7320_v27 = vld [vmem:[%s12916_s1 + $0xf98] sm:$0xf0]  ;;  %v7067_v39 = vor.u32 %v8445_v21, %v7064_v41  ;;  %v8501_v4 = vld [vmem:[%s12916_s1 + $0xf4c] sm:$0xf] }
 0x1e2   :  { %3907 = vmatpush.bf16.msra.mxu0 %v6363_v48  ;;  %v11855_v24 = vpop.f32.mrf.mxu0  ;;  %v7323_v48 = vor.u32 %v8509_v26, %v7320_v27  ;;  %v7176_v51 = vld [vmem:[%s12916_s1 + $0xe78] sm:$0xf0]  ;;  %v8401_v20 = vld [vmem:[%s12916_s1 + $0xc2c] sm:$0xf] }
 0x1e3   :  { %3920 = vmatpush.bf16.msra.mxu1 %v6491_v62  ;;  %v11863_v34 = vpop.f32.mrf.mxu1  ;;  %v8505_v62 = vld [vmem:[%s12916_s1 + $0xf6c] sm:$0xf]  ;;  %v7032_v63 = vld [vmem:[%s12916_s1 + $0xd58] sm:$0xf0] }
 0x1e4   :  { %3933 = vmatpush.bf16.msra.mxu2 %v6619_v55  ;;  %v7304_v55 = vld [vmem:[%s12916_s1 + $0xf78] sm:$0xf0]  ;;  %v8433_v12 = vld [vmem:[%s12916_s1 + $0xd2c] sm:$0xf] }
 0x1e5   :  { %3946 = vmatpush.bf16.msra.mxu3 %v6747_v56  ;;  %3908 = vmatmul.bf16.vlgmr.msra.gmra.mxu0 %v9379_v25  ;;  %v8513_v25 = vld [vmem:[%s12916_s1 + $0xfac] sm:$0xf]  ;;  %v7179_v56 = vor.u32 %v8473_v50, %v7176_v51  ;;  %v7307_v61 = vor.u32 %v8505_v62, %v7304_v55  ;;  %v7160_v1 = vld [vmem:[%s12916_s1 + $0xe58] sm:$0xf0]  ;;  %v7742_v50 = vld [vmem:[%s12919_s3 + $0x2e0] sm:$0xf] }
 0x1e6   :  { %3952 = vmatpush.bf16.msrb.mxu0 %v6987_v57  ;;  %3921 = vmatmul.bf16.vlgmr.msra.gmra.mxu1 %v9392_v30  ;;  %v6936_v30 = vld [vmem:[%s12916_s1 + $0xc98] sm:$0xf0]  ;;  %v8405_v57 = vld [vmem:[%s12916_s1 + $0xc4c] sm:$0xf]  ;;  %v8618_v51 = vld [vmem:[%s12919_s3 + $0x2ec] sm:$0xf0] }
 0x1e7   :  { %3965 = vmatpush.bf16.msrb.mxu1 %v7115_v58  ;;  %3934 = vmatmul.bf16.vlgmr.msra.gmra.mxu2 %v9390_v29  ;;  %v8413_v29 = vld [vmem:[%s12916_s1 + $0xc8c] sm:$0xf]  ;;  %v6904_v58 = vld [vmem:[%s12916_s1 + $0xc58] sm:$0xf0] }
 0x1e8   :  { %3978 = vmatpush.bf16.msrb.mxu2 %v7243_v59  ;;  %3947 = vmatmul.bf16.vlgmr.msra.gmra.mxu3 %v9400_v33  ;;  %v7339_v33 = vor.u32 %v8513_v25, %v7336_v37  ;;  %v6939_v32 = vor.u32 %v8413_v29, %v6936_v30  ;;  %v8437_v59 = vld [vmem:[%s12916_s1 + $0xd4c] sm:$0xf]  ;;  %v7288_v5 = vld [vmem:[%s12916_s1 + $0xf58] sm:$0xf0] }
 0x1e9   :  { %3991 = vmatpush.bf16.msrb.mxu3 %v7371_v0  ;;  %v8469_v0 = vld [vmem:[%s12916_s1 + $0xe4c] sm:$0xf]  ;;  %v7035_v10 = vor.u32 %v8437_v59, %v7032_v63  ;;  %v7144_v38 = vld [vmem:[%s12916_s1 + $0xe38] sm:$0xf0]  ;;  %v7598_v59 = vld [vmem:[%s12919_s3 + $0x1c0] sm:$0xf] }
 0x1ea   :  { %3953 = vmatpush.bf16.msrb.mxu0 %v6971_v8  ;;  %v11898_v6 = vpop.f32.mrf.mxu2  ;;  %v3703_v7 = vpop.f32.mrf.mxu0  ;;  %v3650_v8 = vadd.f32 %v11657_v36, %v11507_v2  ;;  %v7163_v19 = vor.u32 %v8469_v0, %v7160_v1  ;;  %v7291_v2 = vor.u32 %v8501_v4, %v7288_v5  ;;  %v7016_v36 = vld [vmem:[%s12916_s1 + $0xd38] sm:$0xf0]  ;;  %v8465_v22 = vld [vmem:[%s12916_s1 + $0xe2c] sm:$0xf]  ;;  %v8582_v63 = vld [vmem:[%s12919_s3 + $0x1cc] sm:$0xf0] }
 0x1eb   :  { %3966 = vmatpush.bf16.msrb.mxu1 %v7099_v18  ;;  %v11909_v3 = vpop.f32.mrf.mxu3  ;;  %v6907_v18 = vor.u32 %v8405_v57, %v6904_v58  ;;  %v8497_v25 = vld [vmem:[%s12916_s1 + $0xf2c] sm:$0xf]  ;;  %v7272_v37 = vld [vmem:[%s12916_s1 + $0xf38] sm:$0xf0]  ;;  %v7019_v30 = vor.u32 %v8433_v12, %v7016_v36  ;;  %v7147_v21 = vor.u32 %v8465_v22, %v7144_v38  ;;  %v7470_v57 = vld [vmem:[%s12919_s3 + $0xc0] sm:$0xf]  ;;  %v7599_v5 = vor.u32 %v8582_v63, %v7598_v59 }
 0x1ec   :  { %3979 = vmatpush.bf16.msrb.mxu2 %v7227_v9  ;;  %v3716_v9 = vpop.f32.mrf.mxu1  ;;  %v6872_v29 = vld [vmem:[%s12916_s1 + $0xc18] sm:$0xf0]  ;;  %v8461_v41 = vld [vmem:[%s12916_s1 + $0xe0c] sm:$0xf]  ;;  %v7275_v42 = vor.u32 %v8497_v25, %v7272_v37  ;;  %v8550_v58 = vld [vmem:[%s12919_s3 + $0xcc] sm:$0xf0] }
 0x1ed   :  { %3992 = vmatpush.bf16.msrb.mxu3 %v7355_v11  ;;  %v6888_v11 = vld [vmem:[%s12916_s1 + $0xc38] sm:$0xf0]  ;;  %v8493_v26 = vld [vmem:[%s12916_s1 + $0xf0c] sm:$0xf]  ;;  %v7726_v0 = vld [vmem:[%s12919_s3 + $0x2c0] sm:$0xf] }
 0x1ee   :  { %3954 = vmatpush.bf16.msrb.mxu0 %v6955_v14  ;;  %v3663_v14 = vadd.f32 %v11668_v47, %v3650_v8  ;;  %v7000_v47 = vld [vmem:[%s12916_s1 + $0xd18] sm:$0xf0]  ;;  %v8614_v1 = vld [vmem:[%s12919_s3 + $0x2cc] sm:$0xf0]  ;;  %v7454_v8 = vld [vmem:[%s12919_s3 + $0xa0] sm:$0xf] }
 0x1ef   :  { %3967 = vmatpush.bf16.msrb.mxu1 %v7083_v15  ;;  %v6891_v15 = vor.u32 %v8401_v20, %v6888_v11  ;;  %v7128_v44 = vld [vmem:[%s12916_s1 + $0xe18] sm:$0xf0]  ;;  %v7727_v7 = vor.u32 %v8614_v1, %v7726_v0  ;;  %v7582_v9 = vld [vmem:[%s12919_s3 + $0x1a0] sm:$0xf]  ;;  %v8606_v22 = vld [vmem:[%s12919_s3 + $0x28c] sm:$0xf0] }
 0x1f0   :  { %3980 = vmatpush.bf16.msrb.mxu2 %v7211_v17  ;;  %v8397_v17 = vld [vmem:[%s12916_s1 + $0xc0c] sm:$0xf]  ;;  %v7256_v27 = vld [vmem:[%s12916_s1 + $0xf18] sm:$0xf0]  ;;  %v3676_v46 = vadd.f32 %v11694_v60, %v3663_v14  ;;  %v7131_v55 = vor.u32 %v8461_v41, %v7128_v44  ;;  %v7438_v12 = vld [vmem:[%s12919_s3 + $0x80] sm:$0xf] }
 0x1f1   :  { %3993 = vmatpush.bf16.msrb.mxu3 %v7339_v33  ;;  %v8429_v33 = vld [vmem:[%s12916_s1 + $0xd0c] sm:$0xf]  ;;  %v7259_v60 = vor.u32 %v8493_v26, %v7256_v27  ;;  %v7694_v36 = vld [vmem:[%s12919_s3 + $0x280] sm:$0xf]  ;;  %v8534_v27 = vld [vmem:[%s12919_s3 + $0x4c] sm:$0xf0] }
 0x1f2   :  { %3955 = vmatpush.bf16.msrb.mxu0 %v6939_v32  ;;  %v3729_v32 = vpop.f32.mrf.mxu2  ;;  %v7003_v62 = vor.u32 %v8429_v33, %v7000_v47  ;;  %v7678_v33 = vld [vmem:[%s12919_s3 + $0x260] sm:$0xf]  ;;  %v8602_v47 = vld [vmem:[%s12919_s3 + $0x26c] sm:$0xf0] }
 0x1f3   :  { %3968 = vmatpush.bf16.msrb.mxu1 %v7067_v39  ;;  %v7486_v39 = vld [vmem:[%s12919_s3 + $0xe0] sm:$0xf]  ;;  %v3742_v45 = vpop.f32.mrf.mxu3  ;;  %v7679_v26 = vor.u32 %v8602_v47, %v7678_v33  ;;  %v8594_v59 = vld [vmem:[%s12919_s3 + $0x22c] sm:$0xf0]  ;;  %v8544_v47 = vld [vmem:[%s12919_s3 + $0xa4] sm:$0xf] }
 0x1f4   :  { %3981 = vmatpush.bf16.msrb.mxu2 %v7195_v43  ;;  %v8554_v43 = vld [vmem:[%s12919_s3 + $0xec] sm:$0xf0]  ;;  %v7534_v32 = vld [vmem:[%s12919_s3 + $0x140] sm:$0xf] }
 0x1f5   :  { %3994 = vmatpush.bf16.msrb.mxu3 %v7323_v48  ;;  %v6875_v48 = vor.u32 %v8397_v17, %v6872_v29  ;;  %v8538_v17 = vld [vmem:[%s12919_s3 + $0x6c] sm:$0xf0]  ;;  %v7550_v29 = vld [vmem:[%s12919_s3 + $0x160] sm:$0xf] }
 0x1f6   :  { %3956 = vmatpush.bf16.msrb.mxu0 %v6923_v52  ;;  %v7487_v52 = vor.u32 %v8554_v43, %v7486_v39  ;;  %v8566_v43 = vld [vmem:[%s12919_s3 + $0x14c] sm:$0xf0]  ;;  %v7374_v63 = vld [vmem:[%s12919_s3] sm:$0xf] }
 0x1f7   :  { %3969 = vmatpush.bf16.msrb.mxu1 %v7051_v53  ;;  %v7615_v53 = vor.u32 %v8586_v49, %v7614_v16  ;;  %v7662_v16 = vld [vmem:[%s12919_s3 + $0x240] sm:$0xf]  ;;  %v8598_v45 = vld [vmem:[%s12919_s3 + $0x24c] sm:$0xf0] }
 0x1f8   :  { %3982 = vmatpush.bf16.msrb.mxu2 %v7179_v56  ;;  %v7743_v56 = vor.u32 %v8618_v51, %v7742_v50 }
 0x1f9   :  { %3995 = vmatpush.bf16.msrb.mxu3 %v7307_v61  ;;  %v3689_v61 = vadd.f32 %v11705_v13, %v3676_v46  ;;  %v7471_v13 = vor.u32 %v8550_v58, %v7470_v57  ;;  %v8562_v57 = vld [vmem:[%s12919_s3 + $0x12c] sm:$0xf0]  ;;  %v7646_v58 = vld [vmem:[%s12919_s3 + $0x220] sm:$0xf] }
 0x1fa   :  { %3957 = vmatpush.bf16.msrb.mxu0 %v6907_v18  ;;  %v8546_v18 = vld [vmem:[%s12919_s3 + $0xac] sm:$0xf0]  ;;  %v7647_v1 = vor.u32 %v8594_v59, %v7646_v58  ;;  %v8568_v58 = vld [vmem:[%s12919_s3 + $0x164] sm:$0xf]  ;;  %v7552_v59 = vld [vmem:[%s12919_s3 + $0x170] sm:$0xf0] }
 0x1fb   :  { %3970 = vmatpush.bf16.msrb.mxu1 %v7035_v10  ;;  %v3702_v4 = vadd.f32 %v11855_v24, %v3689_v61  ;;  %v8578_v24 = vld [vmem:[%s12919_s3 + $0x1ac] sm:$0xf0]  ;;  %v7710_v10 = vld [vmem:[%s12919_s3 + $0x2a0] sm:$0xf] }
 0x1fc   :  { %3983 = vmatpush.bf16.msrb.mxu2 %v7163_v19  ;;  %v8610_v19 = vld [vmem:[%s12919_s3 + $0x2ac] sm:$0xf0]  ;;  %v7583_v20 = vor.u32 %v8578_v24, %v7582_v9  ;;  %v8552_v9 = vld [vmem:[%s12919_s3 + $0xe4] sm:$0xf] }
 0x1fd   :  { %3996 = vmatpush.bf16.msrb.mxu3 %v7291_v2  ;;  %v7711_v11 = vor.u32 %v8610_v19, %v7710_v10  ;;  %v8542_v2 = vld [vmem:[%s12919_s3 + $0x8c] sm:$0xf0]  ;;  %v7488_v10 = vld [vmem:[%s12919_s3 + $0xf0] sm:$0xf0]  ;;  %v8584_v19 = vld [vmem:[%s12919_s3 + $0x1e4] sm:$0xf] }
 0x1fe   :  { %3958 = vmatpush.bf16.msrb.mxu0 %v6891_v15  ;;  %v7439_v25 = vor.u32 %v8542_v2, %v7438_v12  ;;  %v7422_v15 = vld [vmem:[%s12919_s3 + $0x60] sm:$0xf]  ;;  %v7744_v12 = vld [vmem:[%s12919_s3 + $0x2f0] sm:$0xf0]  ;;  %v4004_v2 = vmax.f32 %v10508_v40, 0.0 }
 0x1ff   :  { %3971 = vmatpush.bf16.msrb.mxu1 %v7019_v30  ;;  %v8580_v40 = vld [vmem:[%s12919_s3 + $0x1c4] sm:$0xf] }
 0x200   :  { %3984 = vmatpush.bf16.msrb.mxu2 %v7147_v21  ;;  %v8570_v21 = vld [vmem:[%s12919_s3 + $0x16c] sm:$0xf0] }
 0x201   :  { %3997 = vmatpush.bf16.msrb.mxu3 %v7275_v42  ;;  %v7423_v42 = vor.u32 %v8538_v17, %v7422_v15  ;;  %v7551_v44 = vor.u32 %v8570_v21, %v7550_v29  ;;  %v7728_v15 = vld [vmem:[%s12919_s3 + $0x2d0] sm:$0xf0]  ;;  %v12160_v17 = vpack.c.bf16 %v4004_v2, %v4004_v2  ;;  %v8528_v2 = vld [vmem:[%s12919_s3 + $0x24] sm:$0xf] }
 0x202   :  { %3959 = vmatpush.bf16.msrb.mxu0 %v6875_v48  ;;  %v3753_v38 = vpop.f32.mrf.mxu0 }
 0x203   :  { %3972 = vmatpush.bf16.msrb.mxu1 %v7003_v62  ;;  %v3766_v37 = vpop.f32.mrf.mxu1  ;;  %v7535_v62 = vor.u32 %v8566_v43, %v7534_v32  ;;  %v8540_v43 = vld [vmem:[%s12919_s3 + $0x84] sm:$0xf] }
 0x204   :  { %3985 = vmatpush.bf16.msrb.mxu2 %v7131_v55  ;;  %v7663_v55 = vor.u32 %v8598_v45, %v7662_v16  ;;  %v7440_v16 = vld [vmem:[%s12919_s3 + $0x90] sm:$0xf0] }
 0x205   :  { %3998 = vmatpush.bf16.msrb.mxu3 %v7259_v60  ;;  %3960 = vmatmul.bf16.vlgmr.msrb.gmra.mxu0 %v9589_v23  ;;  %v3715_v23 = vadd.f32 %v11863_v34, %v3702_v4  ;;  %v8574_v34 = vld [vmem:[%s12919_s3 + $0x18c] sm:$0xf0]  ;;  %v7390_v60 = vld [vmem:[%s12919_s3 + $0x20] sm:$0xf] }
 0x206   :  { %4790 = vmatpush.bf16.msra.mxu0 %v7487_v52  ;;  %3973 = vmatmul.bf16.vlgmr.msrb.gmra.mxu1 %v9602_v31  ;;  %v7455_v31 = vor.u32 %v8546_v18, %v7454_v8  ;;  %v8530_v52 = vld [vmem:[%s12919_s3 + $0x2c] sm:$0xf0]  ;;  %v7630_v8 = vld [vmem:[%s12919_s3 + $0x200] sm:$0xf] }
 0x207   :  { %4803 = vmatpush.bf16.msra.mxu1 %v7615_v53  ;;  %3986 = vmatmul.bf16.vlgmr.msrb.gmra.mxu2 %v9600_v28  ;;  %v7566_v28 = vld [vmem:[%s12919_s3 + $0x180] sm:$0xf]  ;;  %v7391_v61 = vor.u32 %v8530_v52, %v7390_v60  ;;  %v8526_v4 = vld [vmem:[%s12919_s3 + $0xc] sm:$0xf0]  ;;  %v8536_v52 = vld [vmem:[%s12919_s3 + $0x64] sm:$0xf] }
 0x208   :  { %4816 = vmatpush.bf16.msra.mxu2 %v7743_v56  ;;  %3999 = vmatmul.bf16.vlgmr.msrb.gmra.mxu3 %v9610_v35  ;;  %v3728_v35 = vadd.f32 %v11898_v6, %v3715_v23  ;;  %v7567_v14 = vor.u32 %v8574_v34, %v7566_v28  ;;  %v7695_v6 = vor.u32 %v8606_v22, %v7694_v36  ;;  %v7518_v53 = vld [vmem:[%s12919_s3 + $0x120] sm:$0xf]  ;;  %v8590_v18 = vld [vmem:[%s12919_s3 + $0x20c] sm:$0xf0]  ;;  %v7616_v23 = vld [vmem:[%s12919_s3 + $0x1f0] sm:$0xf0] }
 0x209   :  { %v7519_v0 = vor.u32 %v8562_v57, %v7518_v53  ;;  %v4005_v28 = vmax.f32 %v11306_v54, 0.0  ;;  %v7631_v34 = vor.u32 %v8590_v18, %v7630_v8  ;;  %v7491_v22 = vor.u32 %v8552_v9, %v7488_v10  ;;  %v7600_v54 = vld [vmem:[%s12919_s3 + $0x1d0] sm:$0xf0]  ;;  %v8564_v9 = vld [vmem:[%s12919_s3 + $0x144] sm:$0xf] }
 0x20a   :  { %4791 = vmatpush.bf16.msra.mxu0 %v7471_v13  ;;  %v3741_v30 = vadd.f32 %v11909_v3, %v3728_v35  ;;  %v7406_v3 = vld [vmem:[%s12919_s3 + $0x40] sm:$0xf]  ;;  %v3779_v39 = vpop.f32.mrf.mxu2  ;;  %v3755_v48 = vpop.f32.mrf.mxu0  ;;  %v7603_v33 = vor.u32 %v8580_v40, %v7600_v54  ;;  %v7424_v57 = vld [vmem:[%s12919_s3 + $0x70] sm:$0xf0]  ;;  %v8524_v40 = vld [vmem:[%s12919_s3 + $0x4] sm:$0xf] }
 0x20b   :  { %4804 = vmatpush.bf16.msra.mxu1 %v7599_v5  ;;  %v3792_v46 = vpop.f32.mrf.mxu3  ;;  %v7407_v50 = vor.u32 %v8534_v27, %v7406_v3  ;;  %v3768_v51 = vpop.f32.mrf.mxu1  ;;  %v7502_v13 = vld [vmem:[%s12919_s3 + $0x100] sm:$0xf]  ;;  %v8558_v5 = vld [vmem:[%s12919_s3 + $0x10c] sm:$0xf0]  ;;  %v12162_v29 = vpack.c.bf16 %v4005_v28, %v4005_v28  ;;  %v8608_v3 = vld [vmem:[%s12919_s3 + $0x2a4] sm:$0xf] }
 0x20c   :  { %4817 = vmatpush.bf16.msra.mxu2 %v7727_v7  ;;  %v3754_v41 = vadd.f32 %v3753_v38, %v3741_v30  ;;  %v7503_v35 = vor.u32 %v8558_v5, %v7502_v13  ;;  %v7619_v38 = vor.u32 %v8584_v19, %v7616_v23  ;;  %v7712_v27 = vld [vmem:[%s12919_s3 + $0x2b0] sm:$0xf0]  ;;  %v8604_v51 = vld [vmem:[%s12919_s3 + $0x284] sm:$0xf]  ;;  %v7427_v13 = vor.u32 %v8536_v52, %v7424_v57  ;;  %v7854_v57 = vld [vmem:[%s12919_s3 + $0x3c0] sm:$0xf] }
 0x20d   :  { %v7715_v45 = vor.u32 %v8608_v3, %v7712_v27  ;;  %v7568_v48 = vld [vmem:[%s12919_s3 + $0x190] sm:$0xf0]  ;;  %v7555_v5 = vor.u32 %v8568_v58, %v7552_v59  ;;  %v8596_v19 = vld [vmem:[%s12919_s3 + $0x244] sm:$0xf]  ;;  %v8650_v3 = vld [vmem:[%s12919_s3 + $0x3ec] sm:$0xf0] }
 0x20e   :  { %4792 = vmatpush.bf16.msra.mxu0 %v7455_v31  ;;  %v3767_v49 = vadd.f32 %v3766_v37, %v3754_v41  ;;  %v7408_v18 = vld [vmem:[%s12919_s3 + $0x50] sm:$0xf0]  ;;  %v7494_v27 = vld [vmem:[%s12919_s3 + $0xe8] sm:$0xf]  ;;  %v8646_v58 = vld [vmem:[%s12919_s3 + $0x3cc] sm:$0xf0] }
 0x20f   :  { %4805 = vmatpush.bf16.msra.mxu1 %v7583_v20  ;;  %v7375_v20 = vor.u32 %v8526_v4, %v7374_v63  ;;  %v7664_v23 = vld [vmem:[%s12919_s3 + $0x250] sm:$0xf0]  ;;  %v8583_v59 = vld [vmem:[%s12919_s3 + $0x1d4] sm:$0xf0] }
 0x210   :  { %4818 = vmatpush.bf16.msra.mxu2 %v7711_v11  ;;  %v3780_v56 = vadd.f32 %v3779_v39, %v3767_v49  ;;  %v8616_v11 = vld [vmem:[%s12919_s3 + $0x2e4] sm:$0xf]  ;;  %v8687_v49 = vld [vmem:[%s12918_s2] sm:$0xf]  ;;  %v7376_v54 = vld [vmem:[%s12919_s3 + $0x10] sm:$0xf0] }
 0x211   :  { %v7747_v37 = vor.u32 %v8616_v11, %v7744_v12 }
 0x212   :  { %4793 = vmatpush.bf16.msra.mxu0 %v7439_v25  ;;  %v3793_v7 = vadd.f32 %v3792_v46, %v3780_v56  ;;  %v3781_v24 = vpop.f32.mrf.mxu2  ;;  %v8548_v25 = vld [vmem:[%s12919_s3 + $0xc4] sm:$0xf] }
 0x213   :  { %4806 = vmatpush.bf16.msra.mxu1 %v7567_v14  ;;  %v3794_v31 = vpop.f32.mrf.mxu3  ;;  %v7472_v14 = vld [vmem:[%s12919_s3 + $0xd0] sm:$0xf0]  ;;  %v8572_v46 = vld [vmem:[%s12919_s3 + $0x184] sm:$0xf] }
 0x214   :  { %4819 = vmatpush.bf16.msra.mxu2 %v7695_v6  ;;  %v4006_v36 = vmax.f32 %v3793_v7, 0.0  ;;  %v8612_v6 = vld [vmem:[%s12919_s3 + $0x2c4] sm:$0xf]  ;;  %v7475_v21 = vor.u32 %v8548_v25, %v7472_v14  ;;  %v7571_v60 = vor.u32 %v8572_v46, %v7568_v48  ;;  %v7536_v24 = vld [vmem:[%s12919_s3 + $0x150] sm:$0xf0] }
 0x215   :  { %v7731_v41 = vor.u32 %v8612_v6, %v7728_v15  ;;  %v8532_v7 = vld [vmem:[%s12919_s3 + $0x44] sm:$0xf]  ;;  %v7539_v12 = vor.u32 %v8564_v9, %v7536_v24  ;;  %v7648_v14 = vld [vmem:[%s12919_s3 + $0x230] sm:$0xf0]  ;;  %v7750_v46 = vld [vmem:[%s12919_s3 + $0x2e8] sm:$0xf] }
 0x216   :  { %4794 = vmatpush.bf16.msra.mxu0 %v7423_v42  ;;  %v12164_v30 = vpack.c.bf16 %v4006_v36, %v4006_v36  ;;  %v7456_v42 = vld [vmem:[%s12919_s3 + $0xb0] sm:$0xf0]  ;;  %v7411_v11 = vor.u32 %v8532_v7, %v7408_v18  ;;  %v8619_v48 = vld [vmem:[%s12919_s3 + $0x2f4] sm:$0xf0]  ;;  %v7718_v9 = vld [vmem:[%s12919_s3 + $0x2a8] sm:$0xf] }
 0x217   :  { %4807 = vmatpush.bf16.msra.mxu1 %v7551_v44  ;;  %v8576_v44 = vld [vmem:[%s12919_s3 + $0x1a4] sm:$0xf]  ;;  %v7459_v32 = vor.u32 %v8544_v47, %v7456_v42  ;;  %v7392_v36 = vld [vmem:[%s12919_s3 + $0x30] sm:$0xf0]  ;;  %v8579_v18 = vld [vmem:[%s12919_s3 + $0x1b4] sm:$0xf0] }
 0x218   :  { %4820 = vmatpush.bf16.msra.mxu2 %v7679_v26  ;;  %v7584_v26 = vld [vmem:[%s12919_s3 + $0x1b0] sm:$0xf0]  ;;  %v7395_v6 = vor.u32 %v8528_v2, %v7392_v36  ;;  %v8588_v47 = vld [vmem:[%s12919_s3 + $0x204] sm:$0xf]  ;;  %v8611_v24 = vld [vmem:[%s12919_s3 + $0x2b4] sm:$0xf0] }
 0x219   :  { %v7587_v39 = vor.u32 %v8576_v44, %v7584_v26  ;;  %v7632_v42 = vld [vmem:[%s12919_s3 + $0x210] sm:$0xf0]  ;;  %v7870_v26 = vld [vmem:[%s12919_s3 + $0x3e0] sm:$0xf]  ;;  %v7719_v2 = vor.u32 %v8611_v24, %v7718_v9  ;;  %v8638_v36 = vld [vmem:[%s12919_s3 + $0x38c] sm:$0xf0] }
 0x21a   :  { %4795 = vmatpush.bf16.msra.mxu0 %v7407_v50  ;;  %v551_v50 = vperm.slane %v8687_v49, 3  ;;  %v7379_v49 = vor.u32 %v8524_v40, %v7376_v54  ;;  %v7430_v40 = vld [vmem:[%s12919_s3 + $0x68] sm:$0xf]  ;;  %v8539_v54 = vld [vmem:[%s12919_s3 + $0x74] sm:$0xf0] }
 0x21b   :  { %4808 = vmatpush.bf16.msra.mxu1 %v7535_v62  ;;  %v7696_v62 = vld [vmem:[%s12919_s3 + $0x290] sm:$0xf0] }
 0x21c   :  { %4821 = vmatpush.bf16.msra.mxu2 %v7663_v55  ;;  %v7443_v55 = vor.u32 %v8540_v43, %v7440_v16  ;;  %v7699_v56 = vor.u32 %v8604_v51, %v7696_v62  ;;  %v7871_v16 = vor.u32 %v8650_v3, %v7870_v26  ;;  %v7635_v51 = vor.u32 %v8588_v47, %v7632_v42  ;;  %v7806_v47 = vld [vmem:[%s12919_s3 + $0x360] sm:$0xf]  ;;  %v8571_v42 = vld [vmem:[%s12919_s3 + $0x174] sm:$0xf0] }
 0x21d   :  { %v8603_v26 = vld [vmem:[%s12919_s3 + $0x274] sm:$0xf0] }
 0x21e   :  { %4796 = vmatpush.bf16.msra.mxu0 %v7391_v61  ;;  %4829 = vmatpush.bf16.msra.mxu3 %v7871_v16 }
 0x21f   :  { %4809 = vmatpush.bf16.msra.mxu1 %v7519_v0  ;;  %v8600_v0 = vld [vmem:[%s12919_s3 + $0x264] sm:$0xf] }
 0x220   :  { %4822 = vmatpush.bf16.msra.mxu2 %v7647_v1  ;;  %v7680_v1 = vld [vmem:[%s12919_s3 + $0x270] sm:$0xf0] }
 0x221   :  { %v7683_v8 = vor.u32 %v8600_v0, %v7680_v1  ;;  %v7855_v0 = vor.u32 %v8646_v58, %v7854_v57  ;;  %v8531_v57 = vld [vmem:[%s12919_s3 + $0x34] sm:$0xf0] }
 0x222   :  { %4797 = vmatpush.bf16.msra.mxu0 %v7375_v20  ;;  %v3805_v53 = vpop.f32.mrf.mxu0 }
 0x223   :  { %4810 = vmatpush.bf16.msra.mxu1 %v7503_v35  ;;  %v3806_v61 = vadd.f32 %v3805_v53, %v551_v50  ;;  %v3818_v63 = vpop.f32.mrf.mxu1  ;;  %v7751_v53 = vor.u32 %v8619_v48, %v7750_v46  ;;  %4830 = vmatpush.bf16.msra.mxu3 %v7855_v0  ;;  %v7542_v46 = vld [vmem:[%s12919_s3 + $0x148] sm:$0xf]  ;;  %v7790_v48 = vld [vmem:[%s12919_s3 + $0x340] sm:$0xf] }
 0x224   :  { %4823 = vmatpush.bf16.msra.mxu2 %v7631_v34  ;;  %v7667_v34 = vor.u32 %v8596_v19, %v7664_v23  ;;  %v8642_v19 = vld [vmem:[%s12919_s3 + $0x3ac] sm:$0xf0]  ;;  %v7654_v0 = vld [vmem:[%s12919_s3 + $0x228] sm:$0xf] }
 0x225   :  { %4798 = vmatmul.bf16.vlgmr.msra.gmra.mxu0 %v12160_v17  ;;  %v3819_v4 = vadd.f32 %v3818_v63, %v3806_v61  ;;  %v7734_v61 = vld [vmem:[%s12919_s3 + $0x2c8] sm:$0xf]  ;;  %v8615_v63 = vld [vmem:[%s12919_s3 + $0x2d4] sm:$0xf0] }
 0x226   :  { %4842 = vmatpush.bf16.msrb.mxu0 %v7491_v22  ;;  %4811 = vmatmul.bf16.vlgmr.msra.gmra.mxu1 %v12162_v29  ;;  %v8560_v22 = vld [vmem:[%s12919_s3 + $0x124] sm:$0xf]  ;;  %v7735_v7 = vor.u32 %v8615_v63, %v7734_v61  ;;  %v7526_v61 = vld [vmem:[%s12919_s3 + $0x128] sm:$0xf]  ;;  %v8563_v63 = vld [vmem:[%s12919_s3 + $0x134] sm:$0xf0] }
 0x227   :  { %4855 = vmatpush.bf16.msrb.mxu1 %v7619_v38  ;;  %4824 = vmatmul.bf16.vlgmr.msra.gmra.mxu2 %v12164_v30  ;;  %v7520_v38 = vld [vmem:[%s12919_s3 + $0x130] sm:$0xf0] }
 0x228   :  { %4868 = vmatpush.bf16.msrb.mxu2 %v7747_v37  ;;  %v8592_v37 = vld [vmem:[%s12919_s3 + $0x224] sm:$0xf]  ;;  %v7523_v15 = vor.u32 %v8560_v22, %v7520_v38  ;;  %v8575_v22 = vld [vmem:[%s12919_s3 + $0x194] sm:$0xf0]  ;;  %v7702_v38 = vld [vmem:[%s12919_s3 + $0x288] sm:$0xf] }
 0x22a   :  { %4843 = vmatpush.bf16.msrb.mxu0 %v7475_v21  ;;  %v3831_v10 = vpop.f32.mrf.mxu2  ;;  %v3807_v35 = vpop.f32.mrf.mxu0  ;;  %v8556_v21 = vld [vmem:[%s12919_s3 + $0x104] sm:$0xf] }
 0x22b   :  { %4856 = vmatpush.bf16.msrb.mxu1 %v7603_v33  ;;  %v3832_v31 = vadd.f32 %v3831_v10, %v3819_v4  ;;  %v3844_v20 = vpop.f32.mrf.mxu3  ;;  %v3820_v25 = vpop.f32.mrf.mxu1  ;;  %v7504_v33 = vld [vmem:[%s12919_s3 + $0x110] sm:$0xf0]  ;;  %v7462_v4 = vld [vmem:[%s12919_s3 + $0xa8] sm:$0xf]  ;;  %v7838_v10 = vld [vmem:[%s12919_s3 + $0x3a0] sm:$0xf] }
 0x22c   :  { %4869 = vmatpush.bf16.msrb.mxu2 %v7731_v41  ;;  %v7651_v41 = vor.u32 %v8592_v37, %v7648_v14  ;;  %v7507_v50 = vor.u32 %v8556_v21, %v7504_v33  ;;  %v7839_v23 = vor.u32 %v8642_v19, %v7838_v10  ;;  %v7574_v35 = vld [vmem:[%s12919_s3 + $0x188] sm:$0xf]  ;;  %v8607_v25 = vld [vmem:[%s12919_s3 + $0x294] sm:$0xf0] }
 0x22d   :  { %v12247_v28 = vadd.f32 %v3844_v20, %v3832_v31  ;;  %v7446_v20 = vld [vmem:[%s12919_s3 + $0x88] sm:$0xf]  ;;  %v8559_v19 = vld [vmem:[%s12919_s3 + $0x114] sm:$0xf0] }
 0x22e   :  { %4844 = vmatpush.bf16.msrb.mxu0 %v7459_v32  ;;  %v8555_v32 = vld [vmem:[%s12919_s3 + $0xf4] sm:$0xf0]  ;;  %4831 = vmatpush.bf16.msra.mxu3 %v7839_v23  ;;  %v7558_v21 = vld [vmem:[%s12919_s3 + $0x168] sm:$0xf] }
 0x22f   :  { %4857 = vmatpush.bf16.msrb.mxu1 %v7587_v39  ;;  %v7622_v39 = vld [vmem:[%s12919_s3 + $0x1e8] sm:$0xf]  ;;  %v7495_v62 = vor.u32 %v8555_v32, %v7494_v27  ;;  %v7431_v32 = vor.u32 %v8539_v54, %v7430_v40  ;;  %v7559_v16 = vor.u32 %v8571_v42, %v7558_v21 }
 0x230   :  { %4870 = vmatpush.bf16.msrb.mxu2 %v7715_v45  ;;  %v8587_v45 = vld [vmem:[%s12919_s3 + $0x1f4] sm:$0xf0]  ;;  %v7510_v10 = vld [vmem:[%s12919_s3 + $0x108] sm:$0xf] }
 0x231   :  { %v7623_v52 = vor.u32 %v8587_v45, %v7622_v39  ;;  %v7414_v39 = vld [vmem:[%s12919_s3 + $0x48] sm:$0xf] }
 0x232   :  { %4845 = vmatpush.bf16.msrb.mxu0 %v7443_v55  ;;  %v3833_v44 = vpop.f32.mrf.mxu2  ;;  %v7478_v55 = vld [vmem:[%s12919_s3 + $0xc8] sm:$0xf] }
 0x233   :  { %4858 = vmatpush.bf16.msrb.mxu1 %v7571_v60  ;;  %v3846_v43 = vpop.f32.mrf.mxu3  ;;  %v8551_v60 = vld [vmem:[%s12919_s3 + $0xd4] sm:$0xf0]  ;;  %v7686_v44 = vld [vmem:[%s12919_s3 + $0x268] sm:$0xf] }
 0x234   :  { %4871 = vmatpush.bf16.msrb.mxu2 %v7699_v56  ;;  %v7606_v56 = vld [vmem:[%s12919_s3 + $0x1c8] sm:$0xf]  ;;  %v7479_v1 = vor.u32 %v8551_v60, %v7478_v55  ;;  %v8535_v43 = vld [vmem:[%s12919_s3 + $0x54] sm:$0xf0]  ;;  %v7687_v45 = vor.u32 %v8603_v26, %v7686_v44  ;;  %v8549_v26 = vld [vmem:[%s12919_s3 + $0xcc] sm:$0xf] }
 0x235   :  { %v7638_v23 = vld [vmem:[%s12919_s3 + $0x208] sm:$0xf] }
 0x236   :  { %4846 = vmatpush.bf16.msrb.mxu0 %v7427_v13  ;;  %v8547_v13 = vld [vmem:[%s12919_s3 + $0xb4] sm:$0xf0] }
 0x237   :  { %4859 = vmatpush.bf16.msrb.mxu1 %v7555_v5  ;;  %v7607_v5 = vor.u32 %v8583_v59, %v7606_v56  ;;  %v7463_v31 = vor.u32 %v8547_v13, %v7462_v4  ;;  %v7398_v56 = vld [vmem:[%s12919_s3 + $0x28] sm:$0xf]  ;;  %v8595_v4 = vld [vmem:[%s12919_s3 + $0x234] sm:$0xf0] }
 0x238   :  { %4872 = vmatpush.bf16.msrb.mxu2 %v7683_v8  ;;  %v7590_v8 = vld [vmem:[%s12919_s3 + $0x1a8] sm:$0xf]  ;;  %v7399_v24 = vor.u32 %v8531_v57, %v7398_v56  ;;  %v7464_v57 = vld [vmem:[%s12919_s3 + $0xb8] sm:$0xf0] }
 0x23a   :  { %4847 = vmatpush.bf16.msrb.mxu0 %v7411_v11  ;;  %v8543_v11 = vld [vmem:[%s12919_s3 + $0x94] sm:$0xf0] }
 0x23b   :  { %4860 = vmatpush.bf16.msrb.mxu1 %v7539_v12  ;;  %v7591_v12 = vor.u32 %v8579_v18, %v7590_v8  ;;  %v7447_v14 = vor.u32 %v8543_v11, %v7446_v20  ;;  %v7382_v8 = vld [vmem:[%s12919_s3 + $0x8] sm:$0xf]  ;;  %v8527_v18 = vld [vmem:[%s12919_s3 + $0x14] sm:$0xf0]  ;;  %v7655_v20 = vor.u32 %v8595_v4, %v7654_v0 }
 0x23c   :  { %4873 = vmatpush.bf16.msrb.mxu2 %v7667_v34  ;;  %v7822_v34 = vld [vmem:[%s12919_s3 + $0x380] sm:$0xf]  ;;  %v8591_v11 = vld [vmem:[%s12919_s3 + $0x214] sm:$0xf0]  ;;  %v7383_v54 = vor.u32 %v8527_v18, %v7382_v8  ;;  %v7448_v18 = vld [vmem:[%s12919_s3 + $0x98] sm:$0xf0] }
 0x23d   :  { %v7823_v37 = vor.u32 %v8638_v36, %v7822_v34  ;;  %v8648_v36 = vld [vmem:[%s12919_s3 + $0x3e4] sm:$0xf] }
 0x23e   :  { %4848 = vmatpush.bf16.msrb.mxu0 %v7395_v6  ;;  %v7575_v6 = vor.u32 %v8575_v22, %v7574_v35  ;;  %v8553_v35 = vld [vmem:[%s12919_s3 + $0xec] sm:$0xf]  ;;  %v7872_v22 = vld [vmem:[%s12919_s3 + $0x3f0] sm:$0xf0] }
 0x23f   :  { %4861 = vmatpush.bf16.msrb.mxu1 %v7523_v15  ;;  %v7703_v15 = vor.u32 %v8607_v25, %v7702_v38  ;;  %4832 = vmatpush.bf16.msra.mxu3 %v7823_v37  ;;  %v7496_v38 = vld [vmem:[%s12919_s3 + $0xf8] sm:$0xf0]  ;;  %v8585_v25 = vld [vmem:[%s12919_s3 + $0x1ec] sm:$0xf]  ;;  %v7875_v21 = vor.u32 %v8648_v36, %v7872_v22 }
 0x240   :  { %4874 = vmatpush.bf16.msrb.mxu2 %v7651_v41  ;;  %v8634_v41 = vld [vmem:[%s12919_s3 + $0x36c] sm:$0xf0]  ;;  %v7624_v37 = vld [vmem:[%s12919_s3 + $0x1f8] sm:$0xf0]  ;;  %v7499_v42 = vor.u32 %v8553_v35, %v7496_v38  ;;  %v7808_v35 = vld [vmem:[%s12919_s3 + $0x370] sm:$0xf0] }
 0x241   :  { %v7807_v27 = vor.u32 %v8634_v41, %v7806_v47  ;;  %v7511_v47 = vor.u32 %v8559_v19, %v7510_v10  ;;  %v7639_v41 = vor.u32 %v8591_v11, %v7638_v23  ;;  %v7627_v44 = vor.u32 %v8585_v25, %v7624_v37  ;;  %v8605_v10 = vld [vmem:[%s12919_s3 + $0x28c] sm:$0xf]  ;;  %v7704_v19 = vld [vmem:[%s12919_s3 + $0x298] sm:$0xf0] }
 0x242   :  { %4849 = vmatpush.bf16.msrb.mxu0 %v7379_v49  ;;  %v12390_v33 = vpop.f32.mrf.mxu0  ;;  %v8630_v49 = vld [vmem:[%s12919_s3 + $0x34c] sm:$0xf0]  ;;  %v7432_v22 = vld [vmem:[%s12919_s3 + $0x78] sm:$0xf0]  ;;  %v8569_v38 = vld [vmem:[%s12919_s3 + $0x16c] sm:$0xf] }
 0x243   :  { %4862 = vmatpush.bf16.msrb.mxu1 %v7507_v50  ;;  %v12407_v3 = vpop.f32.mrf.mxu1  ;;  %v8567_v50 = vld [vmem:[%s12919_s3 + $0x154] sm:$0xf0]  ;;  %4833 = vmatpush.bf16.msra.mxu3 %v7807_v27  ;;  %v8644_v27 = vld [vmem:[%s12919_s3 + $0x3c4] sm:$0xf]  ;;  %v7560_v25 = vld [vmem:[%s12919_s3 + $0x178] sm:$0xf0] }
 0x244   :  { %4875 = vmatpush.bf16.msrb.mxu2 %v7635_v51  ;;  %v7670_v51 = vld [vmem:[%s12919_s3 + $0x248] sm:$0xf]  ;;  %v7543_v58 = vor.u32 %v8567_v50, %v7542_v46  ;;  %v8613_v46 = vld [vmem:[%s12919_s3 + $0x2cc] sm:$0xf] }
 0x245   :  { %4850 = vmatmul.bf16.vlgmr.msrb.gmra.mxu0 %v12160_v17  ;;  %v8601_v37 = vld [vmem:[%s12919_s3 + $0x26c] sm:$0xf] }
 0x246   :  { %4894 = vmatpush.bf16.msra.mxu0 %v7495_v62  ;;  %4863 = vmatmul.bf16.vlgmr.msrb.gmra.mxu1 %v12162_v29  ;;  %v8599_v62 = vld [vmem:[%s12919_s3 + $0x254] sm:$0xf0] }
 0x247   :  { %4907 = vmatpush.bf16.msra.mxu1 %v7623_v52  ;;  %4876 = vmatmul.bf16.vlgmr.msrb.gmra.mxu2 %v12164_v30  ;;  %v7791_v52 = vor.u32 %v8630_v49, %v7790_v48  ;;  %v7671_v59 = vor.u32 %v8599_v62, %v7670_v51  ;;  %v7736_v48 = vld [vmem:[%s12919_s3 + $0x2d8] sm:$0xf0]  ;;  %v8545_v62 = vld [vmem:[%s12919_s3 + $0xac] sm:$0xf] }
 0x248   :  { %4920 = vmatpush.bf16.msra.mxu2 %v7751_v53  ;;  %v7415_v53 = vor.u32 %v8535_v43, %v7414_v39  ;;  %v7480_v43 = vld [vmem:[%s12919_s3 + $0xd8] sm:$0xf0]  ;;  %v7739_v56 = vor.u32 %v8613_v46, %v7736_v48 }
 0x249   :  { %4834 = vmatpush.bf16.msra.mxu3 %v7791_v52  ;;  %v7483_v50 = vor.u32 %v8549_v26, %v7480_v43  ;;  %v8640_v52 = vld [vmem:[%s12919_s3 + $0x3a4] sm:$0xf]  ;;  %v7544_v26 = vld [vmem:[%s12919_s3 + $0x158] sm:$0xf0] }
 0x24a   :  { %4895 = vmatpush.bf16.msra.mxu0 %v7479_v1  ;;  %v12433_v55 = vpop.f32.mrf.mxu2  ;;  %v3859_v1 = vpop.f32.mrf.mxu0 }
 0x24b   :  { %4908 = vmatpush.bf16.msra.mxu1 %v7607_v5  ;;  %v12435_v60 = vpop.f32.mrf.mxu3  ;;  %v3872_v13 = vpop.f32.mrf.mxu1  ;;  %v7774_v5 = vld [vmem:[%s12919_s3 + $0x320] sm:$0xf]  ;;  %v7467_v1 = vor.u32 %v8545_v62, %v7464_v57  ;;  %v7400_v62 = vld [vmem:[%s12919_s3 + $0x38] sm:$0xf0] }
 0x24c   :  { %4921 = vmatpush.bf16.msra.mxu2 %v7735_v7  ;;  %v8626_v7 = vld [vmem:[%s12919_s3 + $0x32c] sm:$0xf0]  ;;  %v8541_v13 = vld [vmem:[%s12919_s3 + $0x8c] sm:$0xf] }
 0x24d   :  { %v7775_v9 = vor.u32 %v8626_v7, %v7774_v5  ;;  %v8636_v5 = vld [vmem:[%s12919_s3 + $0x384] sm:$0xf]  ;;  %v7824_v7 = vld [vmem:[%s12919_s3 + $0x390] sm:$0xf0] }
 0x24e   :  { %4896 = vmatpush.bf16.msra.mxu0 %v7463_v31  ;;  %v7527_v31 = vor.u32 %v8563_v63, %v7526_v61  ;;  %v8609_v61 = vld [vmem:[%s12919_s3 + $0x2ac] sm:$0xf]  ;;  %v7720_v63 = vld [vmem:[%s12919_s3 + $0x2b8] sm:$0xf0]  ;;  %v7827_v23 = vor.u32 %v8636_v5, %v7824_v7 }
 0x24f   :  { %4909 = vmatpush.bf16.msra.mxu1 %v7591_v12  ;;  %v7758_v12 = vld [vmem:[%s12919_s3 + $0x300] sm:$0xf]  ;;  %4835 = vmatpush.bf16.msra.mxu3 %v7775_v9  ;;  %v7723_v8 = vor.u32 %v8609_v61, %v7720_v63  ;;  %v8573_v9 = vld [vmem:[%s12919_s3 + $0x18c] sm:$0xf]  ;;  %v7384_v5 = vld [vmem:[%s12919_s3 + $0x18] sm:$0xf0] }
 0x250   :  { %4922 = vmatpush.bf16.msra.mxu2 %v7719_v2  ;;  %v8622_v2 = vld [vmem:[%s12919_s3 + $0x30c] sm:$0xf0]  ;;  %v8557_v7 = vld [vmem:[%s12919_s3 + $0x10c] sm:$0xf] }
 0x251   :  { %v7759_v40 = vor.u32 %v8622_v2, %v7758_v12  ;;  %v8537_v12 = vld [vmem:[%s12919_s3 + $0x6c] sm:$0xf]  ;;  %v8632_v2 = vld [vmem:[%s12919_s3 + $0x364] sm:$0xf] }
 0x252   :  { %4897 = vmatpush.bf16.msra.mxu0 %v7447_v14  ;;  %v3885_v34 = vpop.f32.mrf.mxu2 }
 0x253   :  { %4910 = vmatpush.bf16.msra.mxu1 %v7575_v6  ;;  %v3898_v14 = vpop.f32.mrf.mxu3  ;;  %v8617_v6 = vld [vmem:[%s12919_s3 + $0x2ec] sm:$0xf]  ;;  %4836 = vmatpush.bf16.msra.mxu3 %v7759_v40  ;;  %v7707_v34 = vor.u32 %v8605_v10, %v7704_v19  ;;  %v7811_v40 = vor.u32 %v8632_v2, %v7808_v35 }
 0x254   :  { %4923 = vmatpush.bf16.msra.mxu2 %v7703_v15  ;;  %v7752_v15 = vld [vmem:[%s12919_s3 + $0x2f8] sm:$0xf0] }
 0x255   :  { %v7755_v39 = vor.u32 %v8617_v6, %v7752_v15  ;;  %v7688_v14 = vld [vmem:[%s12919_s3 + $0x278] sm:$0xf0]  ;;  %v7563_v6 = vor.u32 %v8569_v38, %v7560_v25  ;;  %v8533_v15 = vld [vmem:[%s12919_s3 + $0x4c] sm:$0xf] }
 0x256   :  { %4898 = vmatpush.bf16.msra.mxu0 %v7431_v32  ;;  %v7856_v32 = vld [vmem:[%s12919_s3 + $0x3d0] sm:$0xf0] }
 0x257   :  { %4911 = vmatpush.bf16.msra.mxu1 %v7559_v16  ;;  %v8581_v16 = vld [vmem:[%s12919_s3 + $0x1cc] sm:$0xf]  ;;  %4881 = vmatpush.bf16.msrb.mxu3 %v7875_v21  ;;  %v7859_v49 = vor.u32 %v8644_v27, %v7856_v32  ;;  %v8628_v21 = vld [vmem:[%s12919_s3 + $0x344] sm:$0xf]  ;;  %v3858_v27 = vadd.f32 %v12390_v33, %v12247_v28 }
 0x258   :  { %4924 = vmatpush.bf16.msra.mxu2 %v7687_v45  ;;  %v7608_v45 = vld [vmem:[%s12919_s3 + $0x1d8] sm:$0xf0]  ;;  %v8597_v32 = vld [vmem:[%s12919_s3 + $0x24c] sm:$0xf] }
 0x259   :  { %v7611_v51 = vor.u32 %v8581_v16, %v7608_v45  ;;  %v8529_v28 = vld [vmem:[%s12919_s3 + $0x2c] sm:$0xf]  ;;  %v3871_v57 = vadd.f32 %v12407_v3, %v3858_v27  ;;  %v8620_v3 = vld [vmem:[%s12919_s3 + $0x304] sm:$0xf]  ;;  %v7846_v27 = vld [vmem:[%s12919_s3 + $0x3a8] sm:$0xf] }
 0x25a   :  { %4899 = vmatpush.bf16.msra.mxu0 %v7415_v53  ;;  %v7840_v53 = vld [vmem:[%s12919_s3 + $0x3b0] sm:$0xf0]  ;;  %v7403_v63 = vor.u32 %v8529_v28, %v7400_v62  ;;  %v7814_v28 = vld [vmem:[%s12919_s3 + $0x368] sm:$0xf] }
 0x25b   :  { %4912 = vmatpush.bf16.msra.mxu1 %v7543_v58  ;;  %v8577_v58 = vld [vmem:[%s12919_s3 + $0x1ac] sm:$0xf]  ;;  %4882 = vmatpush.bf16.msrb.mxu3 %v7859_v49  ;;  %v7843_v0 = vor.u32 %v8640_v52, %v7840_v53  ;;  %v8624_v49 = vld [vmem:[%s12919_s3 + $0x324] sm:$0xf]  ;;  %v7528_v53 = vld [vmem:[%s12919_s3 + $0x138] sm:$0xf0] }
 0x25c   :  { %4925 = vmatpush.bf16.msra.mxu2 %v7671_v59  ;;  %v7592_v59 = vld [vmem:[%s12919_s3 + $0x1b8] sm:$0xf0]  ;;  %v8561_v52 = vld [vmem:[%s12919_s3 + $0x12c] sm:$0xf] }
 0x25d   :  { %v7595_v4 = vor.u32 %v8577_v58, %v7592_v59  ;;  %v8593_v58 = vld [vmem:[%s12919_s3 + $0x22c] sm:$0xf]  ;;  %v7656_v59 = vld [vmem:[%s12919_s3 + $0x238] sm:$0xf0] }
 0x25e   :  { %4900 = vmatpush.bf16.msra.mxu0 %v7399_v24  ;;  %v7576_v24 = vld [vmem:[%s12919_s3 + $0x198] sm:$0xf0] }
 0x25f   :  { %4913 = vmatpush.bf16.msra.mxu1 %v7527_v31  ;;  %4883 = vmatpush.bf16.msrb.mxu3 %v7843_v0  ;;  %v7579_v11 = vor.u32 %v8573_v9, %v7576_v24  ;;  %v7531_v0 = vor.u32 %v8561_v52, %v7528_v53  ;;  %v8589_v9 = vld [vmem:[%s12919_s3 + $0x20c] sm:$0xf]  ;;  %v7640_v24 = vld [vmem:[%s12919_s3 + $0x218] sm:$0xf0]  ;;  %v7798_v52 = vld [vmem:[%s12919_s3 + $0x348] sm:$0xf] }
 0x260   :  { %4926 = vmatpush.bf16.msra.mxu2 %v7655_v20  ;;  %v7451_v20 = vor.u32 %v8541_v13, %v7448_v18  ;;  %v7659_v13 = vor.u32 %v8593_v58, %v7656_v59  ;;  %v3884_v18 = vadd.f32 %v12433_v55, %v3871_v57  ;;  %v8631_v53 = vld [vmem:[%s12919_s3 + $0x354] sm:$0xf0]  ;;  %v7782_v58 = vld [vmem:[%s12919_s3 + $0x328] sm:$0xf] }
 0x261   :  { %v7799_v57 = vor.u32 %v8631_v53, %v7798_v52  ;;  %v8627_v59 = vld [vmem:[%s12919_s3 + $0x334] sm:$0xf0]  ;;  %v8666_v53 = vld [vmem:[%s12921_s5 + $0x70] sm:$0xff] }
 0x262   :  { %4901 = vmatpush.bf16.msra.mxu0 %v7383_v54  ;;  %v12584_v31 = vpop.f32.mrf.mxu0  ;;  %v7435_v54 = vor.u32 %v8537_v12, %v7432_v22  ;;  %v7643_v12 = vor.u32 %v8589_v9, %v7640_v24  ;;  %v3897_v55 = vadd.f32 %v12435_v60, %v3884_v18  ;;  %v8645_v9 = vld [vmem:[%s12919_s3 + $0x3cc] sm:$0xf]  ;;  %v7864_v24 = vld [vmem:[%s12919_s3 + $0x3d8] sm:$0xf0] }
 0x263   :  { %4914 = vmatpush.bf16.msra.mxu1 %v7511_v47  ;;  %v12595_v36 = vpop.f32.mrf.mxu1  ;;  %4884 = vmatpush.bf16.msrb.mxu3 %v7827_v23  ;;  %v7792_v47 = vld [vmem:[%s12919_s3 + $0x350] sm:$0xf0] }
 0x264   :  { %4927 = vmatpush.bf16.msra.mxu2 %v7639_v41  ;;  %v7691_v41 = vor.u32 %v8601_v37, %v7688_v14  ;;  %v7795_v16 = vor.u32 %v8628_v21, %v7792_v47  ;;  %v3910_v2 = vadd.f32 %v12584_v31, %v3897_v55  ;;  %v7862_v47 = vld [vmem:[%s12919_s3 + $0x3c8] sm:$0xf]  ;;  %v7832_v55 = vld [vmem:[%s12919_s3 + $0x398] sm:$0xf0] }
 0x265   :  { %4902 = vmatmul.bf16.vlgmr.msra.gmra.mxu0 %v12160_v17 }
 0x266   :  { %4946 = vmatpush.bf16.msrb.mxu0 %v7499_v42  ;;  %4915 = vmatmul.bf16.vlgmr.msra.gmra.mxu1 %v12162_v29  ;;  %v7416_v42 = vld [vmem:[%s12919_s3 + $0x58] sm:$0xf0]  ;;  %v3923_v35 = vadd.f32 %v12595_v36, %v3910_v2 }
 0x267   :  { %4959 = vmatpush.bf16.msrb.mxu1 %v7627_v44  ;;  %4928 = vmatmul.bf16.vlgmr.msra.gmra.mxu2 %v12164_v30  ;;  %v8565_v44 = vld [vmem:[%s12919_s3 + $0x14c] sm:$0xf]  ;;  %v7419_v46 = vor.u32 %v8533_v15, %v7416_v42 }
 0x268   :  { %4972 = vmatpush.bf16.msrb.mxu2 %v7755_v39  ;;  %v7672_v39 = vld [vmem:[%s12919_s3 + $0x258] sm:$0xf0]  ;;  %4885 = vmatpush.bf16.msrb.mxu3 %v7811_v40  ;;  %v7547_v48 = vor.u32 %v8565_v44, %v7544_v26 }
 0x26a   :  { %4947 = vmatpush.bf16.msrb.mxu0 %v7483_v50  ;;  %v3935_v43 = vpop.f32.mrf.mxu2  ;;  %v3911_v33 = vpop.f32.mrf.mxu0  ;;  %v7776_v50 = vld [vmem:[%s12919_s3 + $0x330] sm:$0xf0] }
 0x26b   :  { %4960 = vmatpush.bf16.msrb.mxu1 %v7611_v51  ;;  %v3948_v45 = vpop.f32.mrf.mxu3  ;;  %v7675_v51 = vor.u32 %v8597_v32, %v7672_v39  ;;  %v7779_v61 = vor.u32 %v8624_v49, %v7776_v50  ;;  %v8643_v32 = vld [vmem:[%s12919_s3 + $0x3b4] sm:$0xf0] }
 0x26c   :  { %4973 = vmatpush.bf16.msrb.mxu2 %v7739_v56  ;;  %v3924_v56 = vpop.f32.mrf.mxu1  ;;  %4886 = vmatpush.bf16.msrb.mxu3 %v7795_v16  ;;  %v7847_v39 = vor.u32 %v8643_v32, %v7846_v27  ;;  %v8639_v16 = vld [vmem:[%s12919_s3 + $0x394] sm:$0xf0] }
 0x26d   :  { %v8635_v33 = vld [vmem:[%s12919_s3 + $0x374] sm:$0xf0] }
 0x26e   :  { %4948 = vmatpush.bf16.msrb.mxu0 %v7467_v1  ;;  %v8525_v1 = vld [vmem:[%s12919_s3 + $0xc] sm:$0xf]  ;;  %v7815_v50 = vor.u32 %v8635_v33, %v7814_v28 }
 0x26f   :  { %4961 = vmatpush.bf16.msrb.mxu1 %v7595_v4  ;;  %v7760_v4 = vld [vmem:[%s12919_s3 + $0x310] sm:$0xf0]  ;;  %v7387_v23 = vor.u32 %v8525_v1, %v7384_v5  ;;  %v7783_v1 = vor.u32 %v8627_v59, %v7782_v58  ;;  %v8649_v5 = vld [vmem:[%s12919_s3 + $0x3ec] sm:$0xf] }
 0x270   :  { %4974 = vmatpush.bf16.msrb.mxu2 %v7723_v8  ;;  %v7512_v8 = vld [vmem:[%s12919_s3 + $0x118] sm:$0xf0]  ;;  %4887 = vmatpush.bf16.msrb.mxu3 %v7779_v61  ;;  %v7763_v19 = vor.u32 %v8620_v3, %v7760_v4  ;;  %v7766_v4 = vld [vmem:[%s12919_s3 + $0x308] sm:$0xf] }
 0x271   :  { %v8653_v59 = vld [vmem:[%s12921_s5 + $0x8] sm:$0xff] }
 0x272   :  { %4949 = vmatpush.bf16.msrb.mxu0 %v7451_v20  ;;  %v3937_v10 = vpop.f32.mrf.mxu2  ;;  %v7515_v20 = vor.u32 %v8557_v7, %v7512_v8  ;;  %v7880_v7 = vld [vmem:[%s12919_s3 + $0x3f8] sm:$0xf0] }
 0x273   :  { %4962 = vmatpush.bf16.msrb.mxu1 %v7579_v11  ;;  %v3950_v11 = vpop.f32.mrf.mxu3  ;;  %v7883_v18 = vor.u32 %v8649_v5, %v7880_v7  ;;  %v8663_v5 = vld [vmem:[%s12921_s5 + $0x58] sm:$0xff] }
 0x274   :  { %4975 = vmatpush.bf16.msrb.mxu2 %v7707_v34  ;;  %4888 = vmatpush.bf16.msrb.mxu3 %v7763_v19  ;;  %v3936_v34 = vadd.f32 %v3935_v43, %v3923_v35  ;;  %v7830_v43 = vld [vmem:[%s12919_s3 + $0x388] sm:$0xf]  ;;  %v7867_v19 = vor.u32 %v8645_v9, %v7864_v24  ;;  %v8633_v35 = vld [vmem:[%s12919_s3 + $0x36c] sm:$0xf]  ;;  %v8675_v7 = vld [vmem:[%s12921_s5 + $0xb8] sm:$0xff] }
 0x275   :  { %v8674_v9 = vld [vmem:[%s12921_s5 + $0xb0] sm:$0xff] }
 0x276   :  { %4950 = vmatpush.bf16.msrb.mxu0 %v7435_v54  ;;  %v3949_v22 = vadd.f32 %v3948_v45, %v3936_v34  ;;  %v12724_v45 = vld [vmem:[%s12920_s4] sm:$0xf]  ;;  %v7816_v34 = vld [vmem:[%s12919_s3 + $0x378] sm:$0xf0] }
 0x277   :  { %4963 = vmatpush.bf16.msrb.mxu1 %v7563_v6  ;;  %v4144_v27 = vperm.slane %v12724_v45, 2  ;;  %v4145_v58 = vperm.slane %v12724_v45, 3 }
 0x278   :  { %4976 = vmatpush.bf16.msrb.mxu2 %v7691_v41  ;;  %v8647_v41 = vld [vmem:[%s12919_s3 + $0x3d4] sm:$0xf0] }
 0x279   :  { %v7863_v26 = vor.u32 %v8647_v41, %v7862_v47  ;;  %v8621_v41 = vld [vmem:[%s12919_s3 + $0x30c] sm:$0xf] }
 0x27a   :  { %4951 = vmatpush.bf16.msrb.mxu0 %v7419_v46  ;;  %v7831_v46 = vor.u32 %v8639_v16, %v7830_v43 }
 0x27b   :  { %4964 = vmatpush.bf16.msrb.mxu1 %v7547_v48  ;;  %v4142_v48 = vperm.slane %v12724_v45, 0 }
 0x27c   :  { %4977 = vmatpush.bf16.msrb.mxu2 %v7675_v51 }
 0x27e   :  { %4952 = vmatpush.bf16.msrb.mxu0 %v7403_v63 }
 0x27f   :  { %4965 = vmatpush.bf16.msrb.mxu1 %v7531_v0 }
 0x280   :  { %4978 = vmatpush.bf16.msrb.mxu2 %v7659_v13  ;;  %v8623_v13 = vld [vmem:[%s12919_s3 + $0x314] sm:$0xf0] }
 0x281   :  { %v7767_v8 = vor.u32 %v8623_v13, %v7766_v4  ;;  %v8652_v4 = vld [vmem:[%s12921_s5] sm:$0xff] }
 0x282   :  { %4953 = vmatpush.bf16.msrb.mxu0 %v7387_v23  ;;  %v3961_v38 = vpop.f32.mrf.mxu0  ;;  %v8641_v23 = vld [vmem:[%s12919_s3 + $0x3ac] sm:$0xf] }
 0x283   :  { %4966 = vmatpush.bf16.msrb.mxu1 %v7515_v20  ;;  %v3974_v25 = vpop.f32.mrf.mxu1  ;;  %v3962_v37 = vadd.f32 %v3961_v38, %v3949_v22  ;;  %v7848_v20 = vld [vmem:[%s12919_s3 + $0x3b8] sm:$0xf0]  ;;  %v4143_v22 = vperm.slane %v12724_v45, 1  ;;  %v7819_v38 = vor.u32 %v8633_v35, %v7816_v34  ;;  %v8664_v45 = vld [vmem:[%s12921_s5 + $0x60] sm:$0xff]  ;;  %v8670_v35 = vld [vmem:[%s12921_s5 + $0x90] sm:$0xff] }
 0x284   :  { %4979 = vmatpush.bf16.msrb.mxu2 %v7643_v12  ;;  %v7851_v11 = vor.u32 %v8641_v23, %v7848_v20  ;;  %v8637_v12 = vld [vmem:[%s12919_s3 + $0x38c] sm:$0xf] }
 0x285   :  { %4954 = vmatmul.bf16.vlgmr.msrb.gmra.mxu0 %v12160_v17  ;;  %v3975_v60 = vadd.f32 %v3974_v25, %v3962_v37  ;;  %v7878_v17 = vld [vmem:[%s12919_s3 + $0x3e8] sm:$0xf]  ;;  %v7835_v2 = vor.u32 %v8637_v12, %v7832_v55  ;;  %v8660_v12 = vld [vmem:[%s12921_s5 + $0x40] sm:$0xff] }
 0x286   :  { %4967 = vmatmul.bf16.vlgmr.msrb.gmra.mxu1 %v12162_v29  ;;  %v8651_v29 = vld [vmem:[%s12919_s3 + $0x3f4] sm:$0xf0]  ;;  %v8661_v23 = vld [vmem:[%s12921_s5 + $0x48] sm:$0xff]  ;;  %v8672_v55 = vld [vmem:[%s12921_s5 + $0xa0] sm:$0xff] }
 0x287   :  { %4980 = vmatmul.bf16.vlgmr.msrb.gmra.mxu2 %v12164_v30  ;;  %v7879_v36 = vor.u32 %v8651_v29, %v7878_v17  ;;  %v8673_v20 = vld [vmem:[%s12921_s5 + $0xa8] sm:$0xff] }
 0x288   :  { %5292 = vmatpush.bf16.msra.mxu2 %v8675_v7 }
 0x28a   :  { %v3987_v14 = vpop.f32.mrf.mxu2  ;;  %v3963_v54 = vpop.f32.mrf.mxu0 }
 0x28b   :  { %v4000_v40 = vpop.f32.mrf.mxu3  ;;  %v3988_v31 = vadd.f32 %v3987_v14, %v3975_v60  ;;  %v3976_v6 = vpop.f32.mrf.mxu1  ;;  %v8629_v60 = vld [vmem:[%s12919_s3 + $0x34c] sm:$0xf]  ;;  %v7800_v14 = vld [vmem:[%s12919_s3 + $0x358] sm:$0xf0] }
 0x28c   :  { %v7803_v54 = vor.u32 %v8629_v60, %v7800_v14  ;;  %v8625_v6 = vld [vmem:[%s12919_s3 + $0x32c] sm:$0xf]  ;;  %5293 = vmatpush.bf16.msra.mxu2 %v8674_v9  ;;  %v8683_v60 = vld [vmem:[%s12921_s5 + $0xf8] sm:$0xff] }
 0x28d   :  { %v4001_v15 = vadd.f32 %v4000_v40, %v3988_v31 }
 0x28f   :  { %v4007_v30 = vmax.f32 %v4001_v15, 0.0  ;;  %v7784_v15 = vld [vmem:[%s12919_s3 + $0x338] sm:$0xf0] }
 0x290   :  { %v7787_v29 = vor.u32 %v8625_v6, %v7784_v15  ;;  %5294 = vmatpush.bf16.msra.mxu2 %v8673_v20 }
 0x291   :  { %v12700_v21 = vpack.c.bf16 %v4007_v30, %v4007_v30 }
 0x292   :  { %v3989_v42 = vpop.f32.mrf.mxu2 }
 0x293   :  { %v4002_v44 = vpop.f32.mrf.mxu3  ;;  %4837 = vmatmul.bf16.vlgmr.msra.gmra.mxu3 %v12700_v21  ;;  %v7768_v42 = vld [vmem:[%s12919_s3 + $0x318] sm:$0xf0] }
 0x294   :  { %4933 = vmatpush.bf16.msra.mxu3 %v7879_v36  ;;  %v7771_v44 = vor.u32 %v8621_v41, %v7768_v42  ;;  %5295 = vmatpush.bf16.msra.mxu2 %v8672_v55  ;;  %v8677_v42 = vld [vmem:[%s12921_s5 + $0xc8] sm:$0xff] }
 0x298   :  { %4934 = vmatpush.bf16.msra.mxu3 %v7863_v26 }
 0x29c   :  { %4935 = vmatpush.bf16.msra.mxu3 %v7847_v39 }
 0x2a0   :  { %4936 = vmatpush.bf16.msra.mxu3 %v7831_v46  ;;  %v8659_v46 = vld [vmem:[%s12921_s5 + $0x38] sm:$0xff] }
 0x2a1   :  { %5266 = vmatpush.bf16.msra.mxu0 %v8659_v46 }
 0x2a2   :  { %v4799_v49 = vpop.f32.mrf.mxu0 }
 0x2a3   :  { %v4800_v51 = vadd.f32 %v4799_v49, %v4142_v48  ;;  %v4812_v62 = vpop.f32.mrf.mxu1  ;;  %4889 = vmatmul.bf16.vlgmr.msrb.gmra.mxu3 %v12700_v21  ;;  %v8658_v48 = vld [vmem:[%s12921_s5 + $0x30] sm:$0xff] }
 0x2a4   :  { %4937 = vmatpush.bf16.msra.mxu3 %v7815_v50  ;;  %v8657_v50 = vld [vmem:[%s12921_s5 + $0x28] sm:$0xff] }
 0x2a5   :  { %v4813_v56 = vadd.f32 %v4812_v62, %v4800_v51  ;;  %5267 = vmatpush.bf16.msra.mxu0 %v8658_v48  ;;  %v8656_v51 = vld [vmem:[%s12921_s5 + $0x20] sm:$0xff]  ;;  %v8667_v62 = vld [vmem:[%s12921_s5 + $0x78] sm:$0xff] }
 0x2a6   :  { %5279 = vmatpush.bf16.msra.mxu1 %v8667_v62 }
 0x2a8   :  { %4938 = vmatpush.bf16.msra.mxu3 %v7799_v57  ;;  %v8654_v57 = vld [vmem:[%s12921_s5 + $0x10] sm:$0xff] }
 0x2a9   :  { %5268 = vmatpush.bf16.msra.mxu0 %v8657_v50 }
 0x2aa   :  { %v4825_v61 = vpop.f32.mrf.mxu2  ;;  %v4801_v0 = vpop.f32.mrf.mxu0  ;;  %5280 = vmatpush.bf16.msra.mxu1 %v8666_v53 }
 0x2ab   :  { %v12746_v63 = vadd.f32 %v4825_v61, %v4813_v56  ;;  %v4814_v3 = vpop.f32.mrf.mxu1  ;;  %v8655_v56 = vld [vmem:[%s12921_s5 + $0x18] sm:$0xff]  ;;  %v8665_v61 = vld [vmem:[%s12921_s5 + $0x68] sm:$0xff] }
 0x2ac   :  { %4939 = vmatpush.bf16.msra.mxu3 %v7783_v1 }
 0x2ad   :  { %5269 = vmatpush.bf16.msra.mxu0 %v8656_v51 }
 0x2ae   :  { %5281 = vmatpush.bf16.msra.mxu1 %v8665_v61 }
 0x2b0   :  { %4940 = vmatpush.bf16.msra.mxu3 %v7767_v8 }
 0x2b1   :  { %5270 = vmatpush.bf16.msra.mxu0 %v8655_v56 }
 0x2b2   :  { %v4827_v10 = vpop.f32.mrf.mxu2  ;;  %5282 = vmatpush.bf16.msra.mxu1 %v8664_v45 }
 0x2b3   :  { %4941 = vmatmul.bf16.vlgmr.msra.gmra.mxu3 %v12700_v21 }
 0x2b4   :  { %4985 = vmatpush.bf16.msrb.mxu3 %v7883_v18  ;;  %v8662_v18 = vld [vmem:[%s12921_s5 + $0x50] sm:$0xff] }
 0x2b5   :  { %5271 = vmatpush.bf16.msra.mxu0 %v8654_v57 }
 0x2b6   :  { %5283 = vmatpush.bf16.msra.mxu1 %v8663_v5 }
 0x2b8   :  { %4986 = vmatpush.bf16.msrb.mxu3 %v7867_v19 }
 0x2b9   :  { %5272 = vmatpush.bf16.msra.mxu0 %v8653_v59 }
 0x2ba   :  { %5284 = vmatpush.bf16.msra.mxu1 %v8662_v18 }
 0x2bc   :  { %4987 = vmatpush.bf16.msrb.mxu3 %v7851_v11 }
 0x2bd   :  { %5273 = vmatpush.bf16.msra.mxu0 %v8652_v4 }
 0x2be   :  { %5285 = vmatpush.bf16.msra.mxu1 %v8661_v23 }
 0x2c0   :  { %4988 = vmatpush.bf16.msrb.mxu3 %v7835_v2  ;;  %v8671_v2 = vld [vmem:[%s12921_s5 + $0x98] sm:$0xff] }
 0x2c1   :  { %5296 = vmatpush.bf16.msra.mxu2 %v8671_v2 }
 0x2c2   :  { %v4851_v25 = vpop.f32.mrf.mxu0  ;;  %5286 = vmatpush.bf16.msra.mxu1 %v8660_v12 }
 0x2c3   :  { %v4864_v37 = vpop.f32.mrf.mxu1  ;;  %v4852_v40 = vadd.f32 %v4851_v25, %v4143_v22  ;;  %v8669_v22 = vld [vmem:[%s12921_s5 + $0x88] sm:$0xff] }
 0x2c4   :  { %4989 = vmatpush.bf16.msrb.mxu3 %v7819_v38 }
 0x2c5   :  { %v4865_v31 = vadd.f32 %v4864_v37, %v4852_v40  ;;  %5297 = vmatpush.bf16.msra.mxu2 %v8670_v35  ;;  %v8668_v37 = vld [vmem:[%s12921_s5 + $0x80] sm:$0xff] }
 0x2c8   :  { %4990 = vmatpush.bf16.msrb.mxu3 %v7803_v54  ;;  %v8680_v54 = vld [vmem:[%s12921_s5 + $0xe0] sm:$0xff] }
 0x2c9   :  { %5298 = vmatpush.bf16.msra.mxu2 %v8669_v22 }
 0x2ca   :  { %v4877_v17 = vpop.f32.mrf.mxu2  ;;  %v4853_v36 = vpop.f32.mrf.mxu0 }
 0x2cb   :  { %v12798_v30 = vadd.f32 %v4877_v17, %v4865_v31  ;;  %v4866_v47 = vpop.f32.mrf.mxu1  ;;  %v8682_v31 = vld [vmem:[%s12921_s5 + $0xf0] sm:$0xff]  ;;  %v8679_v17 = vld [vmem:[%s12921_s5 + $0xd8] sm:$0xff] }
 0x2cc   :  { %4991 = vmatpush.bf16.msrb.mxu3 %v7787_v29  ;;  %v8678_v47 = vld [vmem:[%s12921_s5 + $0xd0] sm:$0xff] }
 0x2cd   :  { %5299 = vmatpush.bf16.msra.mxu2 %v8668_v37 }
 0x2d0   :  { %4992 = vmatpush.bf16.msrb.mxu3 %v7771_v44  ;;  %v8676_v44 = vld [vmem:[%s12921_s5 + $0xc0] sm:$0xff] }
 0x2d2   :  { %v4879_v26 = vpop.f32.mrf.mxu2 }
 0x2d3   :  { %4993 = vmatmul.bf16.vlgmr.msrb.gmra.mxu3 %v12700_v21 }
 0x2d4   :  { %5305 = vmatpush.bf16.msra.mxu3 %v8683_v60 }
 0x2d8   :  { %5306 = vmatpush.bf16.msra.mxu3 %v8682_v31 }
 0x2e2   :  { %v4903_v32 = vpop.f32.mrf.mxu0 }
 0x2e3   :  { %v4904_v39 = vadd.f32 %v4903_v32, %v4144_v27  ;;  %v4916_v43 = vpop.f32.mrf.mxu1 }
 0x2e5   :  { %v4917_v16 = vadd.f32 %v4916_v43, %v4904_v39 }
 0x2ea   :  { %v4929_v28 = vpop.f32.mrf.mxu2  ;;  %v4905_v49 = vpop.f32.mrf.mxu0 }
 0x2eb   :  { %v12814_v33 = vadd.f32 %v4929_v28, %v4917_v16  ;;  %v4918_v21 = vpop.f32.mrf.mxu1 }
 0x2f2   :  { %v4931_v52 = vpop.f32.mrf.mxu2 }
 0x302   :  { %v4955_v0 = vpop.f32.mrf.mxu0 }
 0x303   :  { %v4968_v1 = vpop.f32.mrf.mxu1  ;;  %v4956_v3 = vadd.f32 %v4955_v0, %v4145_v58 }
 0x305   :  { %v4969_v13 = vadd.f32 %v4968_v1, %v4956_v3 }
 0x30a   :  { %v4981_v8 = vpop.f32.mrf.mxu2  ;;  %v4957_v10 = vpop.f32.mrf.mxu0 }
 0x30b   :  { %v4982_v24 = vadd.f32 %v4981_v8, %v4969_v13  ;;  %v4970_v19 = vpop.f32.mrf.mxu1 }
 0x312   :  { %v4983_v11 = vpop.f32.mrf.mxu2 }
 0x316   :  { %v4838_v34 = vpop.f32.mrf.mxu3 }
 0x317   :  { %v4839_v38 = vadd.f32 %v4838_v34, %v12746_v63  ;;  %v8681_v63 = vld [vmem:[%s12921_s5 + $0xe8] sm:$0xff] }
 0x318   :  { %5307 = vmatpush.bf16.msra.mxu3 %v8681_v63 }
 0x319   :  { %v4998_v25 = vmax.f32 %v4839_v38, 0.0 }
 0x31b   :  { %v5002_v14 = vpack.c.bf16 %v4998_v25, %v4998_v25 }
 0x31c   :  { %5308 = vmatpush.bf16.msra.mxu3 %v8680_v54 }
 0x31d   :  { %5274 = vmatmul.bf16.vlgmr.msra.gmra.mxu0 %v5002_v14 }
 0x31e   :  { %v4840_v40 = vpop.f32.mrf.mxu3 }
 0x320   :  { %5309 = vmatpush.bf16.msra.mxu3 %v8679_v17 }
 0x324   :  { %5310 = vmatpush.bf16.msra.mxu3 %v8678_v47 }
 0x326   :  { %v4890_v6 = vpop.f32.mrf.mxu3 }
 0x327   :  { %v4891_v15 = vadd.f32 %v4890_v6, %v12798_v30 }
 0x328   :  { %5311 = vmatpush.bf16.msra.mxu3 %v8677_v42 }
 0x329   :  { %v4999_v29 = vmax.f32 %v4891_v15, 0.0 }
 0x32b   :  { %v5003_v36 = vpack.c.bf16 %v4999_v29, %v4999_v29 }
 0x32c   :  { %5312 = vmatpush.bf16.msra.mxu3 %v8676_v44 }
 0x32d   :  { %5287 = vmatmul.bf16.vlgmr.msra.gmra.mxu1 %v5003_v36 }
 0x32e   :  { %v4892_v41 = vpop.f32.mrf.mxu3 }
 0x336   :  { %v4942_v30 = vpop.f32.mrf.mxu3 }
 0x337   :  { %v4943_v26 = vadd.f32 %v4942_v30, %v12814_v33  ;;  %v8684_v33 = vld [vmem:[%s12922_s6] ss:$0 sm:$0xff] }
 0x339   :  { %v5000_v27 = vmax.f32 %v4943_v26, 0.0 }
 0x33b   :  { %v5004_v32 = vpack.c.bf16 %v5000_v27, %v5000_v27 }
 0x33d   :  { %5300 = vmatmul.bf16.vlgmr.msra.gmra.mxu2 %v5004_v32 }
 0x33e   :  { %v4944_v39 = vpop.f32.mrf.mxu3 }
 0x356   :  { %v4994_v43 = vpop.f32.mrf.mxu3 }
 0x357   :  { %v4995_v16 = vadd.f32 %v4994_v43, %v4982_v24 }
 0x359   :  { %v5001_v46 = vmax.f32 %v4995_v16, 0.0 }
 0x35b   :  { %v5005_v48 = vpack.c.bf16 %v5001_v46, %v5001_v46 }
 0x35d   :  { %5313 = vmatmul.bf16.vlgmr.msra.gmra.mxu3 %v5005_v48 }
 0x35e   :  { %v4996_v28 = vpop.f32.mrf.mxu3 }
 0x39a   :  { %v5275_v49 = vpop.f32.mrf.mxu0 }
 0x39b   :  { %v5276_v53 = vadd.f32 %v8684_v33, %v5275_v49 }
 0x3a2   :  { %v5277_v21 = vpop.f32.mrf.mxu0 }
 0x3aa   :  { %v5288_v50 = vpop.f32.mrf.mxu1 }
 0x3ab   :  { %v5289_v56 = vadd.f32 %v5288_v50, %v5276_v53 }
 0x3b2   :  { %v5290_v51 = vpop.f32.mrf.mxu1 }
 0x3c0   :  { %v5301_v62 = vpop.f32.mrf.mxu2 }
 0x3c1   :  { %v5302_v57 = vadd.f32 %v5301_v62, %v5289_v56 }
 0x3c8   :  { %v5303_v52 = vpop.f32.mrf.mxu2 }
 0x3e0   :  { %v5314_v58 = vpop.f32.mrf.mxu3 }
 0x3e1   :  { %v5315_v59 = vadd.f32 %v5314_v58, %v5302_v57 }
 0x3e3   :  { %5319 = vst.msk [vmem:[%s12923_s7] sm:$0xff] %vm5318_vm0, %v5315_v59 }
 0x3e8   :  { %v5316_v61 = vpop.f32.mrf.mxu3 }

</bundles_post_ra>
